<compile_context>
chip_gen: v7x
topology: tpu7x:2x2x1
jax: 0.10.0
libtpu: 0.0.40
codegen_flags: <defaults>
</compile_context>

<pallas_src>
import functools

import jax
import jax.numpy as jnp
from jax import lax
from jax.experimental import pallas as pl
from jax.experimental.pallas import tpu as pltpu


def _round_up(x, m):
    return (x + m - 1) // m * m


# ------------------------------ fused forward kernel ------------------------------ #
def _gru_classifier_kernel(*refs, num_layers, seq_len, bp, hp, unroll):
    """Fused multi-layer GRU + FC head.

    refs layout (inputs, output, scratch):
      [0]                  x_flat   (T*Bp, D)   time-major, batch-padded, flattened, f32
      [1+4l .. 1+4l+3]     layer l: W_ih (Din_p, 3Hp) bf16, W_hh (Hp, 3Hp) bf16,
                                     b_i (1, 3Hp) f32 (r/z biases pre-folded), b_hn (1, Hp) f32
      [1+4L], [2+4L]       fc_w (Hp, C) bf16, fc_b (1, C) f32
      [3+4L]               out (Bp, C) f32
      scratch:             gates (T*Bp, 3Hp) f32, [seq (T*Bp, Hp) f32 iff num_layers > 1]
    """
    n_in = 3 + 4 * num_layers
    x_ref = refs[0]
    layer_refs = refs[1:1 + 4 * num_layers]
    fc_w_ref = refs[1 + 4 * num_layers]
    fc_b_ref = refs[2 + 4 * num_layers]
    out_ref = refs[n_in]
    scratch = refs[n_in + 1:]
    gates_ref = scratch[0]
    seq_ref = scratch[1] if num_layers > 1 else None

    h_last = None
    for l in range(num_layers):
        w_ih, w_hh, b_i, b_hn = layer_refs[4 * l:4 * l + 4]

        # Hoisted input projection: ONE (T*Bp, Din) @ (Din, 3Hp) bf16 MXU matmul per layer,
        # completely off the serial recurrence path, plus a single fused bias pass.
        inp = (x_ref[...] if l == 0 else seq_ref[...]).astype(jnp.bfloat16)
        gates_ref[...] = (jnp.dot(inp, w_ih[...],
                                  preferred_element_type=jnp.float32)
                          + b_i[...])

        write_seq = (l + 1 < num_layers)        # the last layer's sequence is never needed
        b_hn_v = b_hn[...]                      # (1, Hp), hoisted out of the time loop

        def step(t, h, *, w_hh=w_hh, b_hn_v=b_hn_v, write_seq=write_seq):
            row = pl.multiple_of(t * bp, bp)                    # aligned sublane offset
            g = gates_ref[pl.ds(row, bp), :]                    # (Bp, 3Hp) f32
            # Single fused recurrent matmul on the serial critical path (bf16 MXU pass).
            hg = jnp.dot(h.astype(jnp.bfloat16), w_hh[...],
                         preferred_element_type=jnp.float32)    # (Bp, 3Hp) f32
            r = jax.nn.sigmoid(g[:, :hp] + hg[:, :hp])
            z = jax.nn.sigmoid(g[:, hp:2 * hp] + hg[:, hp:2 * hp])
            n = jnp.tanh(g[:, 2 * hp:] + r * (hg[:, 2 * hp:] + b_hn_v))
            h_new = (1.0 - z) * n + z * h
            if write_seq:
                seq_ref[pl.ds(row, bp), :] = h_new
            return h_new

        h0 = jnp.zeros((bp, hp), jnp.float32)
        # h stays vreg-resident as the loop carry; no per-step VMEM round-trip.
        h_last = lax.fori_loop(0, seq_len, step, h0, unroll=unroll)

    # FC head on the final hidden state of the last layer (== hn[-1]).
    out_ref[...] = (jnp.dot(h_last.astype(jnp.bfloat16), fc_w_ref[...],
                            preferred_element_type=jnp.float32)
                    + fc_b_ref[...]).astype(out_ref.dtype)


# ------------------------------ wrapper ------------------------------ #
def gru_classifier_forward(x, gru_params, fc_w, fc_b):
    """x: (B, T, input_dim) batch-first, like the PyTorch module. Returns (B, num_classes)."""
    B, T, D = x.shape
    L = len(gru_params)
    H = gru_params[0][1].shape[0]          # w_hh is (H, 3H)
    C = fc_w.shape[1]
    Bp = _round_up(B, 8)                   # sublane-aligned batch
    Hp = _round_up(H, 128)                 # lane-aligned (padded) hidden dim

    # (B,T,D) -> zero-pad batch -> time-major -> (T*Bp, D). Bp is a multiple of 8, so the
    # flattened layout matches the kernel's per-timestep contiguous (Bp, .) row blocks.
    x_p = jnp.pad(x.astype(jnp.float32), ((0, Bp - B), (0, 0), (0, 0)))
    x_flat = jnp.swapaxes(x_p, 0, 1).reshape(T * Bp, D)

    flat_params = []
    for l, (w_ih, w_hh, b_ih, b_hh) in enumerate(gru_params):
        din = w_ih.shape[0]
        din_p = din if l == 0 else Hp      # layer>0 consumes the Hp-padded sequence

        def split3(a):
            return a[:, :H], a[:, H:2 * H], a[:, 2 * H:]

        w_ir, w_iz, w_in = split3(w_ih)
        w_hr, w_hz, w_hn = split3(w_hh)
        b_ir, b_iz, b_in = split3(b_ih)
        b_hr, b_hz, b_hn = split3(b_hh)

        def pad_in(w):
            return jnp.pad(w, ((0, din_p - din), (0, Hp - H)))

        def pad_hh(w):
            return jnp.pad(w, ((0, Hp - H), (0, Hp - H)))

        def pad_b(b):
            return jnp.pad(b, ((0, 0), (0, Hp - H)))

        # Concatenated gate layout [r | z | n], each gate padded to Hp lanes.
        w_ih_cat = jnp.concatenate([pad_in(w_ir), pad_in(w_iz), pad_in(w_in)],
                                   axis=1).astype(jnp.bfloat16)
        w_hh_cat = jnp.concatenate([pad_hh(w_hr), pad_hh(w_hz), pad_hh(w_hn)],
                                   axis=1).astype(jnp.bfloat16)
        b_i_cat = jnp.concatenate([pad_b(b_ir + b_hr),      # r bias folded
                                   pad_b(b_iz + b_hz),      # z bias folded
                                   pad_b(b_in)],            # n input bias
                                  axis=1).astype(jnp.float32)
        b_hn_p = pad_b(b_hn).astype(jnp.float32)             # kept separate (multiplied by r)

        flat_params += [w_ih_cat, w_hh_cat, b_i_cat, b_hn_p]

    fc_w_p = jnp.pad(fc_w, ((0, Hp - H), (0, 0))).astype(jnp.bfloat16)
    fc_b_p = fc_b.astype(jnp.float32)

    # ---- VMEM footprint -> vmem_limit_bytes (instead of a hardcoded 32 MiB) ---- #
    def tile_bytes(shape, itemsize, sub=8):
        return _round_up(shape[0], sub) * _round_up(shape[1], 128) * itemsize

    fp = tile_bytes((T * Bp, D), 4)                                  # x_flat
    for l in range(L):
        din_p = D if l == 0 else Hp
        fp += tile_bytes((din_p, 3 * Hp), 2, sub=16)                 # W_ih bf16
        fp += tile_bytes((Hp, 3 * Hp), 2, sub=16)                    # W_hh bf16
        fp += tile_bytes((1, 3 * Hp), 4) + tile_bytes((1, Hp), 4)    # biases
    fp += tile_bytes((Hp, C), 2, sub=16) + tile_bytes((1, C), 4)     # fc
    fp += tile_bytes((Bp, C), 4)                                     # out
    fp += tile_bytes((T * Bp, 3 * Hp), 4)                            # gates scratch
    if L > 1:
        fp += tile_bytes((T * Bp, Hp), 4)                            # seq scratch
    vmem_limit = min(max(int(fp * 1.5) + (4 << 20), 16 << 20), 64 << 20)

    scratch_shapes = [pltpu.VMEM((T * Bp, 3 * Hp), jnp.float32)]     # fused gate projections
    if L > 1:
        scratch_shapes.append(pltpu.VMEM((T * Bp, Hp), jnp.float32))  # layer output sequence

    unroll = T if T <= 8 else 4            # full unroll only for short sequences

    kernel = functools.partial(_gru_classifier_kernel,
                               num_layers=L, seq_len=T, bp=Bp, hp=Hp, unroll=unroll)
    out_p = pl.pallas_call(
        kernel,
        out_shape=jax.ShapeDtypeStruct((Bp, C), jnp.float32),
        scratch_shapes=scratch_shapes,
        compiler_params=pltpu.CompilerParams(vmem_limit_bytes=vmem_limit),
    )(x_flat, *flat_params, fc_w_p, fc_b_p)
    return out_p[:B]


# ------------------------------ pure-JAX reference ------------------------------ #
def gru_classifier_ref(x, gru_params, fc_w, fc_b):
    B = x.shape[0]
    seq = x
    hi = jax.lax.Precision.HIGHEST
    for (w_ih, w_hh, b_ih, b_hh) in gru_params:
        H = w_hh.shape[0]

        def step(h, xt, w_ih=w_ih, w_hh=w_hh, b_ih=b_ih, b_hh=b_hh, H=H):
            gi = jnp.dot(xt, w_ih, precision=hi) + b_ih
            gh = jnp.dot(h, w_hh, precision=hi) + b_hh
            r = jax.nn.sigmoid(gi[:, :H] + gh[:, :H])
            z = jax.nn.sigmoid(gi[:, H:2 * H] + gh[:, H:2 * H])
            n = jnp.tanh(gi[:, 2 * H:] + r * gh[:, 2 * H:])
            h_new = (1.0 - z) * n + z * h
            return h_new, h_new

        h0 = jnp.zeros((B, H), jnp.float32)
        _, outs = jax.lax.scan(step, h0, jnp.swapaxes(seq, 0, 1))
        seq = jnp.swapaxes(outs, 0, 1)
    return jnp.dot(seq[:, -1, :], fc_w, precision=hi) + fc_b


# ------------------------------------ main ------------------------------------ #
if __name__ == "__main__":
    batch, seq_len = 2, 8
    input_dim, hidden_dim, num_layers, num_classes = 16, 32, 2, 4

    key = jax.random.PRNGKey(0)
    k_x, key = jax.random.split(key)
    x = jax.random.normal(k_x, (batch, seq_len, input_dim), dtype=jnp.float32)

    # Deterministic params matching PyTorch GRU/Linear shapes (stored transposed for
    # right-multiplication), gate order [r | z | n].
    bound = 1.0 / (hidden_dim ** 0.5)
    gru_params = []
    in_dim = input_dim
    for _ in range(num_layers):
        k1, k2, k3, k4, key = jax.random.split(key, 5)
        w_ih = jax.random.uniform(k1, (in_dim, 3 * hidden_dim), jnp.float32, -bound, bound)
        w_hh = jax.random.uniform(k2, (hidden_dim, 3 * hidden_dim), jnp.float32, -bound, bound)
        b_ih = jax.random.uniform(k3, (1, 3 * hidden_dim), jnp.float32, -bound, bound)
        b_hh = jax.random.uniform(k4, (1, 3 * hidden_dim), jnp.float32, -bound, bound)
        gru_params.append((w_ih, w_hh, b_ih, b_hh))
        in_dim = hidden_dim

    k5, k6, key = jax.random.split(key, 3)
    fc_w = jax.random.uniform(k5, (hidden_dim, num_classes), jnp.float32, -bound, bound)
    fc_b = jax.random.uniform(k6, (1, num_classes), jnp.float32, -bound, bound)

    fwd = jax.jit(gru_classifier_forward)
    out = jax.block_until_ready(fwd(x, gru_params, fc_w, fc_b))

    ref = jax.block_until_ready(gru_classifier_ref(x, gru_params, fc_w, fc_b))
    assert out.shape == (batch, num_classes)
    # bf16 MXU passes -> tolerance loosened vs the pure-f32 reference.
    assert jnp.allclose(out, ref, atol=5e-2, rtol=5e-2), "Pallas output mismatch vs reference"

    print("KERNEL_OK")
</pallas_src>

<mosaic_0001>
module attributes {stable_mosaic.version = 11 : i64} {
  func.func @_gru_classifier_kernel(%arg0: memref<64x16xf32, #tpu.memory_space<vmem>>, %arg1: memref<16x384xbf16, #tpu.memory_space<vmem>>, %arg2: memref<128x384xbf16, #tpu.memory_space<vmem>>, %arg3: memref<1x384xf32, #tpu.memory_space<vmem>>, %arg4: memref<1x128xf32, #tpu.memory_space<vmem>>, %arg5: memref<128x384xbf16, #tpu.memory_space<vmem>>, %arg6: memref<128x384xbf16, #tpu.memory_space<vmem>>, %arg7: memref<1x384xf32, #tpu.memory_space<vmem>>, %arg8: memref<1x128xf32, #tpu.memory_space<vmem>>, %arg9: memref<128x4xbf16, #tpu.memory_space<vmem>>, %arg10: memref<1x4xf32, #tpu.memory_space<vmem>>, %arg11: memref<8x4xf32, #tpu.memory_space<vmem>>, %arg12: memref<64x384xf32, #tpu.memory_space<vmem>>, %arg13: memref<64x128xf32, #tpu.memory_space<vmem>>) attributes {dimension_semantics = [], scalar_prefetch = 0 : i64, scratch_operands = 2 : i64, tpu.core_type = #tpu.core_type<tc>} {
    %c0 = arith.constant 0 : index
    %c0_0 = arith.constant 0 : index
    %0 = vector.load %arg0[%c0, %c0_0] : memref<64x16xf32, #tpu.memory_space<vmem>>, vector<64x16xf32>
    %1 = arith.truncf %0 : vector<64x16xf32> to vector<64x16xbf16>
    %c0_1 = arith.constant 0 : index
    %c0_2 = arith.constant 0 : index
    %2 = vector.load %arg1[%c0_1, %c0_2] : memref<16x384xbf16, #tpu.memory_space<vmem>>, vector<16x384xbf16>
    %cst = arith.constant dense<0.000000e+00> : vector<64x384xf32>
    %3 = tpu.matmul %1, %2, %cst {dimension_numbers = #tpu.dot_dimension_numbers<[1], [0], [0], [1], [0, 0, 1, 1], [], []>} : vector<64x16xbf16>, vector<16x384xbf16>, vector<64x384xf32> -> vector<64x384xf32>
    %c0_3 = arith.constant 0 : index
    %c0_4 = arith.constant 0 : index
    %4 = vector.load %arg3[%c0_3, %c0_4] : memref<1x384xf32, #tpu.memory_space<vmem>>, vector<1x384xf32>
    %5 = vector.broadcast %4 : vector<1x384xf32> to vector<64x384xf32>
    %6 = arith.addf %3, %5 : vector<64x384xf32>
    %c0_5 = arith.constant 0 : index
    %c0_6 = arith.constant 0 : index
    %7 = vector.load %arg12[%c0_5, %c0_6] : memref<64x384xf32, #tpu.memory_space<vmem>>, vector<64x384xf32>
    tpu.vector_store %arg12[%c0_5, %c0_6], %6 {strides = array<i32>} : memref<64x384xf32, #tpu.memory_space<vmem>>, vector<64x384xf32>,
    %c0_7 = arith.constant 0 : index
    %c0_8 = arith.constant 0 : index
    %8 = vector.load %arg4[%c0_7, %c0_8] : memref<1x128xf32, #tpu.memory_space<vmem>>, vector<1x128xf32>
    %cst_9 = arith.constant 0.000000e+00 : f32
    %9 = vector.broadcast %cst_9 : f32 to vector<8x128xf32>
    %c0_i32 = arith.constant 0 : i32
    %c8_i32 = arith.constant 8 : i32
    %10 = arith.muli %c0_i32, %c8_i32 : i32
    %11 = tpu.assume_multiple %10, 8 : i32
    %12 = arith.index_cast %11 : i32 to index
    %c0_10 = arith.constant 0 : index
    %13 = vector.load %arg12[%12, %c0_10] : memref<64x384xf32, #tpu.memory_space<vmem>>, vector<8x384xf32>
    %14 = arith.truncf %9 : vector<8x128xf32> to vector<8x128xbf16>
    %c0_11 = arith.constant 0 : index
    %c0_12 = arith.constant 0 : index
    %15 = vector.load %arg2[%c0_11, %c0_12] : memref<128x384xbf16, #tpu.memory_space<vmem>>, vector<128x384xbf16>
    %cst_13 = arith.constant dense<0.000000e+00> : vector<8x384xf32>
    %16 = tpu.matmul %14, %15, %cst_13 {dimension_numbers = #tpu.dot_dimension_numbers<[1], [0], [0], [1], [0, 0, 1, 1], [], []>} : vector<8x128xbf16>, vector<128x384xbf16>, vector<8x384xf32> -> vector<8x384xf32>
    %17 = vector.extract_strided_slice %13 {offsets = [0, 0], sizes = [8, 128], strides = [1, 1]} : vector<8x384xf32> to vector<8x128xf32>
    %18 = vector.extract_strided_slice %16 {offsets = [0, 0], sizes = [8, 128], strides = [1, 1]} : vector<8x384xf32> to vector<8x128xf32>
    %19 = arith.addf %17, %18 : vector<8x128xf32>
    %20 = arith.negf %19 : vector<8x128xf32>
    %21 = math.exp %20 : vector<8x128xf32>
    %cst_14 = arith.constant 1.000000e+00 : f32
    %22 = vector.broadcast %cst_14 : f32 to vector<8x128xf32>
    %23 = arith.addf %22, %21 : vector<8x128xf32>
    %24 = arith.divf %22, %23 : vector<8x128xf32>
    %25 = vector.extract_strided_slice %13 {offsets = [0, 128], sizes = [8, 128], strides = [1, 1]} : vector<8x384xf32> to vector<8x128xf32>
    %26 = vector.extract_strided_slice %16 {offsets = [0, 128], sizes = [8, 128], strides = [1, 1]} : vector<8x384xf32> to vector<8x128xf32>
    %27 = arith.addf %25, %26 : vector<8x128xf32>
    %28 = arith.negf %27 : vector<8x128xf32>
    %29 = math.exp %28 : vector<8x128xf32>
    %cst_15 = arith.constant 1.000000e+00 : f32
    %30 = vector.broadcast %cst_15 : f32 to vector<8x128xf32>
    %31 = arith.addf %30, %29 : vector<8x128xf32>
    %32 = arith.divf %30, %31 : vector<8x128xf32>
    %33 = vector.extract_strided_slice %13 {offsets = [0, 256], sizes = [8, 128], strides = [1, 1]} : vector<8x384xf32> to vector<8x128xf32>
    %34 = vector.extract_strided_slice %16 {offsets = [0, 256], sizes = [8, 128], strides = [1, 1]} : vector<8x384xf32> to vector<8x128xf32>
    %35 = vector.broadcast %8 : vector<1x128xf32> to vector<8x128xf32>
    %36 = arith.addf %34, %35 : vector<8x128xf32>
    %37 = arith.mulf %24, %36 : vector<8x128xf32>
    %38 = arith.addf %33, %37 : vector<8x128xf32>
    %39 = math.tanh %38 : vector<8x128xf32>
    %cst_16 = arith.constant 1.000000e+00 : f32
    %40 = vector.broadcast %cst_16 : f32 to vector<8x128xf32>
    %41 = arith.subf %40, %32 : vector<8x128xf32>
    %42 = arith.mulf %41, %39 : vector<8x128xf32>
    %43 = arith.mulf %32, %9 : vector<8x128xf32>
    %44 = arith.addf %42, %43 : vector<8x128xf32>
    %45 = arith.index_cast %11 : i32 to index
    %c0_17 = arith.constant 0 : index
    %46 = vector.load %arg13[%45, %c0_17] : memref<64x128xf32, #tpu.memory_space<vmem>>, vector<8x128xf32>
    tpu.vector_store %arg13[%45, %c0_17], %44 {strides = array<i32>} : memref<64x128xf32, #tpu.memory_space<vmem>>, vector<8x128xf32>,
    %c1_i32 = arith.constant 1 : i32
    %c8_i32_18 = arith.constant 8 : i32
    %47 = arith.muli %c1_i32, %c8_i32_18 : i32
    %48 = tpu.assume_multiple %47, 8 : i32
    %49 = arith.index_cast %48 : i32 to index
    %c0_19 = arith.constant 0 : index
    %50 = vector.load %arg12[%49, %c0_19] : memref<64x384xf32, #tpu.memory_space<vmem>>, vector<8x384xf32>
    %51 = arith.truncf %44 : vector<8x128xf32> to vector<8x128xbf16>
    %c0_20 = arith.constant 0 : index
    %c0_21 = arith.constant 0 : index
    %52 = vector.load %arg2[%c0_20, %c0_21] : memref<128x384xbf16, #tpu.memory_space<vmem>>, vector<128x384xbf16>
    %cst_22 = arith.constant dense<0.000000e+00> : vector<8x384xf32>
    %53 = tpu.matmul %51, %52, %cst_22 {dimension_numbers = #tpu.dot_dimension_numbers<[1], [0], [0], [1], [0, 0, 1, 1], [], []>} : vector<8x128xbf16>, vector<128x384xbf16>, vector<8x384xf32> -> vector<8x384xf32>
    %54 = vector.extract_strided_slice %50 {offsets = [0, 0], sizes = [8, 128], strides = [1, 1]} : vector<8x384xf32> to vector<8x128xf32>
    %55 = vector.extract_strided_slice %53 {offsets = [0, 0], sizes = [8, 128], strides = [1, 1]} : vector<8x384xf32> to vector<8x128xf32>
    %56 = arith.addf %54, %55 : vector<8x128xf32>
    %57 = arith.negf %56 : vector<8x128xf32>
    %58 = math.exp %57 : vector<8x128xf32>
    %cst_23 = arith.constant 1.000000e+00 : f32
    %59 = vector.broadcast %cst_23 : f32 to vector<8x128xf32>
    %60 = arith.addf %59, %58 : vector<8x128xf32>
    %61 = arith.divf %59, %60 : vector<8x128xf32>
    %62 = vector.extract_strided_slice %50 {offsets = [0, 128], sizes = [8, 128], strides = [1, 1]} : vector<8x384xf32> to vector<8x128xf32>
    %63 = vector.extract_strided_slice %53 {offsets = [0, 128], sizes = [8, 128], strides = [1, 1]} : vector<8x384xf32> to vector<8x128xf32>
    %64 = arith.addf %62, %63 : vector<8x128xf32>
    %65 = arith.negf %64 : vector<8x128xf32>
    %66 = math.exp %65 : vector<8x128xf32>
    %cst_24 = arith.constant 1.000000e+00 : f32
    %67 = vector.broadcast %cst_24 : f32 to vector<8x128xf32>
    %68 = arith.addf %67, %66 : vector<8x128xf32>
    %69 = arith.divf %67, %68 : vector<8x128xf32>
    %70 = vector.extract_strided_slice %50 {offsets = [0, 256], sizes = [8, 128], strides = [1, 1]} : vector<8x384xf32> to vector<8x128xf32>
    %71 = vector.extract_strided_slice %53 {offsets = [0, 256], sizes = [8, 128], strides = [1, 1]} : vector<8x384xf32> to vector<8x128xf32>
    %72 = vector.broadcast %8 : vector<1x128xf32> to vector<8x128xf32>
    %73 = arith.addf %71, %72 : vector<8x128xf32>
    %74 = arith.mulf %61, %73 : vector<8x128xf32>
    %75 = arith.addf %70, %74 : vector<8x128xf32>
    %76 = math.tanh %75 : vector<8x128xf32>
    %cst_25 = arith.constant 1.000000e+00 : f32
    %77 = vector.broadcast %cst_25 : f32 to vector<8x128xf32>
    %78 = arith.subf %77, %69 : vector<8x128xf32>
    %79 = arith.mulf %78, %76 : vector<8x128xf32>
    %80 = arith.mulf %69, %44 : vector<8x128xf32>
    %81 = arith.addf %79, %80 : vector<8x128xf32>
    %82 = arith.index_cast %48 : i32 to index
    %c0_26 = arith.constant 0 : index
    %83 = vector.load %arg13[%82, %c0_26] : memref<64x128xf32, #tpu.memory_space<vmem>>, vector<8x128xf32>
    tpu.vector_store %arg13[%82, %c0_26], %81 {strides = array<i32>} : memref<64x128xf32, #tpu.memory_space<vmem>>, vector<8x128xf32>,
    %c2_i32 = arith.constant 2 : i32
    %c8_i32_27 = arith.constant 8 : i32
    %84 = arith.muli %c2_i32, %c8_i32_27 : i32
    %85 = tpu.assume_multiple %84, 8 : i32
    %86 = arith.index_cast %85 : i32 to index
    %c0_28 = arith.constant 0 : index
    %87 = vector.load %arg12[%86, %c0_28] : memref<64x384xf32, #tpu.memory_space<vmem>>, vector<8x384xf32>
    %88 = arith.truncf %81 : vector<8x128xf32> to vector<8x128xbf16>
    %c0_29 = arith.constant 0 : index
    %c0_30 = arith.constant 0 : index
    %89 = vector.load %arg2[%c0_29, %c0_30] : memref<128x384xbf16, #tpu.memory_space<vmem>>, vector<128x384xbf16>
    %cst_31 = arith.constant dense<0.000000e+00> : vector<8x384xf32>
    %90 = tpu.matmul %88, %89, %cst_31 {dimension_numbers = #tpu.dot_dimension_numbers<[1], [0], [0], [1], [0, 0, 1, 1], [], []>} : vector<8x128xbf16>, vector<128x384xbf16>, vector<8x384xf32> -> vector<8x384xf32>
    %91 = vector.extract_strided_slice %87 {offsets = [0, 0], sizes = [8, 128], strides = [1, 1]} : vector<8x384xf32> to vector<8x128xf32>
    %92 = vector.extract_strided_slice %90 {offsets = [0, 0], sizes = [8, 128], strides = [1, 1]} : vector<8x384xf32> to vector<8x128xf32>
    %93 = arith.addf %91, %92 : vector<8x128xf32>
    %94 = arith.negf %93 : vector<8x128xf32>
    %95 = math.exp %94 : vector<8x128xf32>
    %cst_32 = arith.constant 1.000000e+00 : f32
    %96 = vector.broadcast %cst_32 : f32 to vector<8x128xf32>
    %97 = arith.addf %96, %95 : vector<8x128xf32>
    %98 = arith.divf %96, %97 : vector<8x128xf32>
    %99 = vector.extract_strided_slice %87 {offsets = [0, 128], sizes = [8, 128], strides = [1, 1]} : vector<8x384xf32> to vector<8x128xf32>
    %100 = vector.extract_strided_slice %90 {offsets = [0, 128], sizes = [8, 128], strides = [1, 1]} : vector<8x384xf32> to vector<8x128xf32>
    %101 = arith.addf %99, %100 : vector<8x128xf32>
    %102 = arith.negf %101 : vector<8x128xf32>
    %103 = math.exp %102 : vector<8x128xf32>
    %cst_33 = arith.constant 1.000000e+00 : f32
    %104 = vector.broadcast %cst_33 : f32 to vector<8x128xf32>
    %105 = arith.addf %104, %103 : vector<8x128xf32>
    %106 = arith.divf %104, %105 : vector<8x128xf32>
    %107 = vector.extract_strided_slice %87 {offsets = [0, 256], sizes = [8, 128], strides = [1, 1]} : vector<8x384xf32> to vector<8x128xf32>
    %108 = vector.extract_strided_slice %90 {offsets = [0, 256], sizes = [8, 128], strides = [1, 1]} : vector<8x384xf32> to vector<8x128xf32>
    %109 = vector.broadcast %8 : vector<1x128xf32> to vector<8x128xf32>
    %110 = arith.addf %108, %109 : vector<8x128xf32>
    %111 = arith.mulf %98, %110 : vector<8x128xf32>
    %112 = arith.addf %107, %111 : vector<8x128xf32>
    %113 = math.tanh %112 : vector<8x128xf32>
    %cst_34 = arith.constant 1.000000e+00 : f32
    %114 = vector.broadcast %cst_34 : f32 to vector<8x128xf32>
    %115 = arith.subf %114, %106 : vector<8x128xf32>
    %116 = arith.mulf %115, %113 : vector<8x128xf32>
    %117 = arith.mulf %106, %81 : vector<8x128xf32>
    %118 = arith.addf %116, %117 : vector<8x128xf32>
    %119 = arith.index_cast %85 : i32 to index
    %c0_35 = arith.constant 0 : index
    %120 = vector.load %arg13[%119, %c0_35] : memref<64x128xf32, #tpu.memory_space<vmem>>, vector<8x128xf32>
    tpu.vector_store %arg13[%119, %c0_35], %118 {strides = array<i32>} : memref<64x128xf32, #tpu.memory_space<vmem>>, vector<8x128xf32>,
    %c3_i32 = arith.constant 3 : i32
    %c8_i32_36 = arith.constant 8 : i32
    %121 = arith.muli %c3_i32, %c8_i32_36 : i32
    %122 = tpu.assume_multiple %121, 8 : i32
    %123 = arith.index_cast %122 : i32 to index
    %c0_37 = arith.constant 0 : index
    %124 = vector.load %arg12[%123, %c0_37] : memref<64x384xf32, #tpu.memory_space<vmem>>, vector<8x384xf32>
    %125 = arith.truncf %118 : vector<8x128xf32> to vector<8x128xbf16>
    %c0_38 = arith.constant 0 : index
    %c0_39 = arith.constant 0 : index
    %126 = vector.load %arg2[%c0_38, %c0_39] : memref<128x384xbf16, #tpu.memory_space<vmem>>, vector<128x384xbf16>
    %cst_40 = arith.constant dense<0.000000e+00> : vector<8x384xf32>
    %127 = tpu.matmul %125, %126, %cst_40 {dimension_numbers = #tpu.dot_dimension_numbers<[1], [0], [0], [1], [0, 0, 1, 1], [], []>} : vector<8x128xbf16>, vector<128x384xbf16>, vector<8x384xf32> -> vector<8x384xf32>
    %128 = vector.extract_strided_slice %124 {offsets = [0, 0], sizes = [8, 128], strides = [1, 1]} : vector<8x384xf32> to vector<8x128xf32>
    %129 = vector.extract_strided_slice %127 {offsets = [0, 0], sizes = [8, 128], strides = [1, 1]} : vector<8x384xf32> to vector<8x128xf32>
    %130 = arith.addf %128, %129 : vector<8x128xf32>
    %131 = arith.negf %130 : vector<8x128xf32>
    %132 = math.exp %131 : vector<8x128xf32>
    %cst_41 = arith.constant 1.000000e+00 : f32
    %133 = vector.broadcast %cst_41 : f32 to vector<8x128xf32>
    %134 = arith.addf %133, %132 : vector<8x128xf32>
    %135 = arith.divf %133, %134 : vector<8x128xf32>
    %136 = vector.extract_strided_slice %124 {offsets = [0, 128], sizes = [8, 128], strides = [1, 1]} : vector<8x384xf32> to vector<8x128xf32>
    %137 = vector.extract_strided_slice %127 {offsets = [0, 128], sizes = [8, 128], strides = [1, 1]} : vector<8x384xf32> to vector<8x128xf32>
    %138 = arith.addf %136, %137 : vector<8x128xf32>
    %139 = arith.negf %138 : vector<8x128xf32>
    %140 = math.exp %139 : vector<8x128xf32>
    %cst_42 = arith.constant 1.000000e+00 : f32
    %141 = vector.broadcast %cst_42 : f32 to vector<8x128xf32>
    %142 = arith.addf %141, %140 : vector<8x128xf32>
    %143 = arith.divf %141, %142 : vector<8x128xf32>
    %144 = vector.extract_strided_slice %124 {offsets = [0, 256], sizes = [8, 128], strides = [1, 1]} : vector<8x384xf32> to vector<8x128xf32>
    %145 = vector.extract_strided_slice %127 {offsets = [0, 256], sizes = [8, 128], strides = [1, 1]} : vector<8x384xf32> to vector<8x128xf32>
    %146 = vector.broadcast %8 : vector<1x128xf32> to vector<8x128xf32>
    %147 = arith.addf %145, %146 : vector<8x128xf32>
    %148 = arith.mulf %135, %147 : vector<8x128xf32>
    %149 = arith.addf %144, %148 : vector<8x128xf32>
    %150 = math.tanh %149 : vector<8x128xf32>
    %cst_43 = arith.constant 1.000000e+00 : f32
    %151 = vector.broadcast %cst_43 : f32 to vector<8x128xf32>
    %152 = arith.subf %151, %143 : vector<8x128xf32>
    %153 = arith.mulf %152, %150 : vector<8x128xf32>
    %154 = arith.mulf %143, %118 : vector<8x128xf32>
    %155 = arith.addf %153, %154 : vector<8x128xf32>
    %156 = arith.index_cast %122 : i32 to index
    %c0_44 = arith.constant 0 : index
    %157 = vector.load %arg13[%156, %c0_44] : memref<64x128xf32, #tpu.memory_space<vmem>>, vector<8x128xf32>
    tpu.vector_store %arg13[%156, %c0_44], %155 {strides = array<i32>} : memref<64x128xf32, #tpu.memory_space<vmem>>, vector<8x128xf32>,
    %c4_i32 = arith.constant 4 : i32
    %c8_i32_45 = arith.constant 8 : i32
    %158 = arith.muli %c4_i32, %c8_i32_45 : i32
    %159 = tpu.assume_multiple %158, 8 : i32
    %160 = arith.index_cast %159 : i32 to index
    %c0_46 = arith.constant 0 : index
    %161 = vector.load %arg12[%160, %c0_46] : memref<64x384xf32, #tpu.memory_space<vmem>>, vector<8x384xf32>
    %162 = arith.truncf %155 : vector<8x128xf32> to vector<8x128xbf16>
    %c0_47 = arith.constant 0 : index
    %c0_48 = arith.constant 0 : index
    %163 = vector.load %arg2[%c0_47, %c0_48] : memref<128x384xbf16, #tpu.memory_space<vmem>>, vector<128x384xbf16>
    %cst_49 = arith.constant dense<0.000000e+00> : vector<8x384xf32>
    %164 = tpu.matmul %162, %163, %cst_49 {dimension_numbers = #tpu.dot_dimension_numbers<[1], [0], [0], [1], [0, 0, 1, 1], [], []>} : vector<8x128xbf16>, vector<128x384xbf16>, vector<8x384xf32> -> vector<8x384xf32>
    %165 = vector.extract_strided_slice %161 {offsets = [0, 0], sizes = [8, 128], strides = [1, 1]} : vector<8x384xf32> to vector<8x128xf32>
    %166 = vector.extract_strided_slice %164 {offsets = [0, 0], sizes = [8, 128], strides = [1, 1]} : vector<8x384xf32> to vector<8x128xf32>
    %167 = arith.addf %165, %166 : vector<8x128xf32>
    %168 = arith.negf %167 : vector<8x128xf32>
    %169 = math.exp %168 : vector<8x128xf32>
    %cst_50 = arith.constant 1.000000e+00 : f32
    %170 = vector.broadcast %cst_50 : f32 to vector<8x128xf32>
    %171 = arith.addf %170, %169 : vector<8x128xf32>
    %172 = arith.divf %170, %171 : vector<8x128xf32>
    %173 = vector.extract_strided_slice %161 {offsets = [0, 128], sizes = [8, 128], strides = [1, 1]} : vector<8x384xf32> to vector<8x128xf32>
    %174 = vector.extract_strided_slice %164 {offsets = [0, 128], sizes = [8, 128], strides = [1, 1]} : vector<8x384xf32> to vector<8x128xf32>
    %175 = arith.addf %173, %174 : vector<8x128xf32>
    %176 = arith.negf %175 : vector<8x128xf32>
    %177 = math.exp %176 : vector<8x128xf32>
    %cst_51 = arith.constant 1.000000e+00 : f32
    %178 = vector.broadcast %cst_51 : f32 to vector<8x128xf32>
    %179 = arith.addf %178, %177 : vector<8x128xf32>
    %180 = arith.divf %178, %179 : vector<8x128xf32>
    %181 = vector.extract_strided_slice %161 {offsets = [0, 256], sizes = [8, 128], strides = [1, 1]} : vector<8x384xf32> to vector<8x128xf32>
    %182 = vector.extract_strided_slice %164 {offsets = [0, 256], sizes = [8, 128], strides = [1, 1]} : vector<8x384xf32> to vector<8x128xf32>
    %183 = vector.broadcast %8 : vector<1x128xf32> to vector<8x128xf32>
    %184 = arith.addf %182, %183 : vector<8x128xf32>
    %185 = arith.mulf %172, %184 : vector<8x128xf32>
    %186 = arith.addf %181, %185 : vector<8x128xf32>
    %187 = math.tanh %186 : vector<8x128xf32>
    %cst_52 = arith.constant 1.000000e+00 : f32
    %188 = vector.broadcast %cst_52 : f32 to vector<8x128xf32>
    %189 = arith.subf %188, %180 : vector<8x128xf32>
    %190 = arith.mulf %189, %187 : vector<8x128xf32>
    %191 = arith.mulf %180, %155 : vector<8x128xf32>
    %192 = arith.addf %190, %191 : vector<8x128xf32>
    %193 = arith.index_cast %159 : i32 to index
    %c0_53 = arith.constant 0 : index
    %194 = vector.load %arg13[%193, %c0_53] : memref<64x128xf32, #tpu.memory_space<vmem>>, vector<8x128xf32>
    tpu.vector_store %arg13[%193, %c0_53], %192 {strides = array<i32>} : memref<64x128xf32, #tpu.memory_space<vmem>>, vector<8x128xf32>,
    %c5_i32 = arith.constant 5 : i32
    %c8_i32_54 = arith.constant 8 : i32
    %195 = arith.muli %c5_i32, %c8_i32_54 : i32
    %196 = tpu.assume_multiple %195, 8 : i32
    %197 = arith.index_cast %196 : i32 to index
    %c0_55 = arith.constant 0 : index
    %198 = vector.load %arg12[%197, %c0_55] : memref<64x384xf32, #tpu.memory_space<vmem>>, vector<8x384xf32>
    %199 = arith.truncf %192 : vector<8x128xf32> to vector<8x128xbf16>
    %c0_56 = arith.constant 0 : index
    %c0_57 = arith.constant 0 : index
    %200 = vector.load %arg2[%c0_56, %c0_57] : memref<128x384xbf16, #tpu.memory_space<vmem>>, vector<128x384xbf16>
    %cst_58 = arith.constant dense<0.000000e+00> : vector<8x384xf32>
    %201 = tpu.matmul %199, %200, %cst_58 {dimension_numbers = #tpu.dot_dimension_numbers<[1], [0], [0], [1], [0, 0, 1, 1], [], []>} : vector<8x128xbf16>, vector<128x384xbf16>, vector<8x384xf32> -> vector<8x384xf32>
    %202 = vector.extract_strided_slice %198 {offsets = [0, 0], sizes = [8, 128], strides = [1, 1]} : vector<8x384xf32> to vector<8x128xf32>
    %203 = vector.extract_strided_slice %201 {offsets = [0, 0], sizes = [8, 128], strides = [1, 1]} : vector<8x384xf32> to vector<8x128xf32>
    %204 = arith.addf %202, %203 : vector<8x128xf32>
    %205 = arith.negf %204 : vector<8x128xf32>
    %206 = math.exp %205 : vector<8x128xf32>
    %cst_59 = arith.constant 1.000000e+00 : f32
    %207 = vector.broadcast %cst_59 : f32 to vector<8x128xf32>
    %208 = arith.addf %207, %206 : vector<8x128xf32>
    %209 = arith.divf %207, %208 : vector<8x128xf32>
    %210 = vector.extract_strided_slice %198 {offsets = [0, 128], sizes = [8, 128], strides = [1, 1]} : vector<8x384xf32> to vector<8x128xf32>
    %211 = vector.extract_strided_slice %201 {offsets = [0, 128], sizes = [8, 128], strides = [1, 1]} : vector<8x384xf32> to vector<8x128xf32>
    %212 = arith.addf %210, %211 : vector<8x128xf32>
    %213 = arith.negf %212 : vector<8x128xf32>
    %214 = math.exp %213 : vector<8x128xf32>
    %cst_60 = arith.constant 1.000000e+00 : f32
    %215 = vector.broadcast %cst_60 : f32 to vector<8x128xf32>
    %216 = arith.addf %215, %214 : vector<8x128xf32>
    %217 = arith.divf %215, %216 : vector<8x128xf32>
    %218 = vector.extract_strided_slice %198 {offsets = [0, 256], sizes = [8, 128], strides = [1, 1]} : vector<8x384xf32> to vector<8x128xf32>
    %219 = vector.extract_strided_slice %201 {offsets = [0, 256], sizes = [8, 128], strides = [1, 1]} : vector<8x384xf32> to vector<8x128xf32>
    %220 = vector.broadcast %8 : vector<1x128xf32> to vector<8x128xf32>
    %221 = arith.addf %219, %220 : vector<8x128xf32>
    %222 = arith.mulf %209, %221 : vector<8x128xf32>
    %223 = arith.addf %218, %222 : vector<8x128xf32>
    %224 = math.tanh %223 : vector<8x128xf32>
    %cst_61 = arith.constant 1.000000e+00 : f32
    %225 = vector.broadcast %cst_61 : f32 to vector<8x128xf32>
    %226 = arith.subf %225, %217 : vector<8x128xf32>
    %227 = arith.mulf %226, %224 : vector<8x128xf32>
    %228 = arith.mulf %217, %192 : vector<8x128xf32>
    %229 = arith.addf %227, %228 : vector<8x128xf32>
    %230 = arith.index_cast %196 : i32 to index
    %c0_62 = arith.constant 0 : index
    %231 = vector.load %arg13[%230, %c0_62] : memref<64x128xf32, #tpu.memory_space<vmem>>, vector<8x128xf32>
    tpu.vector_store %arg13[%230, %c0_62], %229 {strides = array<i32>} : memref<64x128xf32, #tpu.memory_space<vmem>>, vector<8x128xf32>,
    %c6_i32 = arith.constant 6 : i32
    %c8_i32_63 = arith.constant 8 : i32
    %232 = arith.muli %c6_i32, %c8_i32_63 : i32
    %233 = tpu.assume_multiple %232, 8 : i32
    %234 = arith.index_cast %233 : i32 to index
    %c0_64 = arith.constant 0 : index
    %235 = vector.load %arg12[%234, %c0_64] : memref<64x384xf32, #tpu.memory_space<vmem>>, vector<8x384xf32>
    %236 = arith.truncf %229 : vector<8x128xf32> to vector<8x128xbf16>
    %c0_65 = arith.constant 0 : index
    %c0_66 = arith.constant 0 : index
    %237 = vector.load %arg2[%c0_65, %c0_66] : memref<128x384xbf16, #tpu.memory_space<vmem>>, vector<128x384xbf16>
    %cst_67 = arith.constant dense<0.000000e+00> : vector<8x384xf32>
    %238 = tpu.matmul %236, %237, %cst_67 {dimension_numbers = #tpu.dot_dimension_numbers<[1], [0], [0], [1], [0, 0, 1, 1], [], []>} : vector<8x128xbf16>, vector<128x384xbf16>, vector<8x384xf32> -> vector<8x384xf32>
    %239 = vector.extract_strided_slice %235 {offsets = [0, 0], sizes = [8, 128], strides = [1, 1]} : vector<8x384xf32> to vector<8x128xf32>
    %240 = vector.extract_strided_slice %238 {offsets = [0, 0], sizes = [8, 128], strides = [1, 1]} : vector<8x384xf32> to vector<8x128xf32>
    %241 = arith.addf %239, %240 : vector<8x128xf32>
    %242 = arith.negf %241 : vector<8x128xf32>
    %243 = math.exp %242 : vector<8x128xf32>
    %cst_68 = arith.constant 1.000000e+00 : f32
    %244 = vector.broadcast %cst_68 : f32 to vector<8x128xf32>
    %245 = arith.addf %244, %243 : vector<8x128xf32>
    %246 = arith.divf %244, %245 : vector<8x128xf32>
    %247 = vector.extract_strided_slice %235 {offsets = [0, 128], sizes = [8, 128], strides = [1, 1]} : vector<8x384xf32> to vector<8x128xf32>
    %248 = vector.extract_strided_slice %238 {offsets = [0, 128], sizes = [8, 128], strides = [1, 1]} : vector<8x384xf32> to vector<8x128xf32>
    %249 = arith.addf %247, %248 : vector<8x128xf32>
    %250 = arith.negf %249 : vector<8x128xf32>
    %251 = math.exp %250 : vector<8x128xf32>
    %cst_69 = arith.constant 1.000000e+00 : f32
    %252 = vector.broadcast %cst_69 : f32 to vector<8x128xf32>
    %253 = arith.addf %252, %251 : vector<8x128xf32>
    %254 = arith.divf %252, %253 : vector<8x128xf32>
    %255 = vector.extract_strided_slice %235 {offsets = [0, 256], sizes = [8, 128], strides = [1, 1]} : vector<8x384xf32> to vector<8x128xf32>
    %256 = vector.extract_strided_slice %238 {offsets = [0, 256], sizes = [8, 128], strides = [1, 1]} : vector<8x384xf32> to vector<8x128xf32>
    %257 = vector.broadcast %8 : vector<1x128xf32> to vector<8x128xf32>
    %258 = arith.addf %256, %257 : vector<8x128xf32>
    %259 = arith.mulf %246, %258 : vector<8x128xf32>
    %260 = arith.addf %255, %259 : vector<8x128xf32>
    %261 = math.tanh %260 : vector<8x128xf32>
    %cst_70 = arith.constant 1.000000e+00 : f32
    %262 = vector.broadcast %cst_70 : f32 to vector<8x128xf32>
    %263 = arith.subf %262, %254 : vector<8x128xf32>
    %264 = arith.mulf %263, %261 : vector<8x128xf32>
    %265 = arith.mulf %254, %229 : vector<8x128xf32>
    %266 = arith.addf %264, %265 : vector<8x128xf32>
    %267 = arith.index_cast %233 : i32 to index
    %c0_71 = arith.constant 0 : index
    %268 = vector.load %arg13[%267, %c0_71] : memref<64x128xf32, #tpu.memory_space<vmem>>, vector<8x128xf32>
    tpu.vector_store %arg13[%267, %c0_71], %266 {strides = array<i32>} : memref<64x128xf32, #tpu.memory_space<vmem>>, vector<8x128xf32>,
    %c7_i32 = arith.constant 7 : i32
    %c8_i32_72 = arith.constant 8 : i32
    %269 = arith.muli %c7_i32, %c8_i32_72 : i32
    %270 = tpu.assume_multiple %269, 8 : i32
    %271 = arith.index_cast %270 : i32 to index
    %c0_73 = arith.constant 0 : index
    %272 = vector.load %arg12[%271, %c0_73] : memref<64x384xf32, #tpu.memory_space<vmem>>, vector<8x384xf32>
    %273 = arith.truncf %266 : vector<8x128xf32> to vector<8x128xbf16>
    %c0_74 = arith.constant 0 : index
    %c0_75 = arith.constant 0 : index
    %274 = vector.load %arg2[%c0_74, %c0_75] : memref<128x384xbf16, #tpu.memory_space<vmem>>, vector<128x384xbf16>
    %cst_76 = arith.constant dense<0.000000e+00> : vector<8x384xf32>
    %275 = tpu.matmul %273, %274, %cst_76 {dimension_numbers = #tpu.dot_dimension_numbers<[1], [0], [0], [1], [0, 0, 1, 1], [], []>} : vector<8x128xbf16>, vector<128x384xbf16>, vector<8x384xf32> -> vector<8x384xf32>
    %276 = vector.extract_strided_slice %272 {offsets = [0, 0], sizes = [8, 128], strides = [1, 1]} : vector<8x384xf32> to vector<8x128xf32>
    %277 = vector.extract_strided_slice %275 {offsets = [0, 0], sizes = [8, 128], strides = [1, 1]} : vector<8x384xf32> to vector<8x128xf32>
    %278 = arith.addf %276, %277 : vector<8x128xf32>
    %279 = arith.negf %278 : vector<8x128xf32>
    %280 = math.exp %279 : vector<8x128xf32>
    %cst_77 = arith.constant 1.000000e+00 : f32
    %281 = vector.broadcast %cst_77 : f32 to vector<8x128xf32>
    %282 = arith.addf %281, %280 : vector<8x128xf32>
    %283 = arith.divf %281, %282 : vector<8x128xf32>
    %284 = vector.extract_strided_slice %272 {offsets = [0, 128], sizes = [8, 128], strides = [1, 1]} : vector<8x384xf32> to vector<8x128xf32>
    %285 = vector.extract_strided_slice %275 {offsets = [0, 128], sizes = [8, 128], strides = [1, 1]} : vector<8x384xf32> to vector<8x128xf32>
    %286 = arith.addf %284, %285 : vector<8x128xf32>
    %287 = arith.negf %286 : vector<8x128xf32>
    %288 = math.exp %287 : vector<8x128xf32>
    %cst_78 = arith.constant 1.000000e+00 : f32
    %289 = vector.broadcast %cst_78 : f32 to vector<8x128xf32>
    %290 = arith.addf %289, %288 : vector<8x128xf32>
    %291 = arith.divf %289, %290 : vector<8x128xf32>
    %292 = vector.extract_strided_slice %272 {offsets = [0, 256], sizes = [8, 128], strides = [1, 1]} : vector<8x384xf32> to vector<8x128xf32>
    %293 = vector.extract_strided_slice %275 {offsets = [0, 256], sizes = [8, 128], strides = [1, 1]} : vector<8x384xf32> to vector<8x128xf32>
    %294 = vector.broadcast %8 : vector<1x128xf32> to vector<8x128xf32>
    %295 = arith.addf %293, %294 : vector<8x128xf32>
    %296 = arith.mulf %283, %295 : vector<8x128xf32>
    %297 = arith.addf %292, %296 : vector<8x128xf32>
    %298 = math.tanh %297 : vector<8x128xf32>
    %cst_79 = arith.constant 1.000000e+00 : f32
    %299 = vector.broadcast %cst_79 : f32 to vector<8x128xf32>
    %300 = arith.subf %299, %291 : vector<8x128xf32>
    %301 = arith.mulf %300, %298 : vector<8x128xf32>
    %302 = arith.mulf %291, %266 : vector<8x128xf32>
    %303 = arith.addf %301, %302 : vector<8x128xf32>
    %304 = arith.index_cast %270 : i32 to index
    %c0_80 = arith.constant 0 : index
    %305 = vector.load %arg13[%304, %c0_80] : memref<64x128xf32, #tpu.memory_space<vmem>>, vector<8x128xf32>
    tpu.vector_store %arg13[%304, %c0_80], %303 {strides = array<i32>} : memref<64x128xf32, #tpu.memory_space<vmem>>, vector<8x128xf32>,
    %c8_i32_81 = arith.constant 8 : i32
    %c0_82 = arith.constant 0 : index
    %c0_83 = arith.constant 0 : index
    %306 = vector.load %arg13[%c0_82, %c0_83] : memref<64x128xf32, #tpu.memory_space<vmem>>, vector<64x128xf32>
    %307 = arith.truncf %306 : vector<64x128xf32> to vector<64x128xbf16>
    %c0_84 = arith.constant 0 : index
    %c0_85 = arith.constant 0 : index
    %308 = vector.load %arg5[%c0_84, %c0_85] : memref<128x384xbf16, #tpu.memory_space<vmem>>, vector<128x384xbf16>
    %cst_86 = arith.constant dense<0.000000e+00> : vector<64x384xf32>
    %309 = tpu.matmul %307, %308, %cst_86 {dimension_numbers = #tpu.dot_dimension_numbers<[1], [0], [0], [1], [0, 0, 1, 1], [], []>} : vector<64x128xbf16>, vector<128x384xbf16>, vector<64x384xf32> -> vector<64x384xf32>
    %c0_87 = arith.constant 0 : index
    %c0_88 = arith.constant 0 : index
    %310 = vector.load %arg7[%c0_87, %c0_88] : memref<1x384xf32, #tpu.memory_space<vmem>>, vector<1x384xf32>
    %311 = vector.broadcast %310 : vector<1x384xf32> to vector<64x384xf32>
    %312 = arith.addf %309, %311 : vector<64x384xf32>
    %c0_89 = arith.constant 0 : index
    %c0_90 = arith.constant 0 : index
    %313 = vector.load %arg12[%c0_89, %c0_90] : memref<64x384xf32, #tpu.memory_space<vmem>>, vector<64x384xf32>
    tpu.vector_store %arg12[%c0_89, %c0_90], %312 {strides = array<i32>} : memref<64x384xf32, #tpu.memory_space<vmem>>, vector<64x384xf32>,
    %c0_91 = arith.constant 0 : index
    %c0_92 = arith.constant 0 : index
    %314 = vector.load %arg8[%c0_91, %c0_92] : memref<1x128xf32, #tpu.memory_space<vmem>>, vector<1x128xf32>
    %cst_93 = arith.constant 0.000000e+00 : f32
    %315 = vector.broadcast %cst_93 : f32 to vector<8x128xf32>
    %c0_i32_94 = arith.constant 0 : i32
    %c8_i32_95 = arith.constant 8 : i32
    %316 = arith.muli %c0_i32_94, %c8_i32_95 : i32
    %317 = tpu.assume_multiple %316, 8 : i32
    %318 = arith.index_cast %317 : i32 to index
    %c0_96 = arith.constant 0 : index
    %319 = vector.load %arg12[%318, %c0_96] : memref<64x384xf32, #tpu.memory_space<vmem>>, vector<8x384xf32>
    %320 = arith.truncf %315 : vector<8x128xf32> to vector<8x128xbf16>
    %c0_97 = arith.constant 0 : index
    %c0_98 = arith.constant 0 : index
    %321 = vector.load %arg6[%c0_97, %c0_98] : memref<128x384xbf16, #tpu.memory_space<vmem>>, vector<128x384xbf16>
    %cst_99 = arith.constant dense<0.000000e+00> : vector<8x384xf32>
    %322 = tpu.matmul %320, %321, %cst_99 {dimension_numbers = #tpu.dot_dimension_numbers<[1], [0], [0], [1], [0, 0, 1, 1], [], []>} : vector<8x128xbf16>, vector<128x384xbf16>, vector<8x384xf32> -> vector<8x384xf32>
    %323 = vector.extract_strided_slice %319 {offsets = [0, 0], sizes = [8, 128], strides = [1, 1]} : vector<8x384xf32> to vector<8x128xf32>
    %324 = vector.extract_strided_slice %322 {offsets = [0, 0], sizes = [8, 128], strides = [1, 1]} : vector<8x384xf32> to vector<8x128xf32>
    %325 = arith.addf %323, %324 : vector<8x128xf32>
    %326 = arith.negf %325 : vector<8x128xf32>
    %327 = math.exp %326 : vector<8x128xf32>
    %cst_100 = arith.constant 1.000000e+00 : f32
    %328 = vector.broadcast %cst_100 : f32 to vector<8x128xf32>
    %329 = arith.addf %328, %327 : vector<8x128xf32>
    %330 = arith.divf %328, %329 : vector<8x128xf32>
    %331 = vector.extract_strided_slice %319 {offsets = [0, 128], sizes = [8, 128], strides = [1, 1]} : vector<8x384xf32> to vector<8x128xf32>
    %332 = vector.extract_strided_slice %322 {offsets = [0, 128], sizes = [8, 128], strides = [1, 1]} : vector<8x384xf32> to vector<8x128xf32>
    %333 = arith.addf %331, %332 : vector<8x128xf32>
    %334 = arith.negf %333 : vector<8x128xf32>
    %335 = math.exp %334 : vector<8x128xf32>
    %cst_101 = arith.constant 1.000000e+00 : f32
    %336 = vector.broadcast %cst_101 : f32 to vector<8x128xf32>
    %337 = arith.addf %336, %335 : vector<8x128xf32>
    %338 = arith.divf %336, %337 : vector<8x128xf32>
    %339 = vector.extract_strided_slice %319 {offsets = [0, 256], sizes = [8, 128], strides = [1, 1]} : vector<8x384xf32> to vector<8x128xf32>
    %340 = vector.extract_strided_slice %322 {offsets = [0, 256], sizes = [8, 128], strides = [1, 1]} : vector<8x384xf32> to vector<8x128xf32>
    %341 = vector.broadcast %314 : vector<1x128xf32> to vector<8x128xf32>
    %342 = arith.addf %340, %341 : vector<8x128xf32>
    %343 = arith.mulf %330, %342 : vector<8x128xf32>
    %344 = arith.addf %339, %343 : vector<8x128xf32>
    %345 = math.tanh %344 : vector<8x128xf32>
    %cst_102 = arith.constant 1.000000e+00 : f32
    %346 = vector.broadcast %cst_102 : f32 to vector<8x128xf32>
    %347 = arith.subf %346, %338 : vector<8x128xf32>
    %348 = arith.mulf %347, %345 : vector<8x128xf32>
    %349 = arith.mulf %338, %315 : vector<8x128xf32>
    %350 = arith.addf %348, %349 : vector<8x128xf32>
    %c1_i32_103 = arith.constant 1 : i32
    %c8_i32_104 = arith.constant 8 : i32
    %351 = arith.muli %c1_i32_103, %c8_i32_104 : i32
    %352 = tpu.assume_multiple %351, 8 : i32
    %353 = arith.index_cast %352 : i32 to index
    %c0_105 = arith.constant 0 : index
    %354 = vector.load %arg12[%353, %c0_105] : memref<64x384xf32, #tpu.memory_space<vmem>>, vector<8x384xf32>
    %355 = arith.truncf %350 : vector<8x128xf32> to vector<8x128xbf16>
    %c0_106 = arith.constant 0 : index
    %c0_107 = arith.constant 0 : index
    %356 = vector.load %arg6[%c0_106, %c0_107] : memref<128x384xbf16, #tpu.memory_space<vmem>>, vector<128x384xbf16>
    %cst_108 = arith.constant dense<0.000000e+00> : vector<8x384xf32>
    %357 = tpu.matmul %355, %356, %cst_108 {dimension_numbers = #tpu.dot_dimension_numbers<[1], [0], [0], [1], [0, 0, 1, 1], [], []>} : vector<8x128xbf16>, vector<128x384xbf16>, vector<8x384xf32> -> vector<8x384xf32>
    %358 = vector.extract_strided_slice %354 {offsets = [0, 0], sizes = [8, 128], strides = [1, 1]} : vector<8x384xf32> to vector<8x128xf32>
    %359 = vector.extract_strided_slice %357 {offsets = [0, 0], sizes = [8, 128], strides = [1, 1]} : vector<8x384xf32> to vector<8x128xf32>
    %360 = arith.addf %358, %359 : vector<8x128xf32>
    %361 = arith.negf %360 : vector<8x128xf32>
    %362 = math.exp %361 : vector<8x128xf32>
    %cst_109 = arith.constant 1.000000e+00 : f32
    %363 = vector.broadcast %cst_109 : f32 to vector<8x128xf32>
    %364 = arith.addf %363, %362 : vector<8x128xf32>
    %365 = arith.divf %363, %364 : vector<8x128xf32>
    %366 = vector.extract_strided_slice %354 {offsets = [0, 128], sizes = [8, 128], strides = [1, 1]} : vector<8x384xf32> to vector<8x128xf32>
    %367 = vector.extract_strided_slice %357 {offsets = [0, 128], sizes = [8, 128], strides = [1, 1]} : vector<8x384xf32> to vector<8x128xf32>
    %368 = arith.addf %366, %367 : vector<8x128xf32>
    %369 = arith.negf %368 : vector<8x128xf32>
    %370 = math.exp %369 : vector<8x128xf32>
    %cst_110 = arith.constant 1.000000e+00 : f32
    %371 = vector.broadcast %cst_110 : f32 to vector<8x128xf32>
    %372 = arith.addf %371, %370 : vector<8x128xf32>
    %373 = arith.divf %371, %372 : vector<8x128xf32>
    %374 = vector.extract_strided_slice %354 {offsets = [0, 256], sizes = [8, 128], strides = [1, 1]} : vector<8x384xf32> to vector<8x128xf32>
    %375 = vector.extract_strided_slice %357 {offsets = [0, 256], sizes = [8, 128], strides = [1, 1]} : vector<8x384xf32> to vector<8x128xf32>
    %376 = vector.broadcast %314 : vector<1x128xf32> to vector<8x128xf32>
    %377 = arith.addf %375, %376 : vector<8x128xf32>
    %378 = arith.mulf %365, %377 : vector<8x128xf32>
    %379 = arith.addf %374, %378 : vector<8x128xf32>
    %380 = math.tanh %379 : vector<8x128xf32>
    %cst_111 = arith.constant 1.000000e+00 : f32
    %381 = vector.broadcast %cst_111 : f32 to vector<8x128xf32>
    %382 = arith.subf %381, %373 : vector<8x128xf32>
    %383 = arith.mulf %382, %380 : vector<8x128xf32>
    %384 = arith.mulf %373, %350 : vector<8x128xf32>
    %385 = arith.addf %383, %384 : vector<8x128xf32>
    %c2_i32_112 = arith.constant 2 : i32
    %c8_i32_113 = arith.constant 8 : i32
    %386 = arith.muli %c2_i32_112, %c8_i32_113 : i32
    %387 = tpu.assume_multiple %386, 8 : i32
    %388 = arith.index_cast %387 : i32 to index
    %c0_114 = arith.constant 0 : index
    %389 = vector.load %arg12[%388, %c0_114] : memref<64x384xf32, #tpu.memory_space<vmem>>, vector<8x384xf32>
    %390 = arith.truncf %385 : vector<8x128xf32> to vector<8x128xbf16>
    %c0_115 = arith.constant 0 : index
    %c0_116 = arith.constant 0 : index
    %391 = vector.load %arg6[%c0_115, %c0_116] : memref<128x384xbf16, #tpu.memory_space<vmem>>, vector<128x384xbf16>
    %cst_117 = arith.constant dense<0.000000e+00> : vector<8x384xf32>
    %392 = tpu.matmul %390, %391, %cst_117 {dimension_numbers = #tpu.dot_dimension_numbers<[1], [0], [0], [1], [0, 0, 1, 1], [], []>} : vector<8x128xbf16>, vector<128x384xbf16>, vector<8x384xf32> -> vector<8x384xf32>
    %393 = vector.extract_strided_slice %389 {offsets = [0, 0], sizes = [8, 128], strides = [1, 1]} : vector<8x384xf32> to vector<8x128xf32>
    %394 = vector.extract_strided_slice %392 {offsets = [0, 0], sizes = [8, 128], strides = [1, 1]} : vector<8x384xf32> to vector<8x128xf32>
    %395 = arith.addf %393, %394 : vector<8x128xf32>
    %396 = arith.negf %395 : vector<8x128xf32>
    %397 = math.exp %396 : vector<8x128xf32>
    %cst_118 = arith.constant 1.000000e+00 : f32
    %398 = vector.broadcast %cst_118 : f32 to vector<8x128xf32>
    %399 = arith.addf %398, %397 : vector<8x128xf32>
    %400 = arith.divf %398, %399 : vector<8x128xf32>
    %401 = vector.extract_strided_slice %389 {offsets = [0, 128], sizes = [8, 128], strides = [1, 1]} : vector<8x384xf32> to vector<8x128xf32>
    %402 = vector.extract_strided_slice %392 {offsets = [0, 128], sizes = [8, 128], strides = [1, 1]} : vector<8x384xf32> to vector<8x128xf32>
    %403 = arith.addf %401, %402 : vector<8x128xf32>
    %404 = arith.negf %403 : vector<8x128xf32>
    %405 = math.exp %404 : vector<8x128xf32>
    %cst_119 = arith.constant 1.000000e+00 : f32
    %406 = vector.broadcast %cst_119 : f32 to vector<8x128xf32>
    %407 = arith.addf %406, %405 : vector<8x128xf32>
    %408 = arith.divf %406, %407 : vector<8x128xf32>
    %409 = vector.extract_strided_slice %389 {offsets = [0, 256], sizes = [8, 128], strides = [1, 1]} : vector<8x384xf32> to vector<8x128xf32>
    %410 = vector.extract_strided_slice %392 {offsets = [0, 256], sizes = [8, 128], strides = [1, 1]} : vector<8x384xf32> to vector<8x128xf32>
    %411 = vector.broadcast %314 : vector<1x128xf32> to vector<8x128xf32>
    %412 = arith.addf %410, %411 : vector<8x128xf32>
    %413 = arith.mulf %400, %412 : vector<8x128xf32>
    %414 = arith.addf %409, %413 : vector<8x128xf32>
    %415 = math.tanh %414 : vector<8x128xf32>
    %cst_120 = arith.constant 1.000000e+00 : f32
    %416 = vector.broadcast %cst_120 : f32 to vector<8x128xf32>
    %417 = arith.subf %416, %408 : vector<8x128xf32>
    %418 = arith.mulf %417, %415 : vector<8x128xf32>
    %419 = arith.mulf %408, %385 : vector<8x128xf32>
    %420 = arith.addf %418, %419 : vector<8x128xf32>
    %c3_i32_121 = arith.constant 3 : i32
    %c8_i32_122 = arith.constant 8 : i32
    %421 = arith.muli %c3_i32_121, %c8_i32_122 : i32
    %422 = tpu.assume_multiple %421, 8 : i32
    %423 = arith.index_cast %422 : i32 to index
    %c0_123 = arith.constant 0 : index
    %424 = vector.load %arg12[%423, %c0_123] : memref<64x384xf32, #tpu.memory_space<vmem>>, vector<8x384xf32>
    %425 = arith.truncf %420 : vector<8x128xf32> to vector<8x128xbf16>
    %c0_124 = arith.constant 0 : index
    %c0_125 = arith.constant 0 : index
    %426 = vector.load %arg6[%c0_124, %c0_125] : memref<128x384xbf16, #tpu.memory_space<vmem>>, vector<128x384xbf16>
    %cst_126 = arith.constant dense<0.000000e+00> : vector<8x384xf32>
    %427 = tpu.matmul %425, %426, %cst_126 {dimension_numbers = #tpu.dot_dimension_numbers<[1], [0], [0], [1], [0, 0, 1, 1], [], []>} : vector<8x128xbf16>, vector<128x384xbf16>, vector<8x384xf32> -> vector<8x384xf32>
    %428 = vector.extract_strided_slice %424 {offsets = [0, 0], sizes = [8, 128], strides = [1, 1]} : vector<8x384xf32> to vector<8x128xf32>
    %429 = vector.extract_strided_slice %427 {offsets = [0, 0], sizes = [8, 128], strides = [1, 1]} : vector<8x384xf32> to vector<8x128xf32>
    %430 = arith.addf %428, %429 : vector<8x128xf32>
    %431 = arith.negf %430 : vector<8x128xf32>
    %432 = math.exp %431 : vector<8x128xf32>
    %cst_127 = arith.constant 1.000000e+00 : f32
    %433 = vector.broadcast %cst_127 : f32 to vector<8x128xf32>
    %434 = arith.addf %433, %432 : vector<8x128xf32>
    %435 = arith.divf %433, %434 : vector<8x128xf32>
    %436 = vector.extract_strided_slice %424 {offsets = [0, 128], sizes = [8, 128], strides = [1, 1]} : vector<8x384xf32> to vector<8x128xf32>
    %437 = vector.extract_strided_slice %427 {offsets = [0, 128], sizes = [8, 128], strides = [1, 1]} : vector<8x384xf32> to vector<8x128xf32>
    %438 = arith.addf %436, %437 : vector<8x128xf32>
    %439 = arith.negf %438 : vector<8x128xf32>
    %440 = math.exp %439 : vector<8x128xf32>
    %cst_128 = arith.constant 1.000000e+00 : f32
    %441 = vector.broadcast %cst_128 : f32 to vector<8x128xf32>
    %442 = arith.addf %441, %440 : vector<8x128xf32>
    %443 = arith.divf %441, %442 : vector<8x128xf32>
    %444 = vector.extract_strided_slice %424 {offsets = [0, 256], sizes = [8, 128], strides = [1, 1]} : vector<8x384xf32> to vector<8x128xf32>
    %445 = vector.extract_strided_slice %427 {offsets = [0, 256], sizes = [8, 128], strides = [1, 1]} : vector<8x384xf32> to vector<8x128xf32>
    %446 = vector.broadcast %314 : vector<1x128xf32> to vector<8x128xf32>
    %447 = arith.addf %445, %446 : vector<8x128xf32>
    %448 = arith.mulf %435, %447 : vector<8x128xf32>
    %449 = arith.addf %444, %448 : vector<8x128xf32>
    %450 = math.tanh %449 : vector<8x128xf32>
    %cst_129 = arith.constant 1.000000e+00 : f32
    %451 = vector.broadcast %cst_129 : f32 to vector<8x128xf32>
    %452 = arith.subf %451, %443 : vector<8x128xf32>
    %453 = arith.mulf %452, %450 : vector<8x128xf32>
    %454 = arith.mulf %443, %420 : vector<8x128xf32>
    %455 = arith.addf %453, %454 : vector<8x128xf32>
    %c4_i32_130 = arith.constant 4 : i32
    %c8_i32_131 = arith.constant 8 : i32
    %456 = arith.muli %c4_i32_130, %c8_i32_131 : i32
    %457 = tpu.assume_multiple %456, 8 : i32
    %458 = arith.index_cast %457 : i32 to index
    %c0_132 = arith.constant 0 : index
    %459 = vector.load %arg12[%458, %c0_132] : memref<64x384xf32, #tpu.memory_space<vmem>>, vector<8x384xf32>
    %460 = arith.truncf %455 : vector<8x128xf32> to vector<8x128xbf16>
    %c0_133 = arith.constant 0 : index
    %c0_134 = arith.constant 0 : index
    %461 = vector.load %arg6[%c0_133, %c0_134] : memref<128x384xbf16, #tpu.memory_space<vmem>>, vector<128x384xbf16>
    %cst_135 = arith.constant dense<0.000000e+00> : vector<8x384xf32>
    %462 = tpu.matmul %460, %461, %cst_135 {dimension_numbers = #tpu.dot_dimension_numbers<[1], [0], [0], [1], [0, 0, 1, 1], [], []>} : vector<8x128xbf16>, vector<128x384xbf16>, vector<8x384xf32> -> vector<8x384xf32>
    %463 = vector.extract_strided_slice %459 {offsets = [0, 0], sizes = [8, 128], strides = [1, 1]} : vector<8x384xf32> to vector<8x128xf32>
    %464 = vector.extract_strided_slice %462 {offsets = [0, 0], sizes = [8, 128], strides = [1, 1]} : vector<8x384xf32> to vector<8x128xf32>
    %465 = arith.addf %463, %464 : vector<8x128xf32>
    %466 = arith.negf %465 : vector<8x128xf32>
    %467 = math.exp %466 : vector<8x128xf32>
    %cst_136 = arith.constant 1.000000e+00 : f32
    %468 = vector.broadcast %cst_136 : f32 to vector<8x128xf32>
    %469 = arith.addf %468, %467 : vector<8x128xf32>
    %470 = arith.divf %468, %469 : vector<8x128xf32>
    %471 = vector.extract_strided_slice %459 {offsets = [0, 128], sizes = [8, 128], strides = [1, 1]} : vector<8x384xf32> to vector<8x128xf32>
    %472 = vector.extract_strided_slice %462 {offsets = [0, 128], sizes = [8, 128], strides = [1, 1]} : vector<8x384xf32> to vector<8x128xf32>
    %473 = arith.addf %471, %472 : vector<8x128xf32>
    %474 = arith.negf %473 : vector<8x128xf32>
    %475 = math.exp %474 : vector<8x128xf32>
    %cst_137 = arith.constant 1.000000e+00 : f32
    %476 = vector.broadcast %cst_137 : f32 to vector<8x128xf32>
    %477 = arith.addf %476, %475 : vector<8x128xf32>
    %478 = arith.divf %476, %477 : vector<8x128xf32>
    %479 = vector.extract_strided_slice %459 {offsets = [0, 256], sizes = [8, 128], strides = [1, 1]} : vector<8x384xf32> to vector<8x128xf32>
    %480 = vector.extract_strided_slice %462 {offsets = [0, 256], sizes = [8, 128], strides = [1, 1]} : vector<8x384xf32> to vector<8x128xf32>
    %481 = vector.broadcast %314 : vector<1x128xf32> to vector<8x128xf32>
    %482 = arith.addf %480, %481 : vector<8x128xf32>
    %483 = arith.mulf %470, %482 : vector<8x128xf32>
    %484 = arith.addf %479, %483 : vector<8x128xf32>
    %485 = math.tanh %484 : vector<8x128xf32>
    %cst_138 = arith.constant 1.000000e+00 : f32
    %486 = vector.broadcast %cst_138 : f32 to vector<8x128xf32>
    %487 = arith.subf %486, %478 : vector<8x128xf32>
    %488 = arith.mulf %487, %485 : vector<8x128xf32>
    %489 = arith.mulf %478, %455 : vector<8x128xf32>
    %490 = arith.addf %488, %489 : vector<8x128xf32>
    %c5_i32_139 = arith.constant 5 : i32
    %c8_i32_140 = arith.constant 8 : i32
    %491 = arith.muli %c5_i32_139, %c8_i32_140 : i32
    %492 = tpu.assume_multiple %491, 8 : i32
    %493 = arith.index_cast %492 : i32 to index
    %c0_141 = arith.constant 0 : index
    %494 = vector.load %arg12[%493, %c0_141] : memref<64x384xf32, #tpu.memory_space<vmem>>, vector<8x384xf32>
    %495 = arith.truncf %490 : vector<8x128xf32> to vector<8x128xbf16>
    %c0_142 = arith.constant 0 : index
    %c0_143 = arith.constant 0 : index
    %496 = vector.load %arg6[%c0_142, %c0_143] : memref<128x384xbf16, #tpu.memory_space<vmem>>, vector<128x384xbf16>
    %cst_144 = arith.constant dense<0.000000e+00> : vector<8x384xf32>
    %497 = tpu.matmul %495, %496, %cst_144 {dimension_numbers = #tpu.dot_dimension_numbers<[1], [0], [0], [1], [0, 0, 1, 1], [], []>} : vector<8x128xbf16>, vector<128x384xbf16>, vector<8x384xf32> -> vector<8x384xf32>
    %498 = vector.extract_strided_slice %494 {offsets = [0, 0], sizes = [8, 128], strides = [1, 1]} : vector<8x384xf32> to vector<8x128xf32>
    %499 = vector.extract_strided_slice %497 {offsets = [0, 0], sizes = [8, 128], strides = [1, 1]} : vector<8x384xf32> to vector<8x128xf32>
    %500 = arith.addf %498, %499 : vector<8x128xf32>
    %501 = arith.negf %500 : vector<8x128xf32>
    %502 = math.exp %501 : vector<8x128xf32>
    %cst_145 = arith.constant 1.000000e+00 : f32
    %503 = vector.broadcast %cst_145 : f32 to vector<8x128xf32>
    %504 = arith.addf %503, %502 : vector<8x128xf32>
    %505 = arith.divf %503, %504 : vector<8x128xf32>
    %506 = vector.extract_strided_slice %494 {offsets = [0, 128], sizes = [8, 128], strides = [1, 1]} : vector<8x384xf32> to vector<8x128xf32>
    %507 = vector.extract_strided_slice %497 {offsets = [0, 128], sizes = [8, 128], strides = [1, 1]} : vector<8x384xf32> to vector<8x128xf32>
    %508 = arith.addf %506, %507 : vector<8x128xf32>
    %509 = arith.negf %508 : vector<8x128xf32>
    %510 = math.exp %509 : vector<8x128xf32>
    %cst_146 = arith.constant 1.000000e+00 : f32
    %511 = vector.broadcast %cst_146 : f32 to vector<8x128xf32>
    %512 = arith.addf %511, %510 : vector<8x128xf32>
    %513 = arith.divf %511, %512 : vector<8x128xf32>
    %514 = vector.extract_strided_slice %494 {offsets = [0, 256], sizes = [8, 128], strides = [1, 1]} : vector<8x384xf32> to vector<8x128xf32>
    %515 = vector.extract_strided_slice %497 {offsets = [0, 256], sizes = [8, 128], strides = [1, 1]} : vector<8x384xf32> to vector<8x128xf32>
    %516 = vector.broadcast %314 : vector<1x128xf32> to vector<8x128xf32>
    %517 = arith.addf %515, %516 : vector<8x128xf32>
    %518 = arith.mulf %505, %517 : vector<8x128xf32>
    %519 = arith.addf %514, %518 : vector<8x128xf32>
    %520 = math.tanh %519 : vector<8x128xf32>
    %cst_147 = arith.constant 1.000000e+00 : f32
    %521 = vector.broadcast %cst_147 : f32 to vector<8x128xf32>
    %522 = arith.subf %521, %513 : vector<8x128xf32>
    %523 = arith.mulf %522, %520 : vector<8x128xf32>
    %524 = arith.mulf %513, %490 : vector<8x128xf32>
    %525 = arith.addf %523, %524 : vector<8x128xf32>
    %c6_i32_148 = arith.constant 6 : i32
    %c8_i32_149 = arith.constant 8 : i32
    %526 = arith.muli %c6_i32_148, %c8_i32_149 : i32
    %527 = tpu.assume_multiple %526, 8 : i32
    %528 = arith.index_cast %527 : i32 to index
    %c0_150 = arith.constant 0 : index
    %529 = vector.load %arg12[%528, %c0_150] : memref<64x384xf32, #tpu.memory_space<vmem>>, vector<8x384xf32>
    %530 = arith.truncf %525 : vector<8x128xf32> to vector<8x128xbf16>
    %c0_151 = arith.constant 0 : index
    %c0_152 = arith.constant 0 : index
    %531 = vector.load %arg6[%c0_151, %c0_152] : memref<128x384xbf16, #tpu.memory_space<vmem>>, vector<128x384xbf16>
    %cst_153 = arith.constant dense<0.000000e+00> : vector<8x384xf32>
    %532 = tpu.matmul %530, %531, %cst_153 {dimension_numbers = #tpu.dot_dimension_numbers<[1], [0], [0], [1], [0, 0, 1, 1], [], []>} : vector<8x128xbf16>, vector<128x384xbf16>, vector<8x384xf32> -> vector<8x384xf32>
    %533 = vector.extract_strided_slice %529 {offsets = [0, 0], sizes = [8, 128], strides = [1, 1]} : vector<8x384xf32> to vector<8x128xf32>
    %534 = vector.extract_strided_slice %532 {offsets = [0, 0], sizes = [8, 128], strides = [1, 1]} : vector<8x384xf32> to vector<8x128xf32>
    %535 = arith.addf %533, %534 : vector<8x128xf32>
    %536 = arith.negf %535 : vector<8x128xf32>
    %537 = math.exp %536 : vector<8x128xf32>
    %cst_154 = arith.constant 1.000000e+00 : f32
    %538 = vector.broadcast %cst_154 : f32 to vector<8x128xf32>
    %539 = arith.addf %538, %537 : vector<8x128xf32>
    %540 = arith.divf %538, %539 : vector<8x128xf32>
    %541 = vector.extract_strided_slice %529 {offsets = [0, 128], sizes = [8, 128], strides = [1, 1]} : vector<8x384xf32> to vector<8x128xf32>
    %542 = vector.extract_strided_slice %532 {offsets = [0, 128], sizes = [8, 128], strides = [1, 1]} : vector<8x384xf32> to vector<8x128xf32>
    %543 = arith.addf %541, %542 : vector<8x128xf32>
    %544 = arith.negf %543 : vector<8x128xf32>
    %545 = math.exp %544 : vector<8x128xf32>
    %cst_155 = arith.constant 1.000000e+00 : f32
    %546 = vector.broadcast %cst_155 : f32 to vector<8x128xf32>
    %547 = arith.addf %546, %545 : vector<8x128xf32>
    %548 = arith.divf %546, %547 : vector<8x128xf32>
    %549 = vector.extract_strided_slice %529 {offsets = [0, 256], sizes = [8, 128], strides = [1, 1]} : vector<8x384xf32> to vector<8x128xf32>
    %550 = vector.extract_strided_slice %532 {offsets = [0, 256], sizes = [8, 128], strides = [1, 1]} : vector<8x384xf32> to vector<8x128xf32>
    %551 = vector.broadcast %314 : vector<1x128xf32> to vector<8x128xf32>
    %552 = arith.addf %550, %551 : vector<8x128xf32>
    %553 = arith.mulf %540, %552 : vector<8x128xf32>
    %554 = arith.addf %549, %553 : vector<8x128xf32>
    %555 = math.tanh %554 : vector<8x128xf32>
    %cst_156 = arith.constant 1.000000e+00 : f32
    %556 = vector.broadcast %cst_156 : f32 to vector<8x128xf32>
    %557 = arith.subf %556, %548 : vector<8x128xf32>
    %558 = arith.mulf %557, %555 : vector<8x128xf32>
    %559 = arith.mulf %548, %525 : vector<8x128xf32>
    %560 = arith.addf %558, %559 : vector<8x128xf32>
    %c7_i32_157 = arith.constant 7 : i32
    %c8_i32_158 = arith.constant 8 : i32
    %561 = arith.muli %c7_i32_157, %c8_i32_158 : i32
    %562 = tpu.assume_multiple %561, 8 : i32
    %563 = arith.index_cast %562 : i32 to index
    %c0_159 = arith.constant 0 : index
    %564 = vector.load %arg12[%563, %c0_159] : memref<64x384xf32, #tpu.memory_space<vmem>>, vector<8x384xf32>
    %565 = arith.truncf %560 : vector<8x128xf32> to vector<8x128xbf16>
    %c0_160 = arith.constant 0 : index
    %c0_161 = arith.constant 0 : index
    %566 = vector.load %arg6[%c0_160, %c0_161] : memref<128x384xbf16, #tpu.memory_space<vmem>>, vector<128x384xbf16>
    %cst_162 = arith.constant dense<0.000000e+00> : vector<8x384xf32>
    %567 = tpu.matmul %565, %566, %cst_162 {dimension_numbers = #tpu.dot_dimension_numbers<[1], [0], [0], [1], [0, 0, 1, 1], [], []>} : vector<8x128xbf16>, vector<128x384xbf16>, vector<8x384xf32> -> vector<8x384xf32>
    %568 = vector.extract_strided_slice %564 {offsets = [0, 0], sizes = [8, 128], strides = [1, 1]} : vector<8x384xf32> to vector<8x128xf32>
    %569 = vector.extract_strided_slice %567 {offsets = [0, 0], sizes = [8, 128], strides = [1, 1]} : vector<8x384xf32> to vector<8x128xf32>
    %570 = arith.addf %568, %569 : vector<8x128xf32>
    %571 = arith.negf %570 : vector<8x128xf32>
    %572 = math.exp %571 : vector<8x128xf32>
    %cst_163 = arith.constant 1.000000e+00 : f32
    %573 = vector.broadcast %cst_163 : f32 to vector<8x128xf32>
    %574 = arith.addf %573, %572 : vector<8x128xf32>
    %575 = arith.divf %573, %574 : vector<8x128xf32>
    %576 = vector.extract_strided_slice %564 {offsets = [0, 128], sizes = [8, 128], strides = [1, 1]} : vector<8x384xf32> to vector<8x128xf32>
    %577 = vector.extract_strided_slice %567 {offsets = [0, 128], sizes = [8, 128], strides = [1, 1]} : vector<8x384xf32> to vector<8x128xf32>
    %578 = arith.addf %576, %577 : vector<8x128xf32>
    %579 = arith.negf %578 : vector<8x128xf32>
    %580 = math.exp %579 : vector<8x128xf32>
    %cst_164 = arith.constant 1.000000e+00 : f32
    %581 = vector.broadcast %cst_164 : f32 to vector<8x128xf32>
    %582 = arith.addf %581, %580 : vector<8x128xf32>
    %583 = arith.divf %581, %582 : vector<8x128xf32>
    %584 = vector.extract_strided_slice %564 {offsets = [0, 256], sizes = [8, 128], strides = [1, 1]} : vector<8x384xf32> to vector<8x128xf32>
    %585 = vector.extract_strided_slice %567 {offsets = [0, 256], sizes = [8, 128], strides = [1, 1]} : vector<8x384xf32> to vector<8x128xf32>
    %586 = vector.broadcast %314 : vector<1x128xf32> to vector<8x128xf32>
    %587 = arith.addf %585, %586 : vector<8x128xf32>
    %588 = arith.mulf %575, %587 : vector<8x128xf32>
    %589 = arith.addf %584, %588 : vector<8x128xf32>
    %590 = math.tanh %589 : vector<8x128xf32>
    %cst_165 = arith.constant 1.000000e+00 : f32
    %591 = vector.broadcast %cst_165 : f32 to vector<8x128xf32>
    %592 = arith.subf %591, %583 : vector<8x128xf32>
    %593 = arith.mulf %592, %590 : vector<8x128xf32>
    %594 = arith.mulf %583, %560 : vector<8x128xf32>
    %595 = arith.addf %593, %594 : vector<8x128xf32>
    %c8_i32_166 = arith.constant 8 : i32
    %596 = arith.truncf %595 : vector<8x128xf32> to vector<8x128xbf16>
    %c0_167 = arith.constant 0 : index
    %c0_168 = arith.constant 0 : index
    %597 = vector.load %arg9[%c0_167, %c0_168] : memref<128x4xbf16, #tpu.memory_space<vmem>>, vector<128x4xbf16>
    %cst_169 = arith.constant dense<0.000000e+00> : vector<8x4xf32>
    %598 = tpu.matmul %596, %597, %cst_169 {dimension_numbers = #tpu.dot_dimension_numbers<[1], [0], [0], [1], [0, 0, 1, 1], [], []>} : vector<8x128xbf16>, vector<128x4xbf16>, vector<8x4xf32> -> vector<8x4xf32>
    %c0_170 = arith.constant 0 : index
    %c0_171 = arith.constant 0 : index
    %599 = vector.load %arg10[%c0_170, %c0_171] : memref<1x4xf32, #tpu.memory_space<vmem>>, vector<1x4xf32>
    %600 = vector.broadcast %599 : vector<1x4xf32> to vector<8x4xf32>
    %601 = arith.addf %598, %600 : vector<8x4xf32>
    %c0_172 = arith.constant 0 : index
    %c0_173 = arith.constant 0 : index
    %602 = vector.load %arg11[%c0_172, %c0_173] : memref<8x4xf32, #tpu.memory_space<vmem>>, vector<8x4xf32>
    tpu.vector_store %arg11[%c0_172, %c0_173], %601 {strides = array<i32>} : memref<8x4xf32, #tpu.memory_space<vmem>>, vector<8x4xf32>,
    return
  }
}

</mosaic_0001>

<bundles_post_ra>
// kernel: gru_classifier_forward.1
= control target key start
LH: loop header
LB: loop body
LE: loop exit
PB: predicated region body
PF: predicated region fallthrough
CT: control target
= control target key end

     0   :  { %v6712_v1 = vmov 0   ;;  %vm88_vm0 = vcmask 130048   ;;  %v6714_v20 = vmov 0.0   ;;  %vm5158_vm1 = vmmov 0   ;;  %s6698_s1 = inlined_call_operand.vmem [shape: bf16[16,384], index: 1, kind: input, shape index: {}]   ;;  %s6699_s0 = inlined_call_operand.vmem [shape: f32[64,16], index: 0, kind: input, shape index: {}]   ;;  %s6700_s2 = inlined_call_operand.vmem [shape: bf16[128,384], index: 2, kind: input, shape index: {}]   ;;  %s6701_s3 = inlined_call_operand.vmem [shape: f32[1,384], index: 3, kind: input, shape index: {}]   ;;  %s6702_s4 = inlined_call_operand.vmem [shape: f32[1,128], index: 4, kind: input, shape index: {}]   ;;  %s6703_s5 = inlined_call_operand.vmem [shape: bf16[128,384], index: 5, kind: input, shape index: {}]   ;;  %s6704_s6 = inlined_call_operand.vmem [shape: bf16[128,384], index: 6, kind: input, shape index: {}]   ;;  %s6705_s7 = inlined_call_operand.vmem [shape: f32[1,384], index: 7, kind: input, shape index: {}]   ;;  %s6706_s8 = inlined_call_operand.vmem [shape: f32[1,128], index: 8, kind: input, shape index: {}]   ;;  %s6707_s9 = inlined_call_operand.vmem [shape: bf16[128,4], index: 9, kind: input, shape index: {}]   ;;  %s6708_s10 = inlined_call_operand.vmem [shape: f32[1,4], index: 10, kind: input, shape index: {}]   ;;  %s6709_s11 = inlined_call_operand.vmem [shape: f32[8,4], index: 11, kind: output, shape index: {}]  }
   0x1   :  { %v4783_v0 = vld [vmem:[%s6698_s1 + $0x4] ss:$12 sps:$4 sm:$0xff]   ;;  %133 = vmatprep.mubr.bf16.mxu0 %v6712_v1  ;;  %v4785_v2 = vld [vmem:[%s6698_s1] ss:$12 sps:$4 sm:$0xff]   ;;  %v5245_v8 = vld [vmem:[%s6700_s2 + $0x1c] ss:$12 sps:$4 sm:$0xff]   ;;  %v57_v49 = vlaneseq }
   0x2   :  { %v39_v3 = vld [vmem:[%s6699_s0] sm:$0xff]  ;;  %v40_v4 = vld [vmem:[%s6699_s0 + $0x8] sm:$0xff]  ;;  %101 = vmatprep.subr.bf16.mxu0 %v4783_v0  ;;  %v41_v10 = vld [vmem:[%s6699_s0 + $0x10] sm:$0xff]  ;;  %vm3929_vm2 = vcmask 31744  }
   0x3   :  { %v47_v5 = vpack.c.bf16 %v40_v4, %v39_v3  ;;  %v5235_v6 = vld [vmem:[%s6700_s2] ss:$12 sps:$4 sm:$0xff]   ;;  %102 = vmatpush1.bf16.msra.mxu0 %v4785_v2  ;;  %v5240_v7 = vld [vmem:[%s6700_s2 + $0x4] ss:$12 sps:$4 sm:$0xff]   ;;  %v42_v11 = vld [vmem:[%s6699_s0 + $0x18] sm:$0xff]  ;;  %v5450_v50 = vshrl.u32 %v57_v49, 7 }
   0x4   :  { %430 = vmatprep.subr.bf16.mxu0 %v5240_v7  ;;  %v5253_v9 = vld [vmem:[%s6700_s2 + $0x18] ss:$12 sps:$4 sm:$0xff]   ;;  %v5267_v12 = vld [vmem:[%s6700_s2 + $0x34] ss:$12 sps:$4 sm:$0xff]   ;;  %v48_v13 = vpack.c.bf16 %v42_v11, %v41_v10  ;;  %v5276_v15 = vld [vmem:[%s6700_s2 + $0x30] ss:$12 sps:$4 sm:$0xff]  }
   0x5   :  { %4408 = vmatprep.mubr.msk.bf16.mxu1 %vm88_vm0, %v47_v5  ;;  %v4801_v14 = vld [vmem:[%s6698_s1 + $0x8] ss:$12 sps:$4 sm:$0xff]   ;;  %v5282_v16 = vld [vmem:[%s6700_s2 + $0x4c] ss:$12 sps:$4 sm:$0xff]   ;;  %v43_v17 = vld [vmem:[%s6699_s0 + $0x20] sm:$0xff]  ;;  %v59_v51 = vsub.s32 0, %v5450_v50 }
   0x6   :  { %3945 = vmatmul.mubr.msk.bf16.vlgmr.msra.gmra.mrb[0].mxu0 %vm88_vm0, %v47_v5  ;;  %v44_v18 = vld [vmem:[%s6699_s0 + $0x28] sm:$0xff]  ;;  %4406 = vmatprep.subr.bf16.mxu1 %v4801_v14  ;;  %v5306_v23 = vld [vmem:[%s6700_s2 + $0x64] ss:$12 sps:$4 sm:$0xff]   ;;  %v46_v27 = vld [vmem:[%s6699_s0 + $0x38] sm:$0xff]  ;;  %v6711_v53 = vsub.s32 1, %v5450_v50  ;;  %v6710_v61 = vsub.s32 2, %v5450_v50 }
   0x7   :  { %431 = vmatpush1.bf16.msra.mxu0 %v5235_v6  ;;  %143 = vmatprep.mubr.bf16.mxu0 %v6712_v1  ;;  %v5294_v19 = vld [vmem:[%s6700_s2 + $0x48] ss:$12 sps:$4 sm:$0xff]   ;;  %v49_v21 = vpack.c.bf16 %v44_v18, %v43_v17  ;;  %v5312_v24 = vld [vmem:[%s6700_s2 + $0x60] ss:$12 sps:$4 sm:$0xff]   ;;  %v4813_v29 = vld [vmem:[%s6700_s2 + $0x38] ss:$12 sps:$4 sm:$0xff]  }
   0x8   :  { %432 = vmatprep.subr.bf16.mxu0 %v5245_v8  ;;  %4407 = vmatpush3.bf16.msra.mxu1 %v4801_v14  ;;  %v4808_v22 = vld [vmem:[%s6700_s2 + $0x8] ss:$12 sps:$4 sm:$0xff]   ;;  %v4812_v25 = vld [vmem:[%s6700_s2 + $0x20] ss:$12 sps:$4 sm:$0xff]   ;;  %v5339_v30 = vld [vmem:[%s6700_s2 + $0x78] ss:$12 sps:$4 sm:$0xff]  }
   0x9   :  { %4416 = vmatprep.subr.bf16.mxu1 %v6714_v20  ;;  %v45_v26 = vld [vmem:[%s6699_s0 + $0x30] sm:$0xff]  ;;  %v5330_v28 = vld [vmem:[%s6700_s2 + $0x7c] ss:$12 sps:$4 sm:$0xff]   ;;  %v5364_v35 = vld [vmem:[%s6700_s2 + $0xac] ss:$12 sps:$4 sm:$0xff]  }
   0xa   :  { %v50_v31 = vpack.c.bf16 %v46_v27, %v45_v26  ;;  %v5347_v32 = vld [vmem:[%s6700_s2 + $0x94] ss:$12 sps:$4 sm:$0xff]   ;;  %v4814_v33 = vld [vmem:[%s6700_s2 + $0x50] ss:$12 sps:$4 sm:$0xff]   ;;  %v4817_v39 = vld [vmem:[%s6700_s2 + $0x98] ss:$12 sps:$4 sm:$0xff]  }
   0xb   :  { %433 = vmatpush1.bf16.msra.mxu0 %v5253_v9  ;;  %4409 = vmatmul.mubr.msk.bf16.vlgmr.msra.gmra.mrb[0].mxu1 %vm88_vm0, %v48_v13  ;;  %v5357_v34 = vld [vmem:[%s6700_s2 + $0x90] ss:$12 sps:$4 sm:$0xff]   ;;  %v4815_v36 = vld [vmem:[%s6700_s2 + $0x68] ss:$12 sps:$4 sm:$0xff]   ;;  %v4816_v38 = vld [vmem:[%s6700_s2 + $0x80] ss:$12 sps:$4 sm:$0xff]  }
   0xc   :  { %434 = vmatprep.subr.bf16.mxu0 %v5267_v12  ;;  %4417 = vmatpush3.bf16.msra.mxu1 %v4808_v22  ;;  %v5375_v37 = vld [vmem:[%s6700_s2 + $0xa8] ss:$12 sps:$4 sm:$0xff]   ;;  %v4818_v40 = vld [vmem:[%s6700_s2 + $0xb0] ss:$12 sps:$4 sm:$0xff]   ;;  %v4820_v42 = vld [vmem:[%s6700_s2 + $0x20] ss:$12 sps:$4 sm:$0xff]  }
   0xd   :  { %4412 = vmatprep.mubr.msk.bf16.mxu1 %vm88_vm0, %v49_v21  ;;  %4418 = vmatprep.subr.bf16.mxu1 %v6714_v20  ;;  %v4819_v41 = vld [vmem:[%s6700_s2 + $0x8] ss:$12 sps:$4 sm:$0xff]   ;;  %v4821_v43 = vld [vmem:[%s6700_s2 + $0x38] ss:$12 sps:$4 sm:$0xff]   ;;  %v4822_v44 = vld [vmem:[%s6700_s2 + $0x50] ss:$12 sps:$4 sm:$0xff]  }
   0xe   :  { %3946 = vmatmul.mubr.msk.bf16.gmra.mrb[4].mxu0 %vm88_vm0, %v48_v13  ;;  %v4823_v45 = vld [vmem:[%s6700_s2 + $0x68] ss:$12 sps:$4 sm:$0xff]   ;;  %v4824_v46 = vld [vmem:[%s6700_s2 + $0x80] ss:$12 sps:$4 sm:$0xff]   ;;  %v4825_v47 = vld [vmem:[%s6700_s2 + $0x98] ss:$12 sps:$4 sm:$0xff]  }
   0xf   :  { %435 = vmatpush1.bf16.msra.mxu0 %v5276_v15  ;;  %153 = vmatprep.mubr.bf16.mxu0 %v6712_v1  ;;  %v4826_v48 = vld [vmem:[%s6700_s2 + $0xb0] ss:$12 sps:$4 sm:$0xff]   ;;  %v55_v52 = vld [vmem:[%s6701_s3] sm:$0x7] }
  0x10   :  { %436 = vmatprep.subr.bf16.mxu0 %v5282_v16  ;;  %4419 = vmatpush3.bf16.msra.mxu1 %v4812_v25  ;;  %v60_v55 = vrot.slane %v55_v52, %v59_v51  ;;  %v64_v57 = vrot.slane %v55_v52, %v6711_v53  ;;  %v5468_v63 = vrot.slane %v55_v52, %v6710_v61 }
  0x11   :  { %4420 = vmatprep.subr.bf16.mxu1 %v6714_v20 }
  0x13   :  { %437 = vmatpush1.bf16.msra.mxu0 %v5294_v19  ;;  %4413 = vmatmul.mubr.msk.bf16.gmra.mrb[4].mxu1 %vm88_vm0, %v50_v31 }
  0x14   :  { %438 = vmatprep.subr.bf16.mxu0 %v5306_v23  ;;  %4421 = vmatpush3.bf16.msra.mxu1 %v4813_v29 }
  0x15   :  { %4432 = vmatprep.mubr.msk.bf16.mxu1 %vm5158_vm1, %v6714_v20  ;;  %4422 = vmatprep.subr.bf16.mxu1 %v6714_v20 }
  0x16   :  { %3947 = vmatmul.mubr.msk.bf16.gmra.mrb[8].mxu0 %vm88_vm0, %v49_v21 }
  0x17   :  { %439 = vmatpush1.bf16.msra.mxu0 %v5312_v24  ;;  %163 = vmatprep.mubr.bf16.mxu0 %v6712_v1 }
  0x18   :  { %440 = vmatprep.subr.bf16.mxu0 %v5330_v28  ;;  %4423 = vmatpush3.bf16.msra.mxu1 %v4814_v33 }
  0x19   :  { %4424 = vmatprep.subr.bf16.mxu1 %v6714_v20 }
  0x1b   :  { %441 = vmatpush1.bf16.msra.mxu0 %v5339_v30 }
  0x1c   :  { %442 = vmatprep.subr.bf16.mxu0 %v5347_v32  ;;  %4425 = vmatpush3.bf16.msra.mxu1 %v4815_v36 }
  0x1d   :  { %4426 = vmatprep.subr.bf16.mxu1 %v6714_v20 }
  0x1e   :  { %3948 = vmatmul.mubr.msk.bf16.gmra.mrb[12].mxu0 %vm88_vm0, %v50_v31 }
  0x1f   :  { %443 = vmatpush1.bf16.msra.mxu0 %v5357_v34  ;;  %462 = vmatprep.mubr.bf16.mxu0 %v6712_v1 }
  0x20   :  { %444 = vmatprep.subr.bf16.mxu0 %v5364_v35  ;;  %4427 = vmatpush3.bf16.msra.mxu1 %v4816_v38 }
  0x21   :  { %4428 = vmatprep.subr.bf16.mxu1 %v6714_v20 }
  0x23   :  { %445 = vmatpush1.bf16.msra.mxu0 %v5375_v37 }
  0x24   :  { %707 = vmatprep.subr.bf16.mxu0 %v5240_v7  ;;  %4429 = vmatpush3.bf16.msra.mxu1 %v4817_v39 }
  0x25   :  { %4430 = vmatprep.subr.bf16.mxu1 %v6714_v20 }
  0x26   :  { %463 = vmatmul.mubr.bf16.vlgmr.msra.gmra.mrb[16].mxu0 %v6712_v1 }
  0x27   :  { %708 = vmatpush1.bf16.msra.mxu0 %v5235_v6  ;;  %739 = vmatprep.mubr.bf16.mxu0 %v6712_v1 }
  0x28   :  { %709 = vmatprep.subr.bf16.mxu0 %v5245_v8  ;;  %4431 = vmatpush3.bf16.msra.mxu1 %v4818_v40 }
  0x29   :  { %4436 = vmatprep.subr.bf16.mxu1 %v6714_v20 }
  0x2b   :  { %710 = vmatpush1.bf16.msra.mxu0 %v5253_v9  ;;  %4433 = vmatmul.mubr.bf16.vlgmr.msra.gmra.mrb[8].mxu1 %v6712_v1 }
  0x2c   :  { %711 = vmatprep.subr.bf16.mxu0 %v5267_v12  ;;  %4452 = vmatprep.mubr.msk.bf16.mxu1 %vm5158_vm1, %v6714_v20 }
  0x2d   :  { %4437 = vmatpush3.bf16.msra.mxu1 %v4819_v41 }
  0x2e   :  { %4438 = vmatprep.subr.bf16.mxu1 %v6714_v20 }
  0x2f   :  { %712 = vmatpush1.bf16.msra.mxu0 %v5276_v15 }
  0x30   :  { %713 = vmatprep.subr.bf16.mxu0 %v5282_v16 }
  0x31   :  { %4439 = vmatpush3.bf16.msra.mxu1 %v4820_v42 }
  0x32   :  { %4440 = vmatprep.subr.bf16.mxu1 %v6714_v20 }
  0x33   :  { %714 = vmatpush1.bf16.msra.mxu0 %v5294_v19 }
  0x34   :  { %715 = vmatprep.subr.bf16.mxu0 %v5306_v23 }
  0x35   :  { %4441 = vmatpush3.bf16.msra.mxu1 %v4821_v43 }
  0x36   :  { %4442 = vmatprep.subr.bf16.mxu1 %v6714_v20 }
  0x37   :  { %716 = vmatpush1.bf16.msra.mxu0 %v5312_v24 }
  0x38   :  { %717 = vmatprep.subr.bf16.mxu0 %v5330_v28 }
  0x39   :  { %4443 = vmatpush3.bf16.msra.mxu1 %v4822_v44 }
  0x3a   :  { %4444 = vmatprep.subr.bf16.mxu1 %v6714_v20 }
  0x3b   :  { %718 = vmatpush1.bf16.msra.mxu0 %v5339_v30 }
  0x3c   :  { %719 = vmatprep.subr.bf16.mxu0 %v5347_v32 }
  0x3d   :  { %4445 = vmatpush3.bf16.msra.mxu1 %v4823_v45 }
  0x3e   :  { %4446 = vmatprep.subr.bf16.mxu1 %v6714_v20 }
  0x3f   :  { %720 = vmatpush1.bf16.msra.mxu0 %v5357_v34 }
  0x40   :  { %721 = vmatprep.subr.bf16.mxu0 %v5364_v35 }
  0x41   :  { %4447 = vmatpush3.bf16.msra.mxu1 %v4824_v46 }
  0x42   :  { %4448 = vmatprep.subr.bf16.mxu1 %v6714_v20 }
  0x43   :  { %722 = vmatpush1.bf16.msra.mxu0 %v5375_v37 }
  0x44   :  { %979 = vmatprep.subr.bf16.mxu0 %v5240_v7 }
  0x45   :  { %4449 = vmatpush3.bf16.msra.mxu1 %v4825_v47 }
  0x46   :  { %4450 = vmatprep.subr.bf16.mxu1 %v6714_v20 }
  0x49   :  { %4451 = vmatpush3.bf16.msra.mxu1 %v4826_v48 }
  0x4a   :  { %4456 = vmatprep.subr.bf16.mxu1 %v6714_v20 }
  0xd9   :  { %v135_v54 = vpop.f32.mrb[0].mxu0 }
  0xda   :  { %v137_v56 = vpop.f32.mrb[1].mxu0 }
  0xdb   :  { %v139_v58 = vpop.f32.mrb[2].mxu0 }
  0xdc   :  { %v5461_v59 = vadd.f32 %v139_v58, %v60_v55  ;;  %v141_v60 = vpop.f32.mrb[3].mxu0 }
  0xdd   :  { %v5464_v62 = vadd.f32 %v141_v60, %v64_v57 }
  0xde   :  { %v4410_v10 = vpop.f32.mrb[0].mxu1 }
  0xdf   :  { %v5477_v14 = vadd.f32 %v4410_v10, %v5468_v63  ;;  %v208_v17 = vpop.f32.mrb[1].mxu1 }
  0xe0   :  { %v4411_v21 = vpop.f32.mrb[2].mxu1 }
  0xe1   :  { %v145_v0 = vpop.f32.mrb[4].mxu0  ;;  %v5482_v22 = vadd.f32 %v4411_v21, %v5468_v63  ;;  %v211_v25 = vpop.f32.mrb[3].mxu1  ;;  %v138_v21 = vadd.f32 %v137_v56, %v64_v57 }
  0xe2   :  { %v5470_v2 = vadd.f32 %v145_v0, %v60_v55  ;;  %v147_v3 = vpop.f32.mrb[5].mxu0  ;;  %v5485_v26 = vadd.f32 %v211_v25, %v5468_v63 }
  0xe3   :  { %v5472_v4 = vadd.f32 %v147_v3, %v64_v57  ;;  %v149_v5 = vpop.f32.mrb[6].mxu0 }
  0xe4   :  { %v5474_v11 = vadd.f32 %v149_v5, %v60_v55  ;;  %v151_v13 = vpop.f32.mrb[7].mxu0 }
  0xe5   :  { %v5479_v18 = vadd.f32 %v151_v13, %v64_v57  ;;  %v136_v13 = vadd.f32 %v135_v54, %v60_v55  ;;  %v5518_v54 = vld [vmem:[%s6702_s4] ss:$0 sm:$0xff] }
  0xe6   :  { %v4414_v38 = vpop.f32.mrb[4].mxu1 }
  0xe7   :  { %v5494_v41 = vadd.f32 %v4414_v38, %v5468_v63  ;;  %v224_v42 = vpop.f32.mrb[5].mxu1 }
  0xe8   :  { %v5499_v44 = vadd.f32 %v224_v42, %v5468_v63  ;;  %v4415_v45 = vpop.f32.mrb[6].mxu1 }
  0xe9   :  { %v155_v27 = vpop.f32.mrb[8].mxu0  ;;  %v5502_v46 = vadd.f32 %v4415_v45, %v5468_v63  ;;  %v227_v47 = vpop.f32.mrb[7].mxu1 }
  0xea   :  { %v5487_v29 = vadd.f32 %v155_v27, %v60_v55  ;;  %v157_v31 = vpop.f32.mrb[9].mxu0  ;;  %v5505_v48 = vadd.f32 %v227_v47, %v5468_v63 }
  0xeb   :  { %v5489_v33 = vadd.f32 %v157_v31, %v64_v57  ;;  %v159_v36 = vpop.f32.mrb[10].mxu0 }
  0xec   :  { %v5491_v39 = vadd.f32 %v159_v36, %v60_v55  ;;  %v161_v40 = vpop.f32.mrb[11].mxu0 }
  0xed   :  { %v5496_v43 = vadd.f32 %v161_v40, %v64_v57 }
  0xf1   :  { %v165_v49 = vpop.f32.mrb[12].mxu0 }
  0xf2   :  { %v5507_v52 = vadd.f32 %v165_v49, %v60_v55  ;;  %v167_v58 = vpop.f32.mrb[13].mxu0 }
  0xf3   :  { %v5509_v60 = vadd.f32 %v167_v58, %v64_v57  ;;  %v169_v0 = vpop.f32.mrb[14].mxu0 }
  0xf4   :  { %v5511_v3 = vadd.f32 %v169_v0, %v60_v55  ;;  %v171_v5 = vpop.f32.mrb[15].mxu0 }
  0xf5   :  { %v5513_v10 = vadd.f32 %v171_v5, %v64_v57 }
  0xf9   :  { %v464_v25 = vpop.f32.mrb[16].mxu0 }
  0xfa   :  { %v511_v27 = vadd.f32 %v464_v25, %v136_v13  ;;  %v466_v31 = vpop.f32.mrb[17].mxu0  ;;  %v209_v13 = vadd.f32 %v208_v17, %v5468_v63  ;;  %v4827_v63 = vld [vmem:[%s6700_s2 + $0x8] ss:$12 sps:$4 sm:$0xff]   ;;  %v4828_v17 = vld [vmem:[%s6700_s2 + $0x20] ss:$12 sps:$4 sm:$0xff]  }
  0xfb   :  { %v518_v36 = vadd.f32 %v466_v31, %v138_v21  ;;  %v468_v38 = vpop.f32.mrb[18].mxu0 }
  0xfc   :  { %v3977_v40 = vmul.f32 -1.442695, %v511_v27  ;;  %v469_v42 = vpop.f32.mrb[19].mxu0 }
  0xfd   :  { %v3978_v45 = vmul.f32 -1.442695, %v518_v36  ;;  %v4829_v42 = vld [vmem:[%s6700_s2 + $0x38] ss:$12 sps:$4 sm:$0xff]  }
  0xfe   :  { %4971 = vpow2.f32 %v3977_v40  ;;  %v505_v47 = vpop.f32.mrb[8].mxu1 }
  0xff   :  { %v4434_v49 = vpop.f32.mrb[9].mxu1  ;;  %4973 = vpow2.f32 %v3978_v45  ;;  %v531_v56 = vadd.f32 %v5518_v54, %v505_v47  ;;  %v4831_v45 = vld [vmem:[%s6700_s2 + $0x68] ss:$12 sps:$4 sm:$0xff]   ;;  %v4832_v47 = vld [vmem:[%s6700_s2 + $0x80] ss:$12 sps:$4 sm:$0xff]  }
 0x100   :  { %v508_v58 = vpop.f32.mrb[10].mxu1  ;;  %v4833_v49 = vld [vmem:[%s6700_s2 + $0x98] ss:$12 sps:$4 sm:$0xff]  }
 0x101   :  { %v4435_v0 = vpop.f32.mrb[11].mxu1  ;;  %v4834_v58 = vld [vmem:[%s6700_s2 + $0xb0] ss:$12 sps:$4 sm:$0xff]  }
 0x108   :  { %v4972_v61 = vpop.eup %4971 }
 0x109   :  { %v515_v53 = vadd.f32 1.0, %v4972_v61  ;;  %v4974_v5 = vpop.eup %4973 }
 0x10a   :  { %v522_v55 = vadd.f32 1.0, %v4974_v5 }
 0x10b   :  { %4975 = vrcp.f32 %v515_v53 }
 0x10c   :  { %4977 = vrcp.f32 %v522_v55 }
 0x115   :  { %v4976_v57 = vpop.eup %4975 }
 0x116   :  { %v532_v21 = vmul.f32 %v4976_v57, %v531_v56  ;;  %v4978_v27 = vpop.eup %4977 }
 0x117   :  { %v535_v31 = vsub.f32 1.0, %v4978_v27  ;;  %v537_v36 = vmul.f32 0.0, %v4978_v27 }
 0x118   :  { %v533_v25 = vadd.f32 %v532_v21, %v209_v13 }
 0x11a   :  { %4979 = vtanh.f32 %v533_v25 }
 0x124   :  { %v4980_v61 = vpop.eup %4979 }
 0x125   :  { %v536_v53 = vmul.f32 %v4980_v61, %v535_v31 }
 0x127   :  { %v5522_v38 = vadd.f32 %v537_v36, %v536_v53 }
 0x129   :  { %v546_v40 = vpack.c.bf16 %v5522_v38, %v5522_v38 }
 0x12b   :  { %740 = vmatmul.mubr.bf16.vlgmr.msra.gmra.mrb[20].mxu0 %v546_v40  ;;  %4453 = vmatmul.mubr.bf16.vlgmr.msra.gmra.mrb[12].mxu1 %v546_v40 }
 0x12c   :  { %980 = vmatpush1.bf16.msra.mxu0 %v5235_v6  ;;  %1011 = vmatprep.mubr.bf16.mxu0 %v6712_v1 }
 0x12d   :  { %981 = vmatprep.subr.bf16.mxu0 %v5245_v8  ;;  %4472 = vmatprep.mubr.msk.bf16.mxu1 %vm5158_vm1, %v6714_v20 }
 0x12e   :  { %4457 = vmatpush3.bf16.msra.mxu1 %v4827_v63 }
 0x12f   :  { %4458 = vmatprep.subr.bf16.mxu1 %v6714_v20 }
 0x130   :  { %982 = vmatpush1.bf16.msra.mxu0 %v5253_v9 }
 0x131   :  { %983 = vmatprep.subr.bf16.mxu0 %v5267_v12 }
 0x132   :  { %4459 = vmatpush3.bf16.msra.mxu1 %v4828_v17 }
 0x133   :  { %4460 = vmatprep.subr.bf16.mxu1 %v6714_v20 }
 0x134   :  { %984 = vmatpush1.bf16.msra.mxu0 %v5276_v15 }
 0x135   :  { %985 = vmatprep.subr.bf16.mxu0 %v5282_v16 }
 0x136   :  { %4461 = vmatpush3.bf16.msra.mxu1 %v4829_v42 }
 0x137   :  { %4462 = vmatprep.subr.bf16.mxu1 %v6714_v20 }
 0x138   :  { %986 = vmatpush1.bf16.msra.mxu0 %v5294_v19 }
 0x139   :  { %987 = vmatprep.subr.bf16.mxu0 %v5306_v23 }
 0x13c   :  { %988 = vmatpush1.bf16.msra.mxu0 %v5312_v24 }
 0x13d   :  { %989 = vmatprep.subr.bf16.mxu0 %v5330_v28 }
 0x140   :  { %990 = vmatpush1.bf16.msra.mxu0 %v5339_v30 }
 0x141   :  { %991 = vmatprep.subr.bf16.mxu0 %v5347_v32 }
 0x144   :  { %992 = vmatpush1.bf16.msra.mxu0 %v5357_v34 }
 0x145   :  { %993 = vmatprep.subr.bf16.mxu0 %v5364_v35 }
 0x148   :  { %994 = vmatpush1.bf16.msra.mxu0 %v5375_v37 }
 0x149   :  { %1251 = vmatprep.subr.bf16.mxu0 %v5240_v7  ;;  %v4830_v7 = vld [vmem:[%s6700_s2 + $0x50] ss:$12 sps:$4 sm:$0xff]  }
 0x14a   :  { %4463 = vmatpush3.bf16.msra.mxu1 %v4830_v7 }
 0x14b   :  { %4464 = vmatprep.subr.bf16.mxu1 %v6714_v20 }
 0x14e   :  { %4465 = vmatpush3.bf16.msra.mxu1 %v4831_v45 }
 0x14f   :  { %4466 = vmatprep.subr.bf16.mxu1 %v6714_v20 }
 0x152   :  { %4467 = vmatpush3.bf16.msra.mxu1 %v4832_v47 }
 0x153   :  { %4468 = vmatprep.subr.bf16.mxu1 %v6714_v20 }
 0x156   :  { %4469 = vmatpush3.bf16.msra.mxu1 %v4833_v49 }
 0x157   :  { %4470 = vmatprep.subr.bf16.mxu1 %v6714_v20 }
 0x15a   :  { %4471 = vmatpush3.bf16.msra.mxu1 %v4834_v58 }
 0x15b   :  { %4476 = vmatprep.subr.bf16.mxu1 %v6714_v20 }
 0x1fe   :  { %v741_v0 = vpop.f32.mrb[20].mxu0  ;;  %v782_v5 = vpop.f32.mrb[12].mxu1 }
 0x1ff   :  { %v788_v55 = vadd.f32 %v741_v0, %v5461_v59  ;;  %v743_v56 = vpop.f32.mrb[21].mxu0  ;;  %v4454_v57 = vpop.f32.mrb[13].mxu1  ;;  %v802_v42 = vadd.f32 %v5518_v54, %v782_v5 }
 0x200   :  { %v795_v13 = vadd.f32 %v743_v56, %v5464_v62  ;;  %v745_v21 = vpop.f32.mrb[22].mxu0  ;;  %v785_v25 = vpop.f32.mrb[14].mxu1 }
 0x201   :  { %v4004_v27 = vmul.f32 -1.442695, %v788_v55  ;;  %v746_v31 = vpop.f32.mrb[23].mxu0  ;;  %v4455_v61 = vpop.f32.mrb[15].mxu1 }
 0x202   :  { %v4005_v53 = vmul.f32 -1.442695, %v795_v13 }
 0x203   :  { %4981 = vpow2.f32 %v4004_v27 }
 0x204   :  { %4983 = vpow2.f32 %v4005_v53 }
 0x20d   :  { %v4982_v36 = vpop.eup %4981 }
 0x20e   :  { %v792_v40 = vadd.f32 1.0, %v4982_v36  ;;  %v4984_v63 = vpop.eup %4983 }
 0x20f   :  { %v799_v17 = vadd.f32 1.0, %v4984_v63 }
 0x210   :  { %4985 = vrcp.f32 %v792_v40 }
 0x211   :  { %4987 = vrcp.f32 %v799_v17 }
 0x21a   :  { %v4986_v59 = vpop.eup %4985 }
 0x21b   :  { %v803_v7 = vmul.f32 %v4986_v59, %v802_v42  ;;  %v4988_v45 = vpop.eup %4987 }
 0x21c   :  { %v806_v47 = vsub.f32 1.0, %v4988_v45  ;;  %v808_v0 = vmul.f32 %v4988_v45, %v5522_v38  ;;  %v5656_v45 = vld [vmem:[%s6700_s2] ss:$12 sps:$4 sm:$0xff]  }
 0x21d   :  { %v804_v62 = vadd.f32 %v803_v7, %v5485_v26 }
 0x21f   :  { %4989 = vtanh.f32 %v804_v62 }
 0x229   :  { %v4990_v49 = vpop.eup %4989 }
 0x22a   :  { %v807_v58 = vmul.f32 %v4990_v49, %v806_v47  ;;  %v4846_v47 = vld [vmem:[%s6700_s2 + $0x8] ss:$12 sps:$4 sm:$0xff]  }
 0x22b   :  { %v5666_v49 = vld [vmem:[%s6700_s2 + $0x1c] ss:$12 sps:$4 sm:$0xff]  }
 0x22c   :  { %v5582_v55 = vadd.f32 %v808_v0, %v807_v58  ;;  %v5672_v58 = vld [vmem:[%s6700_s2 + $0x18] ss:$12 sps:$4 sm:$0xff]   ;;  %v4850_v0 = vld [vmem:[%s6700_s2 + $0x20] ss:$12 sps:$4 sm:$0xff]  }
 0x22e   :  { %v818_v56 = vpack.c.bf16 %v5582_v55, %v5582_v55 }
 0x230   :  { %1012 = vmatmul.mubr.bf16.vlgmr.msra.gmra.mrb[24].mxu0 %v818_v56  ;;  %4473 = vmatmul.mubr.bf16.vlgmr.msra.gmra.mrb[16].mxu1 %v818_v56  ;;  %v5682_v56 = vld [vmem:[%s6700_s2 + $0x34] ss:$12 sps:$4 sm:$0xff]  }
 0x231   :  { %1252 = vmatpush1.bf16.msra.mxu0 %v5235_v6  ;;  %1283 = vmatprep.mubr.bf16.mxu0 %v6712_v1  ;;  %v4835_v6 = vld [vmem:[%s6700_s2 + $0x8] ss:$12 sps:$4 sm:$0xff]  }
 0x232   :  { %1253 = vmatprep.subr.bf16.mxu0 %v5245_v8  ;;  %4492 = vmatprep.mubr.msk.bf16.mxu1 %vm5158_vm1, %v6714_v20  ;;  %v4836_v8 = vld [vmem:[%s6700_s2 + $0x20] ss:$12 sps:$4 sm:$0xff]  }
 0x233   :  { %4477 = vmatpush3.bf16.msra.mxu1 %v4835_v6  ;;  %v5688_v6 = vld [vmem:[%s6700_s2 + $0x30] ss:$12 sps:$4 sm:$0xff]  }
 0x234   :  { %4478 = vmatprep.subr.bf16.mxu1 %v6714_v20 }
 0x235   :  { %1254 = vmatpush1.bf16.msra.mxu0 %v5253_v9  ;;  %v4837_v9 = vld [vmem:[%s6700_s2 + $0x38] ss:$12 sps:$4 sm:$0xff]  }
 0x236   :  { %1255 = vmatprep.subr.bf16.mxu0 %v5267_v12  ;;  %v4838_v12 = vld [vmem:[%s6700_s2 + $0x50] ss:$12 sps:$4 sm:$0xff]  }
 0x237   :  { %4479 = vmatpush3.bf16.msra.mxu1 %v4836_v8  ;;  %v4854_v8 = vld [vmem:[%s6700_s2 + $0x38] ss:$12 sps:$4 sm:$0xff]  }
 0x238   :  { %4480 = vmatprep.subr.bf16.mxu1 %v6714_v20 }
 0x239   :  { %1256 = vmatpush1.bf16.msra.mxu0 %v5276_v15  ;;  %v4839_v15 = vld [vmem:[%s6700_s2 + $0x68] ss:$12 sps:$4 sm:$0xff]  }
 0x23a   :  { %1257 = vmatprep.subr.bf16.mxu0 %v5282_v16  ;;  %v4840_v16 = vld [vmem:[%s6700_s2 + $0x80] ss:$12 sps:$4 sm:$0xff]  }
 0x23b   :  { %4481 = vmatpush3.bf16.msra.mxu1 %v4837_v9  ;;  %v5698_v9 = vld [vmem:[%s6700_s2 + $0x4c] ss:$12 sps:$4 sm:$0xff]  }
 0x23c   :  { %4482 = vmatprep.subr.bf16.mxu1 %v6714_v20 }
 0x23d   :  { %1258 = vmatpush1.bf16.msra.mxu0 %v5294_v19  ;;  %v4841_v19 = vld [vmem:[%s6700_s2 + $0x98] ss:$12 sps:$4 sm:$0xff]  }
 0x23e   :  { %1259 = vmatprep.subr.bf16.mxu0 %v5306_v23  ;;  %v4842_v23 = vld [vmem:[%s6700_s2 + $0xb0] ss:$12 sps:$4 sm:$0xff]  }
 0x23f   :  { %4483 = vmatpush3.bf16.msra.mxu1 %v4838_v12  ;;  %v5704_v12 = vld [vmem:[%s6700_s2 + $0x48] ss:$12 sps:$4 sm:$0xff]  }
 0x240   :  { %4484 = vmatprep.subr.bf16.mxu1 %v6714_v20 }
 0x241   :  { %1260 = vmatpush1.bf16.msra.mxu0 %v5312_v24 }
 0x242   :  { %1261 = vmatprep.subr.bf16.mxu0 %v5330_v28 }
 0x243   :  { %4485 = vmatpush3.bf16.msra.mxu1 %v4839_v15  ;;  %v4858_v15 = vld [vmem:[%s6700_s2 + $0x50] ss:$12 sps:$4 sm:$0xff]  }
 0x244   :  { %4486 = vmatprep.subr.bf16.mxu1 %v6714_v20 }
 0x245   :  { %1262 = vmatpush1.bf16.msra.mxu0 %v5339_v30 }
 0x246   :  { %1263 = vmatprep.subr.bf16.mxu0 %v5347_v32 }
 0x247   :  { %4487 = vmatpush3.bf16.msra.mxu1 %v4840_v16  ;;  %v5714_v16 = vld [vmem:[%s6700_s2 + $0x64] ss:$12 sps:$4 sm:$0xff]  }
 0x248   :  { %4488 = vmatprep.subr.bf16.mxu1 %v6714_v20 }
 0x249   :  { %1264 = vmatpush1.bf16.msra.mxu0 %v5357_v34 }
 0x24a   :  { %1265 = vmatprep.subr.bf16.mxu0 %v5364_v35 }
 0x24b   :  { %4489 = vmatpush3.bf16.msra.mxu1 %v4841_v19  ;;  %v5720_v19 = vld [vmem:[%s6700_s2 + $0x60] ss:$12 sps:$4 sm:$0xff]  }
 0x24c   :  { %4490 = vmatprep.subr.bf16.mxu1 %v6714_v20 }
 0x24d   :  { %1266 = vmatpush1.bf16.msra.mxu0 %v5375_v37 }
 0x24f   :  { %4491 = vmatpush3.bf16.msra.mxu1 %v4842_v23  ;;  %v4862_v23 = vld [vmem:[%s6700_s2 + $0x68] ss:$12 sps:$4 sm:$0xff]  }
 0x250   :  { %4496 = vmatprep.subr.bf16.mxu1 %v6714_v20 }
 0x303   :  { %v1013_v24 = vpop.f32.mrb[24].mxu0  ;;  %v1054_v28 = vpop.f32.mrb[16].mxu1 }
 0x304   :  { %v1060_v30 = vadd.f32 %v1013_v24, %v5470_v2  ;;  %v1015_v32 = vpop.f32.mrb[25].mxu0  ;;  %v4474_v34 = vpop.f32.mrb[17].mxu1  ;;  %v1074_v53 = vadd.f32 %v5518_v54, %v1054_v28  ;;  %v5729_v24 = vld [vmem:[%s6700_s2 + $0x7c] ss:$12 sps:$4 sm:$0xff]   ;;  %v5735_v28 = vld [vmem:[%s6700_s2 + $0x78] ss:$12 sps:$4 sm:$0xff]  }
 0x305   :  { %v1067_v35 = vadd.f32 %v1015_v32, %v5472_v4  ;;  %v1017_v37 = vpop.f32.mrb[26].mxu0  ;;  %v1057_v26 = vpop.f32.mrb[18].mxu1  ;;  %v5745_v32 = vld [vmem:[%s6700_s2 + $0x94] ss:$12 sps:$4 sm:$0xff]   ;;  %v5751_v34 = vld [vmem:[%s6700_s2 + $0x90] ss:$12 sps:$4 sm:$0xff]  }
 0x306   :  { %v4030_v5 = vmul.f32 -1.442695, %v1060_v30  ;;  %v1018_v57 = vpop.f32.mrb[27].mxu0  ;;  %v4475_v13 = vpop.f32.mrb[19].mxu1  ;;  %v4866_v30 = vld [vmem:[%s6700_s2 + $0x80] ss:$12 sps:$4 sm:$0xff]  }
 0x307   :  { %v4031_v21 = vmul.f32 -1.442695, %v1067_v35  ;;  %v4870_v35 = vld [vmem:[%s6700_s2 + $0x98] ss:$12 sps:$4 sm:$0xff]   ;;  %v5767_v26 = vld [vmem:[%s6700_s2 + $0xa8] ss:$12 sps:$4 sm:$0xff]  }
 0x308   :  { %4991 = vpow2.f32 %v4030_v5  ;;  %v5761_v37 = vld [vmem:[%s6700_s2 + $0xac] ss:$12 sps:$4 sm:$0xff]   ;;  %v4874_v5 = vld [vmem:[%s6700_s2 + $0xb0] ss:$12 sps:$4 sm:$0xff]  }
 0x309   :  { %4993 = vpow2.f32 %v4031_v21 }
 0x312   :  { %v4992_v25 = vpop.eup %4991 }
 0x313   :  { %v1064_v27 = vadd.f32 1.0, %v4992_v25  ;;  %v4994_v31 = vpop.eup %4993 }
 0x314   :  { %v1071_v61 = vadd.f32 1.0, %v4994_v31 }
 0x315   :  { %4995 = vrcp.f32 %v1064_v27 }
 0x316   :  { %4997 = vrcp.f32 %v1071_v61 }
 0x31f   :  { %v4996_v2 = vpop.eup %4995 }
 0x320   :  { %v1075_v36 = vmul.f32 %v4996_v2, %v1074_v53  ;;  %v4998_v40 = vpop.eup %4997 }
 0x321   :  { %v1078_v63 = vsub.f32 1.0, %v4998_v40  ;;  %v1080_v59 = vmul.f32 %v4998_v40, %v5582_v55 }
 0x322   :  { %v1076_v4 = vadd.f32 %v1075_v36, %v5477_v14  ;;  %v5651_v14 = vld [vmem:[%s6700_s2 + $0x4] ss:$12 sps:$4 sm:$0xff]  }
 0x323   :  { %1523 = vmatprep.subr.bf16.mxu0 %v5651_v14 }
 0x324   :  { %4999 = vtanh.f32 %v1076_v4 }
 0x32e   :  { %v5000_v17 = vpop.eup %4999 }
 0x32f   :  { %v1079_v42 = vmul.f32 %v5000_v17, %v1078_v63 }
 0x331   :  { %v5641_v7 = vadd.f32 %v1080_v59, %v1079_v42 }
 0x333   :  { %v1090_v62 = vpack.c.bf16 %v5641_v7, %v5641_v7 }
 0x335   :  { %1284 = vmatmul.mubr.bf16.vlgmr.msra.gmra.mrb[28].mxu0 %v1090_v62  ;;  %4493 = vmatmul.mubr.bf16.vlgmr.msra.gmra.mrb[20].mxu1 %v1090_v62 }
 0x336   :  { %1555 = vmatprep.mubr.bf16.mxu0 %v6712_v1  ;;  %4512 = vmatprep.mubr.msk.bf16.mxu1 %vm5158_vm1, %v6714_v20 }
 0x337   :  { %1524 = vmatpush1.bf16.msra.mxu0 %v5656_v45  ;;  %4497 = vmatpush3.bf16.msra.mxu1 %v4846_v47 }
 0x338   :  { %4498 = vmatprep.subr.bf16.mxu1 %v6714_v20  ;;  %1525 = vmatprep.subr.bf16.mxu0 %v5666_v49 }
 0x33b   :  { %1526 = vmatpush1.bf16.msra.mxu0 %v5672_v58  ;;  %4499 = vmatpush3.bf16.msra.mxu1 %v4850_v0 }
 0x33c   :  { %4500 = vmatprep.subr.bf16.mxu1 %v6714_v20  ;;  %1527 = vmatprep.subr.bf16.mxu0 %v5682_v56 }
 0x33f   :  { %1528 = vmatpush1.bf16.msra.mxu0 %v5688_v6  ;;  %4501 = vmatpush3.bf16.msra.mxu1 %v4854_v8 }
 0x340   :  { %4502 = vmatprep.subr.bf16.mxu1 %v6714_v20  ;;  %1529 = vmatprep.subr.bf16.mxu0 %v5698_v9 }
 0x343   :  { %1530 = vmatpush1.bf16.msra.mxu0 %v5704_v12  ;;  %4503 = vmatpush3.bf16.msra.mxu1 %v4858_v15 }
 0x344   :  { %4504 = vmatprep.subr.bf16.mxu1 %v6714_v20  ;;  %1531 = vmatprep.subr.bf16.mxu0 %v5714_v16 }
 0x347   :  { %1532 = vmatpush1.bf16.msra.mxu0 %v5720_v19  ;;  %4505 = vmatpush3.bf16.msra.mxu1 %v4862_v23 }
 0x348   :  { %1533 = vmatprep.subr.bf16.mxu0 %v5729_v24  ;;  %4506 = vmatprep.subr.bf16.mxu1 %v6714_v20 }
 0x34b   :  { %1534 = vmatpush1.bf16.msra.mxu0 %v5735_v28  ;;  %4507 = vmatpush3.bf16.msra.mxu1 %v4866_v30 }
 0x34c   :  { %1535 = vmatprep.subr.bf16.mxu0 %v5745_v32  ;;  %4508 = vmatprep.subr.bf16.mxu1 %v6714_v20 }
 0x34f   :  { %1536 = vmatpush1.bf16.msra.mxu0 %v5751_v34  ;;  %4509 = vmatpush3.bf16.msra.mxu1 %v4870_v35 }
 0x350   :  { %1537 = vmatprep.subr.bf16.mxu0 %v5761_v37  ;;  %4510 = vmatprep.subr.bf16.mxu1 %v6714_v20 }
 0x353   :  { %1538 = vmatpush1.bf16.msra.mxu0 %v5767_v26  ;;  %4511 = vmatpush3.bf16.msra.mxu1 %v4874_v5 }
 0x354   :  { %1795 = vmatprep.subr.bf16.mxu0 %v5651_v14  ;;  %4516 = vmatprep.subr.bf16.mxu1 %v6714_v20 }
 0x408   :  { %v1285_v57 = vpop.f32.mrb[28].mxu0  ;;  %v1326_v13 = vpop.f32.mrb[20].mxu1 }
 0x409   :  { %v1332_v21 = vadd.f32 %v1285_v57, %v5474_v11  ;;  %v1287_v25 = vpop.f32.mrb[29].mxu0  ;;  %v4494_v27 = vpop.f32.mrb[21].mxu1  ;;  %v1346_v62 = vadd.f32 %v5518_v54, %v1326_v13  ;;  %v4876_v57 = vld [vmem:[%s6700_s2 + $0x20] ss:$12 sps:$4 sm:$0xff]   ;;  %v4877_v13 = vld [vmem:[%s6700_s2 + $0x38] ss:$12 sps:$4 sm:$0xff]  }
 0x40a   :  { %v1339_v31 = vadd.f32 %v1287_v25, %v5479_v18  ;;  %v1289_v61 = vpop.f32.mrb[30].mxu0  ;;  %v1329_v53 = vpop.f32.mrb[22].mxu1  ;;  %v4879_v25 = vld [vmem:[%s6700_s2 + $0x68] ss:$12 sps:$4 sm:$0xff]   ;;  %v4880_v27 = vld [vmem:[%s6700_s2 + $0x80] ss:$12 sps:$4 sm:$0xff]  }
 0x40b   :  { %v4056_v2 = vmul.f32 -1.442695, %v1332_v21  ;;  %v1290_v36 = vpop.f32.mrb[31].mxu0  ;;  %v4495_v4 = vpop.f32.mrb[23].mxu1  ;;  %v4878_v21 = vld [vmem:[%s6700_s2 + $0x50] ss:$12 sps:$4 sm:$0xff]  }
 0x40c   :  { %v4057_v40 = vmul.f32 -1.442695, %v1339_v31  ;;  %v4881_v31 = vld [vmem:[%s6700_s2 + $0x98] ss:$12 sps:$4 sm:$0xff]   ;;  %v4882_v61 = vld [vmem:[%s6700_s2 + $0xb0] ss:$12 sps:$4 sm:$0xff]  }
 0x40d   :  { %5001 = vpow2.f32 %v4056_v2 }
 0x40e   :  { %5003 = vpow2.f32 %v4057_v40 }
 0x417   :  { %v5002_v63 = vpop.eup %5001 }
 0x418   :  { %v1336_v17 = vadd.f32 1.0, %v5002_v63  ;;  %v5004_v42 = vpop.eup %5003 }
 0x419   :  { %v1343_v59 = vadd.f32 1.0, %v5004_v42 }
 0x41a   :  { %5005 = vrcp.f32 %v1336_v17 }
 0x41b   :  { %5007 = vrcp.f32 %v1343_v59 }
 0x424   :  { %v5006_v11 = vpop.eup %5005 }
 0x425   :  { %v1347_v47 = vmul.f32 %v5006_v11, %v1346_v62  ;;  %v5008_v0 = vpop.eup %5007 }
 0x426   :  { %v1350_v8 = vsub.f32 1.0, %v5008_v0  ;;  %v1352_v30 = vmul.f32 %v5008_v0, %v5641_v7 }
 0x427   :  { %v1348_v18 = vadd.f32 %v1347_v47, %v5482_v22  ;;  %v4875_v22 = vld [vmem:[%s6700_s2 + $0x8] ss:$12 sps:$4 sm:$0xff]  }
 0x429   :  { %5009 = vtanh.f32 %v1348_v18 }
 0x433   :  { %v5010_v15 = vpop.eup %5009 }
 0x434   :  { %v1351_v23 = vmul.f32 %v5010_v15, %v1350_v8 }
 0x436   :  { %v5782_v35 = vadd.f32 %v1352_v30, %v1351_v23 }
 0x438   :  { %v1362_v5 = vpack.c.bf16 %v5782_v35, %v5782_v35 }
 0x43a   :  { %1556 = vmatmul.mubr.bf16.vlgmr.msra.gmra.mrb[32].mxu0 %v1362_v5  ;;  %4513 = vmatmul.mubr.bf16.vlgmr.msra.gmra.mrb[24].mxu1 %v1362_v5 }
 0x43b   :  { %1796 = vmatpush1.bf16.msra.mxu0 %v5656_v45  ;;  %1827 = vmatprep.mubr.bf16.mxu0 %v6712_v1 }
 0x43c   :  { %1797 = vmatprep.subr.bf16.mxu0 %v5666_v49  ;;  %4532 = vmatprep.mubr.msk.bf16.mxu1 %vm5158_vm1, %v6714_v20 }
 0x43d   :  { %4517 = vmatpush3.bf16.msra.mxu1 %v4875_v22 }
 0x43e   :  { %4518 = vmatprep.subr.bf16.mxu1 %v6714_v20 }
 0x43f   :  { %1798 = vmatpush1.bf16.msra.mxu0 %v5672_v58 }
 0x440   :  { %1799 = vmatprep.subr.bf16.mxu0 %v5682_v56 }
 0x441   :  { %4519 = vmatpush3.bf16.msra.mxu1 %v4876_v57 }
 0x442   :  { %4520 = vmatprep.subr.bf16.mxu1 %v6714_v20 }
 0x443   :  { %1800 = vmatpush1.bf16.msra.mxu0 %v5688_v6 }
 0x444   :  { %1801 = vmatprep.subr.bf16.mxu0 %v5698_v9 }
 0x445   :  { %4521 = vmatpush3.bf16.msra.mxu1 %v4877_v13 }
 0x446   :  { %4522 = vmatprep.subr.bf16.mxu1 %v6714_v20 }
 0x447   :  { %1802 = vmatpush1.bf16.msra.mxu0 %v5704_v12 }
 0x448   :  { %1803 = vmatprep.subr.bf16.mxu0 %v5714_v16 }
 0x449   :  { %4523 = vmatpush3.bf16.msra.mxu1 %v4878_v21 }
 0x44a   :  { %4524 = vmatprep.subr.bf16.mxu1 %v6714_v20 }
 0x44b   :  { %1804 = vmatpush1.bf16.msra.mxu0 %v5720_v19 }
 0x44c   :  { %1805 = vmatprep.subr.bf16.mxu0 %v5729_v24 }
 0x44d   :  { %4525 = vmatpush3.bf16.msra.mxu1 %v4879_v25 }
 0x44e   :  { %4526 = vmatprep.subr.bf16.mxu1 %v6714_v20 }
 0x44f   :  { %1806 = vmatpush1.bf16.msra.mxu0 %v5735_v28 }
 0x450   :  { %1807 = vmatprep.subr.bf16.mxu0 %v5745_v32 }
 0x451   :  { %4527 = vmatpush3.bf16.msra.mxu1 %v4880_v27 }
 0x452   :  { %4528 = vmatprep.subr.bf16.mxu1 %v6714_v20 }
 0x453   :  { %1808 = vmatpush1.bf16.msra.mxu0 %v5751_v34 }
 0x454   :  { %1809 = vmatprep.subr.bf16.mxu0 %v5761_v37 }
 0x455   :  { %4529 = vmatpush3.bf16.msra.mxu1 %v4881_v31  ;;  %v4884_v31 = vld [vmem:[%s6700_s2 + $0x20] ss:$12 sps:$4 sm:$0xff]  }
 0x456   :  { %4530 = vmatprep.subr.bf16.mxu1 %v6714_v20 }
 0x457   :  { %1810 = vmatpush1.bf16.msra.mxu0 %v5767_v26 }
 0x458   :  { %2067 = vmatprep.subr.bf16.mxu0 %v5651_v14 }
 0x459   :  { %4531 = vmatpush3.bf16.msra.mxu1 %v4882_v61  ;;  %v4885_v61 = vld [vmem:[%s6700_s2 + $0x38] ss:$12 sps:$4 sm:$0xff]  }
 0x45a   :  { %4536 = vmatprep.subr.bf16.mxu1 %v6714_v20 }
 0x50d   :  { %v1557_v53 = vpop.f32.mrb[32].mxu0  ;;  %v1598_v2 = vpop.f32.mrb[24].mxu1 }
 0x50e   :  { %v1604_v36 = vadd.f32 %v1557_v53, %v5487_v29  ;;  %v1559_v4 = vpop.f32.mrb[33].mxu0  ;;  %v4514_v40 = vpop.f32.mrb[25].mxu1  ;;  %v1618_v23 = vadd.f32 %v5518_v54, %v1598_v2  ;;  %v4887_v53 = vld [vmem:[%s6700_s2 + $0x68] ss:$12 sps:$4 sm:$0xff]   ;;  %v4888_v2 = vld [vmem:[%s6700_s2 + $0x80] ss:$12 sps:$4 sm:$0xff]  }
 0x50f   :  { %v1611_v63 = vadd.f32 %v1559_v4, %v5489_v33  ;;  %v1561_v17 = vpop.f32.mrb[34].mxu0  ;;  %v1601_v42 = vpop.f32.mrb[26].mxu1  ;;  %v4890_v4 = vld [vmem:[%s6700_s2 + $0xb0] ss:$12 sps:$4 sm:$0xff]  }
 0x510   :  { %v4082_v59 = vmul.f32 -1.442695, %v1604_v36  ;;  %v1562_v62 = vpop.f32.mrb[35].mxu0  ;;  %v4515_v11 = vpop.f32.mrb[27].mxu1  ;;  %v4889_v36 = vld [vmem:[%s6700_s2 + $0x98] ss:$12 sps:$4 sm:$0xff]  }
 0x511   :  { %v4083_v47 = vmul.f32 -1.442695, %v1611_v63 }
 0x512   :  { %5011 = vpow2.f32 %v4082_v59 }
 0x513   :  { %5013 = vpow2.f32 %v4083_v47 }
 0x51c   :  { %v5012_v18 = vpop.eup %5011 }
 0x51d   :  { %v1608_v0 = vadd.f32 1.0, %v5012_v18  ;;  %v5014_v8 = vpop.eup %5013 }
 0x51e   :  { %v1615_v15 = vadd.f32 1.0, %v5014_v8 }
 0x51f   :  { %5015 = vrcp.f32 %v1608_v0 }
 0x520   :  { %5017 = vrcp.f32 %v1615_v15 }
 0x529   :  { %v5016_v29 = vpop.eup %5015 }
 0x52a   :  { %v1619_v30 = vmul.f32 %v5016_v29, %v1618_v23  ;;  %v5018_v5 = vpop.eup %5017 }
 0x52b   :  { %v1622_v22 = vsub.f32 1.0, %v5018_v5  ;;  %v1624_v21 = vmul.f32 %v5018_v5, %v5782_v35 }
 0x52c   :  { %v1620_v33 = vadd.f32 %v1619_v30, %v5499_v44  ;;  %v4883_v44 = vld [vmem:[%s6700_s2 + $0x8] ss:$12 sps:$4 sm:$0xff]  }
 0x52e   :  { %5019 = vtanh.f32 %v1620_v33 }
 0x538   :  { %v5020_v57 = vpop.eup %5019 }
 0x539   :  { %v1623_v13 = vmul.f32 %v5020_v57, %v1622_v22 }
 0x53b   :  { %v5842_v25 = vadd.f32 %v1624_v21, %v1623_v13 }
 0x53d   :  { %v1634_v27 = vpack.c.bf16 %v5842_v25, %v5842_v25 }
 0x53f   :  { %1828 = vmatmul.mubr.bf16.vlgmr.msra.gmra.mrb[36].mxu0 %v1634_v27  ;;  %4533 = vmatmul.mubr.bf16.vlgmr.msra.gmra.mrb[28].mxu1 %v1634_v27 }
 0x540   :  { %2068 = vmatpush1.bf16.msra.mxu0 %v5656_v45  ;;  %2099 = vmatprep.mubr.bf16.mxu0 %v6712_v1 }
 0x541   :  { %2069 = vmatprep.subr.bf16.mxu0 %v5666_v49  ;;  %4552 = vmatprep.mubr.msk.bf16.mxu1 %vm5158_vm1, %v6714_v20 }
 0x542   :  { %4537 = vmatpush3.bf16.msra.mxu1 %v4883_v44 }
 0x543   :  { %4538 = vmatprep.subr.bf16.mxu1 %v6714_v20 }
 0x544   :  { %2070 = vmatpush1.bf16.msra.mxu0 %v5672_v58 }
 0x545   :  { %2071 = vmatprep.subr.bf16.mxu0 %v5682_v56 }
 0x546   :  { %4539 = vmatpush3.bf16.msra.mxu1 %v4884_v31 }
 0x547   :  { %4540 = vmatprep.subr.bf16.mxu1 %v6714_v20 }
 0x548   :  { %2072 = vmatpush1.bf16.msra.mxu0 %v5688_v6 }
 0x549   :  { %2073 = vmatprep.subr.bf16.mxu0 %v5698_v9 }
 0x54a   :  { %4541 = vmatpush3.bf16.msra.mxu1 %v4885_v61 }
 0x54b   :  { %4542 = vmatprep.subr.bf16.mxu1 %v6714_v20 }
 0x54c   :  { %2074 = vmatpush1.bf16.msra.mxu0 %v5704_v12 }
 0x54d   :  { %2075 = vmatprep.subr.bf16.mxu0 %v5714_v16 }
 0x550   :  { %2076 = vmatpush1.bf16.msra.mxu0 %v5720_v19 }
 0x551   :  { %2077 = vmatprep.subr.bf16.mxu0 %v5729_v24 }
 0x554   :  { %2078 = vmatpush1.bf16.msra.mxu0 %v5735_v28 }
 0x555   :  { %2079 = vmatprep.subr.bf16.mxu0 %v5745_v32 }
 0x558   :  { %2080 = vmatpush1.bf16.msra.mxu0 %v5751_v34 }
 0x559   :  { %2081 = vmatprep.subr.bf16.mxu0 %v5761_v37 }
 0x55c   :  { %2082 = vmatpush1.bf16.msra.mxu0 %v5767_v26 }
 0x55d   :  { %2339 = vmatprep.subr.bf16.mxu0 %v5651_v14  ;;  %v4886_v14 = vld [vmem:[%s6700_s2 + $0x50] ss:$12 sps:$4 sm:$0xff]  }
 0x55e   :  { %4543 = vmatpush3.bf16.msra.mxu1 %v4886_v14 }
 0x55f   :  { %4544 = vmatprep.subr.bf16.mxu1 %v6714_v20 }
 0x562   :  { %4545 = vmatpush3.bf16.msra.mxu1 %v4887_v53 }
 0x563   :  { %4546 = vmatprep.subr.bf16.mxu1 %v6714_v20 }
 0x566   :  { %4547 = vmatpush3.bf16.msra.mxu1 %v4888_v2 }
 0x567   :  { %4548 = vmatprep.subr.bf16.mxu1 %v6714_v20 }
 0x56a   :  { %4549 = vmatpush3.bf16.msra.mxu1 %v4889_v36 }
 0x56b   :  { %4550 = vmatprep.subr.bf16.mxu1 %v6714_v20 }
 0x56e   :  { %4551 = vmatpush3.bf16.msra.mxu1 %v4890_v4 }
 0x56f   :  { %4556 = vmatprep.subr.bf16.mxu1 %v6714_v20 }
 0x612   :  { %v1829_v40 = vpop.f32.mrb[36].mxu0  ;;  %v1870_v63 = vpop.f32.mrb[28].mxu1 }
 0x613   :  { %v1876_v17 = vadd.f32 %v1829_v40, %v5491_v39  ;;  %v1831_v42 = vpop.f32.mrb[37].mxu0  ;;  %v4534_v59 = vpop.f32.mrb[29].mxu1  ;;  %v1890_v5 = vadd.f32 %v5518_v54, %v1870_v63 }
 0x614   :  { %v1883_v62 = vadd.f32 %v1831_v42, %v5496_v43  ;;  %v1833_v11 = vpop.f32.mrb[38].mxu0  ;;  %v1873_v47 = vpop.f32.mrb[30].mxu1 }
 0x615   :  { %v4108_v18 = vmul.f32 -1.442695, %v1876_v17  ;;  %v1834_v0 = vpop.f32.mrb[39].mxu0  ;;  %v4535_v8 = vpop.f32.mrb[31].mxu1 }
 0x616   :  { %v4109_v15 = vmul.f32 -1.442695, %v1883_v62 }
 0x617   :  { %5021 = vpow2.f32 %v4108_v18 }
 0x618   :  { %5023 = vpow2.f32 %v4109_v15 }
 0x621   :  { %v5022_v23 = vpop.eup %5021 }
 0x622   :  { %v1880_v29 = vadd.f32 1.0, %v5022_v23  ;;  %v5024_v30 = vpop.eup %5023 }
 0x623   :  { %v1887_v33 = vadd.f32 1.0, %v5024_v30  ;;  %v4906_v30 = vld [vmem:[%s6703_s5 + $0x20] ss:$12 sps:$4 sm:$0xff]  }
 0x624   :  { %5025 = vrcp.f32 %v1880_v29  ;;  %v4899_v29 = vld [vmem:[%s6703_s5] ss:$12 sps:$4 sm:$0xff]  }
 0x625   :  { %5027 = vrcp.f32 %v1887_v33  ;;  %v2452_v33 = vpack.c.bf16 %v5582_v55, %v5522_v38  ;;  %v4907_v38 = vld [vmem:[%s6703_s5 + $0x30] ss:$12 sps:$4 sm:$0xff]   ;;  %v4913_v55 = vld [vmem:[%s6703_s5 + $0x4c] ss:$12 sps:$4 sm:$0xff]  }
 0x62e   :  { %v5026_v39 = vpop.eup %5025 }
 0x62f   :  { %v1891_v22 = vmul.f32 %v5026_v39, %v1890_v5  ;;  %v5028_v57 = vpop.eup %5027  ;;  %v4903_v5 = vld [vmem:[%s6703_s5 + $0x18] ss:$12 sps:$4 sm:$0xff]   ;;  %v4909_v39 = vld [vmem:[%s6703_s5 + $0x34] ss:$12 sps:$4 sm:$0xff]  }
 0x630   :  { %v1894_v13 = vsub.f32 1.0, %v5028_v57  ;;  %v1896_v44 = vmul.f32 %v5028_v57, %v5842_v25  ;;  %v4911_v57 = vld [vmem:[%s6703_s5 + $0x48] ss:$12 sps:$4 sm:$0xff]  }
 0x631   :  { %v1892_v43 = vadd.f32 %v1891_v22, %v5505_v48  ;;  %v4891_v48 = vld [vmem:[%s6700_s2 + $0x8] ss:$12 sps:$4 sm:$0xff]   ;;  %v4910_v22 = vld [vmem:[%s6703_s5 + $0x38] ss:$12 sps:$4 sm:$0xff]  }
 0x633   :  { %5029 = vtanh.f32 %v1892_v43  ;;  %v4914_v43 = vld [vmem:[%s6703_s5 + $0x50] ss:$12 sps:$4 sm:$0xff]  }
 0x63d   :  { %v5030_v21 = vpop.eup %5029 }
 0x63e   :  { %v1895_v27 = vmul.f32 %v5030_v21, %v1894_v13  ;;  %v4917_v13 = vld [vmem:[%s6703_s5 + $0x64] ss:$12 sps:$4 sm:$0xff]   ;;  %v4918_v21 = vld [vmem:[%s6703_s5 + $0x68] ss:$12 sps:$4 sm:$0xff]  }
 0x640   :  { %v5902_v31 = vadd.f32 %v1896_v44, %v1895_v27  ;;  %v4915_v27 = vld [vmem:[%s6703_s5 + $0x60] ss:$12 sps:$4 sm:$0xff]   ;;  %v4921_v44 = vld [vmem:[%s6703_s5 + $0x7c] ss:$12 sps:$4 sm:$0xff]  }
 0x642   :  { %v1906_v61 = vpack.c.bf16 %v5902_v31, %v5902_v31 }
 0x644   :  { %2100 = vmatmul.mubr.bf16.vlgmr.msra.gmra.mrb[40].mxu0 %v1906_v61  ;;  %4553 = vmatmul.mubr.bf16.vlgmr.msra.gmra.mrb[32].mxu1 %v1906_v61  ;;  %v4922_v61 = vld [vmem:[%s6703_s5 + $0x80] ss:$12 sps:$4 sm:$0xff]  }
 0x645   :  { %2340 = vmatpush1.bf16.msra.mxu0 %v5656_v45  ;;  %2371 = vmatprep.mubr.bf16.mxu0 %v6712_v1  ;;  %v4892_v45 = vld [vmem:[%s6700_s2 + $0x20] ss:$12 sps:$4 sm:$0xff]  }
 0x646   :  { %2341 = vmatprep.subr.bf16.mxu0 %v5666_v49  ;;  %4572 = vmatprep.mubr.msk.bf16.mxu1 %vm5158_vm1, %v6714_v20  ;;  %v4893_v49 = vld [vmem:[%s6700_s2 + $0x38] ss:$12 sps:$4 sm:$0xff]  }
 0x647   :  { %4557 = vmatpush3.bf16.msra.mxu1 %v4891_v48  ;;  %v4919_v48 = vld [vmem:[%s6703_s5 + $0x78] ss:$12 sps:$4 sm:$0xff]  }
 0x648   :  { %4558 = vmatprep.subr.bf16.mxu1 %v6714_v20 }
 0x649   :  { %2342 = vmatpush1.bf16.msra.mxu0 %v5672_v58  ;;  %v4894_v58 = vld [vmem:[%s6700_s2 + $0x50] ss:$12 sps:$4 sm:$0xff]  }
 0x64a   :  { %2343 = vmatprep.subr.bf16.mxu0 %v5682_v56  ;;  %v4895_v56 = vld [vmem:[%s6700_s2 + $0x68] ss:$12 sps:$4 sm:$0xff]  }
 0x64b   :  { %4559 = vmatpush3.bf16.msra.mxu1 %v4892_v45  ;;  %v4925_v45 = vld [vmem:[%s6703_s5 + $0x94] ss:$12 sps:$4 sm:$0xff]  }
 0x64c   :  { %4560 = vmatprep.subr.bf16.mxu1 %v6714_v20 }
 0x64d   :  { %2344 = vmatpush1.bf16.msra.mxu0 %v5688_v6  ;;  %v4896_v6 = vld [vmem:[%s6700_s2 + $0x80] ss:$12 sps:$4 sm:$0xff]  }
 0x64e   :  { %2345 = vmatprep.subr.bf16.mxu0 %v5698_v9  ;;  %v4901_v9 = vld [vmem:[%s6703_s5 + $0x4] ss:$12 sps:$4 sm:$0xff]  }
 0x64f   :  { %4561 = vmatpush3.bf16.msra.mxu1 %v4893_v49  ;;  %v4926_v49 = vld [vmem:[%s6703_s5 + $0x98] ss:$12 sps:$4 sm:$0xff]  }
 0x650   :  { %4562 = vmatprep.subr.bf16.mxu1 %v6714_v20 }
 0x651   :  { %2346 = vmatpush1.bf16.msra.mxu0 %v5704_v12  ;;  %v4897_v12 = vld [vmem:[%s6700_s2 + $0x98] ss:$12 sps:$4 sm:$0xff]  }
 0x652   :  { %2347 = vmatprep.subr.bf16.mxu0 %v5714_v16  ;;  %v4898_v16 = vld [vmem:[%s6700_s2 + $0xb0] ss:$12 sps:$4 sm:$0xff]  }
 0x653   :  { %4563 = vmatpush3.bf16.msra.mxu1 %v4894_v58  ;;  %v4923_v58 = vld [vmem:[%s6703_s5 + $0x90] ss:$12 sps:$4 sm:$0xff]  }
 0x654   :  { %4564 = vmatprep.subr.bf16.mxu1 %v6714_v20 }
 0x655   :  { %2348 = vmatpush1.bf16.msra.mxu0 %v5720_v19  ;;  %v4902_v19 = vld [vmem:[%s6703_s5 + $0x8] ss:$12 sps:$4 sm:$0xff]  }
 0x656   :  { %2349 = vmatprep.subr.bf16.mxu0 %v5729_v24 }
 0x657   :  { %4565 = vmatpush3.bf16.msra.mxu1 %v4895_v56  ;;  %v4929_v56 = vld [vmem:[%s6703_s5 + $0xac] ss:$12 sps:$4 sm:$0xff]  }
 0x658   :  { %4566 = vmatprep.subr.bf16.mxu1 %v6714_v20 }
 0x659   :  { %2350 = vmatpush1.bf16.msra.mxu0 %v5735_v28 }
 0x65a   :  { %2351 = vmatprep.subr.bf16.mxu0 %v5745_v32 }
 0x65b   :  { %4567 = vmatpush3.bf16.msra.mxu1 %v4896_v6  ;;  %v4930_v6 = vld [vmem:[%s6703_s5 + $0xb0] ss:$12 sps:$4 sm:$0xff]  }
 0x65c   :  { %4568 = vmatprep.subr.bf16.mxu1 %v6714_v20 }
 0x65d   :  { %2352 = vmatpush1.bf16.msra.mxu0 %v5751_v34 }
 0x65e   :  { %2353 = vmatprep.subr.bf16.mxu0 %v5761_v37 }
 0x65f   :  { %4569 = vmatpush3.bf16.msra.mxu1 %v4897_v12  ;;  %v2453_v12 = vpack.c.bf16 %v5782_v35, %v5641_v7  ;;  %v6050_v7 = vld [vmem:[%s6704_s6 + $0x4] ss:$12 sps:$4 sm:$0xff]   ;;  %v6055_v35 = vld [vmem:[%s6704_s6] ss:$12 sps:$4 sm:$0xff]  }
 0x660   :  { %4570 = vmatprep.subr.bf16.mxu1 %v6714_v20 }
 0x661   :  { %2354 = vmatpush1.bf16.msra.mxu0 %v5767_v26 }
 0x662   :  { %2633 = vmatprep.subr.bf16.mxu0 %v4901_v9  ;;  %v4927_v9 = vld [vmem:[%s6703_s5 + $0xa8] ss:$12 sps:$4 sm:$0xff]  }
 0x663   :  { %4571 = vmatpush3.bf16.msra.mxu1 %v4898_v16  ;;  %v2454_v16 = vpack.c.bf16 %v5902_v31, %v5842_v25  ;;  %v6062_v25 = vld [vmem:[%s6704_s6 + $0x1c] ss:$12 sps:$4 sm:$0xff]  }
 0x664   :  { %4576 = vmatprep.subr.bf16.mxu1 %v4902_v19 }
 0x717   :  { %v2101_v24 = vpop.f32.mrb[40].mxu0  ;;  %v2142_v28 = vpop.f32.mrb[32].mxu1 }
 0x718   :  { %v2148_v32 = vadd.f32 %v2101_v24, %v5507_v52  ;;  %v2103_v34 = vpop.f32.mrb[41].mxu0  ;;  %v4554_v37 = vpop.f32.mrb[33].mxu1  ;;  %v2162_v62 = vadd.f32 %v5518_v54, %v2142_v28  ;;  %v6079_v24 = vld [vmem:[%s6704_s6 + $0x30] ss:$12 sps:$4 sm:$0xff]   ;;  %v6086_v28 = vld [vmem:[%s6704_s6 + $0x4c] ss:$12 sps:$4 sm:$0xff]  }
 0x719   :  { %v2155_v26 = vadd.f32 %v2103_v34, %v5509_v60  ;;  %v2105_v14 = vpop.f32.mrb[42].mxu0  ;;  %v2145_v53 = vpop.f32.mrb[34].mxu1  ;;  %v6098_v34 = vld [vmem:[%s6704_s6 + $0x64] ss:$12 sps:$4 sm:$0xff]   ;;  %v6103_v37 = vld [vmem:[%s6704_s6 + $0x60] ss:$12 sps:$4 sm:$0xff]  }
 0x71a   :  { %v4134_v2 = vmul.f32 -1.442695, %v2148_v32  ;;  %v2106_v36 = vpop.f32.mrb[43].mxu0  ;;  %v4555_v4 = vpop.f32.mrb[35].mxu1  ;;  %v6092_v32 = vld [vmem:[%s6704_s6 + $0x48] ss:$12 sps:$4 sm:$0xff]  }
 0x71b   :  { %v4135_v40 = vmul.f32 -1.442695, %v2155_v26  ;;  %v6110_v26 = vld [vmem:[%s6704_s6 + $0x7c] ss:$12 sps:$4 sm:$0xff]   ;;  %v6116_v14 = vld [vmem:[%s6704_s6 + $0x78] ss:$12 sps:$4 sm:$0xff]  }
 0x71c   :  { %5031 = vpow2.f32 %v4134_v2  ;;  %v6122_v53 = vld [vmem:[%s6704_s6 + $0x94] ss:$12 sps:$4 sm:$0xff]   ;;  %v6132_v36 = vld [vmem:[%s6704_s6 + $0x90] ss:$12 sps:$4 sm:$0xff]   ;;  %v6140_v4 = vld [vmem:[%s6704_s6 + $0xac] ss:$12 sps:$4 sm:$0xff]  }
 0x71d   :  { %5033 = vpow2.f32 %v4135_v40  ;;  %v6127_v2 = vld [vmem:[%s6704_s6 + $0x8] ss:$12 sps:$4 sm:$0xff]  }
 0x71e   :  { %v6146_v40 = vld [vmem:[%s6704_s6 + $0xa8] ss:$12 sps:$4 sm:$0xff]  }
 0x726   :  { %v5032_v63 = vpop.eup %5031 }
 0x727   :  { %v2152_v17 = vadd.f32 1.0, %v5032_v63  ;;  %v5034_v42 = vpop.eup %5033  ;;  %v6151_v63 = vld [vmem:[%s6704_s6 + $0x20] ss:$12 sps:$4 sm:$0xff]  }
 0x728   :  { %v2159_v59 = vadd.f32 1.0, %v5034_v42  ;;  %v6167_v42 = vld [vmem:[%s6704_s6 + $0x50] ss:$12 sps:$4 sm:$0xff]  }
 0x729   :  { %5035 = vrcp.f32 %v2152_v17  ;;  %v6160_v17 = vld [vmem:[%s6704_s6 + $0x38] ss:$12 sps:$4 sm:$0xff]  }
 0x72a   :  { %5037 = vrcp.f32 %v2159_v59  ;;  %v6174_v59 = vld [vmem:[%s6704_s6 + $0x68] ss:$12 sps:$4 sm:$0xff]  }
 0x733   :  { %v5036_v52 = vpop.eup %5035 }
 0x734   :  { %v2163_v11 = vmul.f32 %v5036_v52, %v2162_v62  ;;  %v5038_v47 = vpop.eup %5037  ;;  %v6181_v62 = vld [vmem:[%s6704_s6 + $0x80] ss:$12 sps:$4 sm:$0xff]   ;;  %v6188_v52 = vld [vmem:[%s6704_s6 + $0x98] ss:$12 sps:$4 sm:$0xff]  }
 0x735   :  { %v2166_v18 = vsub.f32 1.0, %v5038_v47  ;;  %v2168_v15 = vmul.f32 %v5038_v47, %v5902_v31  ;;  %v6067_v31 = vld [vmem:[%s6704_s6 + $0x18] ss:$12 sps:$4 sm:$0xff]  }
 0x736   :  { %v2164_v60 = vadd.f32 %v2163_v11, %v5494_v41  ;;  %v4905_v41 = vld [vmem:[%s6703_s5 + $0x1c] ss:$12 sps:$4 sm:$0xff]  }
 0x737   :  { %v6195_v11 = vld [vmem:[%s6704_s6 + $0xb0] ss:$12 sps:$4 sm:$0xff]  }
 0x738   :  { %5039 = vtanh.f32 %v2164_v60 }
 0x742   :  { %v5040_v0 = vpop.eup %5039 }
 0x743   :  { %v2167_v8 = vmul.f32 %v5040_v0, %v2166_v18 }
 0x745   :  { %v5966_v23 = vadd.f32 %v2168_v15, %v2167_v8 }
 0x747   :  { %v2178_v54 = vpack.c.bf16 %v5966_v23, %v5966_v23 }
 0x749   :  { %2372 = vmatmul.mubr.bf16.vlgmr.msra.gmra.mrb[44].mxu0 %v2178_v54  ;;  %4573 = vmatmul.mubr.bf16.vlgmr.msra.gmra.mrb[36].mxu1 %v2178_v54 }
 0x74a   :  { %2634 = vmatpush1.bf16.msra.mxu0 %v4899_v29  ;;  %4577 = vmatpush3.bf16.msra.mxu1 %v4902_v19  ;;  %v6074_v19 = vld [vmem:[%s6704_s6 + $0x34] ss:$12 sps:$4 sm:$0xff]  }
 0x74b   :  { %4592 = vmatprep.mubr.bf16.mxu1 %v2452_v33  ;;  %2635 = vmatprep.subr.bf16.mxu0 %v4905_v41 }
 0x74c   :  { %4578 = vmatprep.subr.bf16.mxu1 %v4906_v30  ;;  %2665 = vmatprep.mubr.bf16.mxu0 %v6712_v1 }
 0x74e   :  { %2636 = vmatpush1.bf16.msra.mxu0 %v4903_v5  ;;  %4579 = vmatpush3.bf16.msra.mxu1 %v4906_v30 }
 0x74f   :  { %2637 = vmatprep.subr.bf16.mxu0 %v4909_v39  ;;  %4580 = vmatprep.subr.bf16.mxu1 %v4910_v22 }
 0x752   :  { %2638 = vmatpush1.bf16.msra.mxu0 %v4907_v38  ;;  %4581 = vmatpush3.bf16.msra.mxu1 %v4910_v22 }
 0x753   :  { %2639 = vmatprep.subr.bf16.mxu0 %v4913_v55  ;;  %4582 = vmatprep.subr.bf16.mxu1 %v4914_v43 }
 0x756   :  { %2640 = vmatpush1.bf16.msra.mxu0 %v4911_v57  ;;  %4583 = vmatpush3.bf16.msra.mxu1 %v4914_v43 }
 0x757   :  { %2641 = vmatprep.subr.bf16.mxu0 %v4917_v13  ;;  %4584 = vmatprep.subr.bf16.mxu1 %v4918_v21 }
 0x75a   :  { %2642 = vmatpush1.bf16.msra.mxu0 %v4915_v27  ;;  %4585 = vmatpush3.bf16.msra.mxu1 %v4918_v21 }
 0x75b   :  { %2643 = vmatprep.subr.bf16.mxu0 %v4921_v44  ;;  %4586 = vmatprep.subr.bf16.mxu1 %v4922_v61 }
 0x75e   :  { %2644 = vmatpush1.bf16.msra.mxu0 %v4919_v48  ;;  %4587 = vmatpush3.bf16.msra.mxu1 %v4922_v61 }
 0x75f   :  { %2645 = vmatprep.subr.bf16.mxu0 %v4925_v45  ;;  %4588 = vmatprep.subr.bf16.mxu1 %v4926_v49 }
 0x762   :  { %2646 = vmatpush1.bf16.msra.mxu0 %v4923_v58  ;;  %4589 = vmatpush3.bf16.msra.mxu1 %v4926_v49 }
 0x763   :  { %2647 = vmatprep.subr.bf16.mxu0 %v4929_v56  ;;  %4590 = vmatprep.subr.bf16.mxu1 %v4930_v6 }
 0x766   :  { %2648 = vmatpush1.bf16.msra.mxu0 %v4927_v9  ;;  %4591 = vmatpush3.bf16.msra.mxu1 %v4930_v6 }
 0x767   :  { %4600 = vmatprep.subr.bf16.mxu1 %v6714_v20  ;;  %2959 = vmatprep.subr.bf16.mxu0 %v6050_v7 }
 0x769   :  { %2666 = vmatmul.mubr.bf16.vlgmr.msra.gmra.mrb[48].mxu0 %v2452_v33  ;;  %4593 = vmatmul.mubr.bf16.vlgmr.msra.gmra.mrb[40].mxu1 %v2453_v12 }
 0x76a   :  { %4596 = vmatprep.mubr.bf16.mxu1 %v2454_v16  ;;  %2675 = vmatprep.mubr.bf16.mxu0 %v6712_v1 }
 0x76b   :  { %2960 = vmatpush1.bf16.msra.mxu0 %v6055_v35  ;;  %4601 = vmatpush3.bf16.msra.mxu1 %v6127_v2 }
 0x76c   :  { %2961 = vmatprep.subr.bf16.mxu0 %v6062_v25  ;;  %4602 = vmatprep.subr.bf16.mxu1 %v6714_v20 }
 0x76f   :  { %2962 = vmatpush1.bf16.msra.mxu0 %v6067_v31  ;;  %4603 = vmatpush3.bf16.msra.mxu1 %v6151_v63 }
 0x770   :  { %2963 = vmatprep.subr.bf16.mxu0 %v6074_v19  ;;  %4604 = vmatprep.subr.bf16.mxu1 %v6714_v20 }
 0x771   :  { %2676 = vmatmul.mubr.bf16.gmra.mrb[52].mxu0 %v2453_v12 }
 0x772   :  { %2685 = vmatprep.mubr.bf16.mxu0 %v6712_v1 }
 0x773   :  { %2964 = vmatpush1.bf16.msra.mxu0 %v6079_v24  ;;  %4605 = vmatpush3.bf16.msra.mxu1 %v6160_v17 }
 0x774   :  { %2965 = vmatprep.subr.bf16.mxu0 %v6086_v28  ;;  %4606 = vmatprep.subr.bf16.mxu1 %v6714_v20 }
 0x777   :  { %2966 = vmatpush1.bf16.msra.mxu0 %v6092_v32  ;;  %4607 = vmatpush3.bf16.msra.mxu1 %v6167_v42 }
 0x778   :  { %2967 = vmatprep.subr.bf16.mxu0 %v6098_v34  ;;  %4608 = vmatprep.subr.bf16.mxu1 %v6714_v20 }
 0x779   :  { %2686 = vmatmul.mubr.bf16.gmra.mrb[56].mxu0 %v2454_v16 }
 0x77a   :  { %2695 = vmatprep.mubr.bf16.mxu0 %v6712_v1 }
 0x77b   :  { %2968 = vmatpush1.bf16.msra.mxu0 %v6103_v37  ;;  %4609 = vmatpush3.bf16.msra.mxu1 %v6174_v59 }
 0x77c   :  { %2969 = vmatprep.subr.bf16.mxu0 %v6110_v26  ;;  %4610 = vmatprep.subr.bf16.mxu1 %v6714_v20 }
 0x77f   :  { %2970 = vmatpush1.bf16.msra.mxu0 %v6116_v14  ;;  %4611 = vmatpush3.bf16.msra.mxu1 %v6181_v62 }
 0x780   :  { %2971 = vmatprep.subr.bf16.mxu0 %v6122_v53  ;;  %4612 = vmatprep.subr.bf16.mxu1 %v6714_v20 }
 0x783   :  { %2972 = vmatpush1.bf16.msra.mxu0 %v6132_v36  ;;  %4613 = vmatpush3.bf16.msra.mxu1 %v6188_v52 }
 0x784   :  { %2973 = vmatprep.subr.bf16.mxu0 %v6140_v4  ;;  %4614 = vmatprep.subr.bf16.mxu1 %v6714_v20 }
 0x787   :  { %2974 = vmatpush1.bf16.msra.mxu0 %v6146_v40  ;;  %4615 = vmatpush3.bf16.msra.mxu1 %v6195_v11 }
 0x788   :  { %3072 = vmatprep.subr.bf16.mxu0 %v6050_v7  ;;  %4620 = vmatprep.subr.bf16.mxu1 %v6714_v20 }
 0x81c   :  { %v2373_v60 = vpop.f32.mrb[44].mxu0  ;;  %v2414_v47 = vpop.f32.mrb[36].mxu1 }
 0x81d   :  { %v2420_v18 = vadd.f32 %v2373_v60, %v5511_v3  ;;  %v2375_v0 = vpop.f32.mrb[45].mxu0  ;;  %v4574_v8 = vpop.f32.mrb[37].mxu1  ;;  %v5131_v3 = vld [vmem:[%s6702_s4] ss:$0 sm:$0xff] }
 0x81e   :  { %v2427_v15 = vadd.f32 %v2375_v0, %v5513_v10  ;;  %v2377_v29 = vpop.f32.mrb[46].mxu0  ;;  %v2417_v54 = vpop.f32.mrb[38].mxu1  ;;  %v2434_v43 = vadd.f32 %v5131_v3, %v2414_v47 }
 0x81f   :  { %v4160_v41 = vmul.f32 -1.442695, %v2420_v18  ;;  %v2378_v30 = vpop.f32.mrb[47].mxu0  ;;  %v4575_v33 = vpop.f32.mrb[39].mxu1 }
 0x820   :  { %v4161_v5 = vmul.f32 -1.442695, %v2427_v15 }
 0x821   :  { %5041 = vpow2.f32 %v4160_v41 }
 0x822   :  { %5043 = vpow2.f32 %v4161_v5 }
 0x82b   :  { %v5042_v39 = vpop.eup %5041 }
 0x82c   :  { %v2424_v22 = vadd.f32 1.0, %v5042_v39  ;;  %v5044_v38 = vpop.eup %5043 }
 0x82d   :  { %v2431_v55 = vadd.f32 1.0, %v5044_v38 }
 0x82e   :  { %5045 = vrcp.f32 %v2424_v22 }
 0x82f   :  { %5047 = vrcp.f32 %v2431_v55 }
 0x838   :  { %v5046_v57 = vpop.eup %5045 }
 0x839   :  { %v2435_v10 = vmul.f32 %v5046_v57, %v2434_v43  ;;  %v5048_v56 = vpop.eup %5047  ;;  %v6722_v57 = vsub.s32 1, %v5450_v50 }
 0x83a   :  { %v2438_v12 = vsub.f32 1.0, %v5048_v56  ;;  %v2440_v18 = vmul.f32 %v5048_v56, %v5966_v23 }
 0x83b   :  { %v2436_v13 = vadd.f32 %v2435_v10, %v5502_v46 }
 0x83c   :  { %v6206_v21 = vpop.f32.mrb[48].mxu0  ;;  %v6208_v27 = vpop.f32.mrb[40].mxu1 }
 0x83d   :  { %5049 = vtanh.f32 %v2436_v13  ;;  %v6210_v44 = vpop.f32.mrb[49].mxu0  ;;  %v6212_v61 = vpop.f32.mrb[41].mxu1 }
 0x83e   :  { %v6214_v48 = vpop.f32.mrb[50].mxu0  ;;  %v6216_v45 = vpop.f32.mrb[42].mxu1 }
 0x83f   :  { %v6218_v49 = vpop.f32.mrb[51].mxu0  ;;  %v6220_v58 = vpop.f32.mrb[43].mxu1 }
 0x844   :  { %v6222_v6 = vpop.f32.mrb[52].mxu0 }
 0x845   :  { %v6224_v46 = vpop.f32.mrb[53].mxu0 }
 0x846   :  { %v6226_v9 = vpop.f32.mrb[54].mxu0 }
 0x847   :  { %v5050_v16 = vpop.eup %5049  ;;  %v6228_v60 = vpop.f32.mrb[55].mxu0 }
 0x848   :  { %v2439_v47 = vmul.f32 %v5050_v16, %v2438_v12 }
 0x84a   :  { %v2441_v0 = vadd.f32 %v2440_v18, %v2439_v47 }
 0x84c   :  { %v6231_v8 = vpop.f32.mrb[56].mxu0  ;;  %v2455_v15 = vpack.c.bf16 %v2441_v0, %v5966_v23  ;;  %v2488_v23 = vld [vmem:[%s6705_s7] sm:$0x7] }
 0x84d   :  { %v6234_v29 = vpop.f32.mrb[57].mxu0  ;;  %v6297_v55 = vrot.slane %v2488_v23, %v59_v51  ;;  %v6305_v10 = vrot.slane %v2488_v23, %v6722_v57 }
 0x84e   :  { %v6236_v54 = vpop.f32.mrb[58].mxu0  ;;  %2696 = vmatmul.mubr.bf16.gmra.mrb[60].mxu0 %v2455_v15  ;;  %4597 = vmatmul.mubr.bf16.gmra.mrb[44].mxu1 %v2455_v15 }
 0x84f   :  { %v6238_v41 = vpop.f32.mrb[59].mxu0  ;;  %2991 = vmatprep.mubr.bf16.mxu0 %v6712_v1  ;;  %4616 = vmatprep.mubr.msk.bf16.mxu1 %vm5158_vm1, %v6714_v20  ;;  %v2668_v13 = vadd.f32 %v6206_v21, %v6297_v55  ;;  %v2670_v56 = vadd.f32 %v6210_v44, %v6305_v10  ;;  %v6314_v44 = vld [vmem:[%s6706_s8] ss:$0 sm:$0xff] }
 0x856   :  { %2992 = vmatmul.mubr.bf16.vlgmr.msra.gmra.mrb[64].mxu0 %v6712_v1  ;;  %4617 = vmatmul.mubr.bf16.vlgmr.msra.gmra.mrb[48].mxu1 %v6712_v1 }
 0x857   :  { %3073 = vmatpush1.bf16.msra.mxu0 %v6055_v35  ;;  %4621 = vmatpush3.bf16.msra.mxu1 %v6127_v2 }
 0x858   :  { %3074 = vmatprep.subr.bf16.mxu0 %v6062_v25  ;;  %4622 = vmatprep.subr.bf16.mxu1 %v6714_v20 }
 0x859   :  { %3104 = vmatprep.mubr.bf16.mxu0 %v6712_v1  ;;  %4636 = vmatprep.mubr.msk.bf16.mxu1 %vm5158_vm1, %v6714_v20 }
 0x85b   :  { %3075 = vmatpush1.bf16.msra.mxu0 %v6067_v31  ;;  %4623 = vmatpush3.bf16.msra.mxu1 %v6151_v63 }
 0x85c   :  { %3076 = vmatprep.subr.bf16.mxu0 %v6074_v19  ;;  %4624 = vmatprep.subr.bf16.mxu1 %v6714_v20 }
 0x85f   :  { %3077 = vmatpush1.bf16.msra.mxu0 %v6079_v24  ;;  %4625 = vmatpush3.bf16.msra.mxu1 %v6160_v17 }
 0x860   :  { %3078 = vmatprep.subr.bf16.mxu0 %v6086_v28  ;;  %4626 = vmatprep.subr.bf16.mxu1 %v6714_v20 }
 0x863   :  { %3079 = vmatpush1.bf16.msra.mxu0 %v6092_v32  ;;  %4627 = vmatpush3.bf16.msra.mxu1 %v6167_v42 }
 0x864   :  { %3080 = vmatprep.subr.bf16.mxu0 %v6098_v34  ;;  %4628 = vmatprep.subr.bf16.mxu1 %v6714_v20 }
 0x867   :  { %3081 = vmatpush1.bf16.msra.mxu0 %v6103_v37  ;;  %4629 = vmatpush3.bf16.msra.mxu1 %v6174_v59 }
 0x868   :  { %3082 = vmatprep.subr.bf16.mxu0 %v6110_v26  ;;  %4630 = vmatprep.subr.bf16.mxu1 %v6714_v20 }
 0x86b   :  { %3083 = vmatpush1.bf16.msra.mxu0 %v6116_v14  ;;  %4631 = vmatpush3.bf16.msra.mxu1 %v6181_v62 }
 0x86c   :  { %3084 = vmatprep.subr.bf16.mxu0 %v6122_v53  ;;  %4632 = vmatprep.subr.bf16.mxu1 %v6714_v20 }
 0x86f   :  { %3085 = vmatpush1.bf16.msra.mxu0 %v6132_v36  ;;  %4633 = vmatpush3.bf16.msra.mxu1 %v6188_v52 }
 0x870   :  { %3086 = vmatprep.subr.bf16.mxu0 %v6140_v4  ;;  %4634 = vmatprep.subr.bf16.mxu1 %v6714_v20 }
 0x873   :  { %3087 = vmatpush1.bf16.msra.mxu0 %v6146_v40  ;;  %4635 = vmatpush3.bf16.msra.mxu1 %v6195_v11 }
 0x874   :  { %3179 = vmatprep.subr.bf16.mxu0 %v6050_v7  ;;  %4640 = vmatprep.subr.bf16.mxu1 %v6714_v20 }
 0x921   :  { %v6283_v30 = vpop.f32.mrb[60].mxu0  ;;  %v6285_v33 = vpop.f32.mrb[44].mxu1 }
 0x922   :  { %6716 = vst [vmem:[#allocation4_spill] sm:$0xff] %v6283_v30  ;;  %6717 = vst [vmem:[#allocation5_spill] sm:$0xff] %v6285_v33  ;;  %v6287_v5 = vpop.f32.mrb[61].mxu0  ;;  %v6289_v39 = vpop.f32.mrb[45].mxu1 }
 0x923   :  { %6718 = vst [vmem:[#allocation6_spill] sm:$0xff] %v6287_v5  ;;  %v6291_v22 = vpop.f32.mrb[62].mxu0  ;;  %v6293_v38 = vpop.f32.mrb[46].mxu1 }
 0x924   :  { %6719 = vst [vmem:[#allocation7_spill] sm:$0xff] %v6291_v22  ;;  %6720 = vst [vmem:[#allocation8_spill] sm:$0xff] %v6293_v38  ;;  %v6299_v3 = vpop.f32.mrb[63].mxu0  ;;  %v6301_v43 = vpop.f32.mrb[47].mxu1 }
 0x925   :  { %6721 = vst [vmem:[#allocation9_spill] sm:$0xff] %v6299_v3 }
 0x929   :  { %v2993_v12 = vpop.f32.mrb[64].mxu0  ;;  %v3034_v16 = vpop.f32.mrb[48].mxu1 }
 0x92a   :  { %v3040_v47 = vadd.f32 %v2993_v12, %v2668_v13  ;;  %v2995_v18 = vpop.f32.mrb[65].mxu0  ;;  %v4618_v51 = vpop.f32.mrb[49].mxu1  ;;  %v6723_v13 = vsub.s32 2, %v5450_v50 }
 0x92b   :  { %v3047_v0 = vadd.f32 %v2995_v18, %v2670_v56  ;;  %v2997_v15 = vpop.f32.mrb[66].mxu0  ;;  %v3037_v1 = vpop.f32.mrb[50].mxu1 }
 0x92c   :  { %v4210_v20 = vmul.f32 -1.442695, %v3040_v47  ;;  %v2998_v38 = vpop.f32.mrb[67].mxu0  ;;  %v4619_v3 = vpop.f32.mrb[51].mxu1  ;;  %v6318_v56 = vrot.slane %v2488_v23, %v6723_v13  ;;  %v6725_v23 = vmov 0  }
 0x92d   :  { %v4211_v57 = vmul.f32 -1.442695, %v3047_v0  ;;  %v3060_v38 = vadd.f32 %v6314_v44, %v3034_v16  ;;  %v2672_v16 = vadd.f32 %v6214_v48, %v6297_v55 }
 0x92e   :  { %5051 = vpow2.f32 %v4210_v20  ;;  %v2741_v20 = vadd.f32 %v6212_v61, %v6318_v56  ;;  %v6724_v61 = vmov 0.0  }
 0x92f   :  { %5053 = vpow2.f32 %v4211_v57  ;;  %v2674_v57 = vadd.f32 %v6218_v49, %v6305_v10 }
 0x938   :  { %v5052_v22 = vpop.eup %5051 }
 0x939   :  { %v3044_v33 = vadd.f32 1.0, %v5052_v22  ;;  %v5054_v21 = vpop.eup %5053 }
 0x93a   :  { %v3051_v1 = vadd.f32 1.0, %v5054_v21 }
 0x93b   :  { %5055 = vrcp.f32 %v3044_v33 }
 0x93c   :  { %5057 = vrcp.f32 %v3051_v1 }
 0x945   :  { %v5056_v3 = vpop.eup %5055 }
 0x946   :  { %v3061_v22 = vmul.f32 %v5056_v3, %v3060_v38  ;;  %v5058_v12 = vpop.eup %5057 }
 0x947   :  { %v3064_v47 = vsub.f32 1.0, %v5058_v12  ;;  %v3066_v0 = vmul.f32 0.0, %v5058_v12 }
 0x948   :  { %v3062_v33 = vadd.f32 %v3061_v22, %v2741_v20 }
 0x94a   :  { %5059 = vtanh.f32 %v3062_v33 }
 0x954   :  { %v5060_v18 = vpop.eup %5059 }
 0x955   :  { %v3065_v51 = vmul.f32 %v5060_v18, %v3064_v47 }
 0x957   :  { %v6323_v15 = vadd.f32 %v3066_v0, %v3065_v51 }
 0x959   :  { %v3071_v50 = vpack.c.bf16 %v6323_v15, %v6323_v15 }
 0x95b   :  { %3105 = vmatmul.mubr.bf16.vlgmr.msra.gmra.mrb[68].mxu0 %v3071_v50  ;;  %4637 = vmatmul.mubr.bf16.vlgmr.msra.gmra.mrb[52].mxu1 %v3071_v50 }
 0x95c   :  { %3180 = vmatpush1.bf16.msra.mxu0 %v6055_v35  ;;  %4641 = vmatpush3.bf16.msra.mxu1 %v6127_v2 }
 0x95d   :  { %3181 = vmatprep.subr.bf16.mxu0 %v6062_v25  ;;  %4642 = vmatprep.subr.bf16.mxu1 %v6724_v61 }
 0x95e   :  { %3211 = vmatprep.mubr.bf16.mxu0 %v6725_v23  ;;  %4656 = vmatprep.mubr.msk.bf16.mxu1 %vm5158_vm1, %v6724_v61 }
 0x960   :  { %3182 = vmatpush1.bf16.msra.mxu0 %v6067_v31  ;;  %4643 = vmatpush3.bf16.msra.mxu1 %v6151_v63 }
 0x961   :  { %3183 = vmatprep.subr.bf16.mxu0 %v6074_v19  ;;  %4644 = vmatprep.subr.bf16.mxu1 %v6724_v61 }
 0x964   :  { %3184 = vmatpush1.bf16.msra.mxu0 %v6079_v24  ;;  %4645 = vmatpush3.bf16.msra.mxu1 %v6160_v17 }
 0x965   :  { %3185 = vmatprep.subr.bf16.mxu0 %v6086_v28  ;;  %4646 = vmatprep.subr.bf16.mxu1 %v6724_v61 }
 0x968   :  { %3186 = vmatpush1.bf16.msra.mxu0 %v6092_v32  ;;  %4647 = vmatpush3.bf16.msra.mxu1 %v6167_v42 }
 0x969   :  { %3187 = vmatprep.subr.bf16.mxu0 %v6098_v34  ;;  %4648 = vmatprep.subr.bf16.mxu1 %v6724_v61 }
 0x96c   :  { %3188 = vmatpush1.bf16.msra.mxu0 %v6103_v37  ;;  %4649 = vmatpush3.bf16.msra.mxu1 %v6174_v59 }
 0x96d   :  { %3189 = vmatprep.subr.bf16.mxu0 %v6110_v26  ;;  %4650 = vmatprep.subr.bf16.mxu1 %v6724_v61 }
 0x970   :  { %3190 = vmatpush1.bf16.msra.mxu0 %v6116_v14  ;;  %4651 = vmatpush3.bf16.msra.mxu1 %v6181_v62 }
 0x971   :  { %3191 = vmatprep.subr.bf16.mxu0 %v6122_v53  ;;  %4652 = vmatprep.subr.bf16.mxu1 %v6724_v61 }
 0x974   :  { %3192 = vmatpush1.bf16.msra.mxu0 %v6132_v36  ;;  %4653 = vmatpush3.bf16.msra.mxu1 %v6188_v52 }
 0x975   :  { %3193 = vmatprep.subr.bf16.mxu0 %v6140_v4  ;;  %4654 = vmatprep.subr.bf16.mxu1 %v6724_v61 }
 0x978   :  { %3194 = vmatpush1.bf16.msra.mxu0 %v6146_v40  ;;  %4655 = vmatpush3.bf16.msra.mxu1 %v6195_v11 }
 0x979   :  { %3286 = vmatprep.subr.bf16.mxu0 %v6050_v7  ;;  %4660 = vmatprep.subr.bf16.mxu1 %v6724_v61 }
 0xa2e   :  { %v3106_v21 = vpop.f32.mrb[68].mxu0  ;;  %v3147_v13 = vpop.f32.mrb[52].mxu1 }
 0xa2f   :  { %v3153_v1 = vadd.f32 %v3106_v21, %v2672_v16  ;;  %v3108_v38 = vpop.f32.mrb[69].mxu0  ;;  %v4638_v3 = vpop.f32.mrb[53].mxu1  ;;  %v3167_v49 = vadd.f32 %v6314_v44, %v3147_v13  ;;  %v2744_v16 = vadd.f32 %v6220_v58, %v6318_v56  ;;  %v2678_v58 = vadd.f32 %v6222_v6, %v6297_v55 }
 0xa30   :  { %v3160_v20 = vadd.f32 %v3108_v38, %v2674_v57  ;;  %v3110_v22 = vpop.f32.mrb[70].mxu0  ;;  %v3150_v33 = vpop.f32.mrb[54].mxu1 }
 0xa31   :  { %v4213_v12 = vmul.f32 -1.442695, %v3153_v1  ;;  %v3111_v47 = vpop.f32.mrb[71].mxu0  ;;  %v4639_v18 = vpop.f32.mrb[55].mxu1 }
 0xa32   :  { %v4214_v51 = vmul.f32 -1.442695, %v3160_v20 }
 0xa33   :  { %5061 = vpow2.f32 %v4213_v12 }
 0xa34   :  { %5063 = vpow2.f32 %v4214_v51 }
 0xa3d   :  { %v5062_v0 = vpop.eup %5061 }
 0xa3e   :  { %v3157_v50 = vadd.f32 1.0, %v5062_v0  ;;  %v5064_v48 = vpop.eup %5063 }
 0xa3f   :  { %v3164_v5 = vadd.f32 1.0, %v5064_v48 }
 0xa40   :  { %5065 = vrcp.f32 %v3157_v50 }
 0xa41   :  { %5067 = vrcp.f32 %v3164_v5 }
 0xa4a   :  { %v5066_v30 = vpop.eup %5065 }
 0xa4b   :  { %v3168_v57 = vmul.f32 %v5066_v30, %v3167_v49  ;;  %v5068_v1 = vpop.eup %5067  ;;  %v2680_v30 = vadd.f32 %v6224_v46, %v6305_v10 }
 0xa4c   :  { %v3171_v38 = vsub.f32 1.0, %v5068_v1  ;;  %v3173_v22 = vmul.f32 %v5068_v1, %v6323_v15 }
 0xa4d   :  { %v3169_v21 = vadd.f32 %v3168_v57, %v2744_v16 }
 0xa4f   :  { %5069 = vtanh.f32 %v3169_v21 }
 0xa59   :  { %v5070_v3 = vpop.eup %5069 }
 0xa5a   :  { %v3172_v20 = vmul.f32 %v5070_v3, %v3171_v38 }
 0xa5c   :  { %v6370_v33 = vadd.f32 %v3173_v22, %v3172_v20  ;;  %v2749_v20 = vadd.f32 %v6208_v27, %v6318_v56  ;;  %v2682_v27 = vadd.f32 %v6226_v9, %v6297_v55 }
 0xa5e   :  { %v3178_v12 = vpack.c.bf16 %v6370_v33, %v6370_v33 }
 0xa60   :  { %3212 = vmatmul.mubr.bf16.vlgmr.msra.gmra.mrb[72].mxu0 %v3178_v12  ;;  %4657 = vmatmul.mubr.bf16.vlgmr.msra.gmra.mrb[56].mxu1 %v3178_v12 }
 0xa61   :  { %3287 = vmatpush1.bf16.msra.mxu0 %v6055_v35  ;;  %4661 = vmatpush3.bf16.msra.mxu1 %v6127_v2 }
 0xa62   :  { %3288 = vmatprep.subr.bf16.mxu0 %v6062_v25  ;;  %4662 = vmatprep.subr.bf16.mxu1 %v6724_v61 }
 0xa63   :  { %3318 = vmatprep.mubr.bf16.mxu0 %v6725_v23  ;;  %4676 = vmatprep.mubr.msk.bf16.mxu1 %vm5158_vm1, %v6724_v61 }
 0xa65   :  { %3289 = vmatpush1.bf16.msra.mxu0 %v6067_v31  ;;  %4663 = vmatpush3.bf16.msra.mxu1 %v6151_v63 }
 0xa66   :  { %3290 = vmatprep.subr.bf16.mxu0 %v6074_v19  ;;  %4664 = vmatprep.subr.bf16.mxu1 %v6724_v61 }
 0xa69   :  { %3291 = vmatpush1.bf16.msra.mxu0 %v6079_v24  ;;  %4665 = vmatpush3.bf16.msra.mxu1 %v6160_v17 }
 0xa6a   :  { %3292 = vmatprep.subr.bf16.mxu0 %v6086_v28  ;;  %4666 = vmatprep.subr.bf16.mxu1 %v6724_v61 }
 0xa6d   :  { %3293 = vmatpush1.bf16.msra.mxu0 %v6092_v32  ;;  %4667 = vmatpush3.bf16.msra.mxu1 %v6167_v42 }
 0xa6e   :  { %3294 = vmatprep.subr.bf16.mxu0 %v6098_v34  ;;  %4668 = vmatprep.subr.bf16.mxu1 %v6724_v61 }
 0xa71   :  { %3295 = vmatpush1.bf16.msra.mxu0 %v6103_v37  ;;  %4669 = vmatpush3.bf16.msra.mxu1 %v6174_v59 }
 0xa72   :  { %3296 = vmatprep.subr.bf16.mxu0 %v6110_v26  ;;  %4670 = vmatprep.subr.bf16.mxu1 %v6724_v61 }
 0xa75   :  { %3297 = vmatpush1.bf16.msra.mxu0 %v6116_v14  ;;  %4671 = vmatpush3.bf16.msra.mxu1 %v6181_v62 }
 0xa76   :  { %3298 = vmatprep.subr.bf16.mxu0 %v6122_v53  ;;  %4672 = vmatprep.subr.bf16.mxu1 %v6724_v61 }
 0xa79   :  { %3299 = vmatpush1.bf16.msra.mxu0 %v6132_v36  ;;  %4673 = vmatpush3.bf16.msra.mxu1 %v6188_v52 }
 0xa7a   :  { %3300 = vmatprep.subr.bf16.mxu0 %v6140_v4  ;;  %4674 = vmatprep.subr.bf16.mxu1 %v6724_v61 }
 0xa7d   :  { %3301 = vmatpush1.bf16.msra.mxu0 %v6146_v40  ;;  %4675 = vmatpush3.bf16.msra.mxu1 %v6195_v11 }
 0xa7e   :  { %3393 = vmatprep.subr.bf16.mxu0 %v6050_v7  ;;  %4680 = vmatprep.subr.bf16.mxu1 %v6724_v61 }
 0xb33   :  { %v3213_v5 = vpop.f32.mrb[72].mxu0  ;;  %v3254_v15 = vpop.f32.mrb[56].mxu1 }
 0xb34   :  { %v3260_v13 = vadd.f32 %v3213_v5, %v2678_v58  ;;  %v3215_v47 = vpop.f32.mrb[73].mxu0  ;;  %v4658_v18 = vpop.f32.mrb[57].mxu1  ;;  %v3274_v46 = vadd.f32 %v6314_v44, %v3254_v15 }
 0xb35   :  { %v3267_v51 = vadd.f32 %v3215_v47, %v2680_v30  ;;  %v3217_v0 = vpop.f32.mrb[74].mxu0  ;;  %v3257_v50 = vpop.f32.mrb[58].mxu1 }
 0xb36   :  { %v4215_v48 = vmul.f32 -1.442695, %v3260_v13  ;;  %v3218_v49 = vpop.f32.mrb[75].mxu0  ;;  %v4659_v16 = vpop.f32.mrb[59].mxu1 }
 0xb37   :  { %v4216_v57 = vmul.f32 -1.442695, %v3267_v51 }
 0xb38   :  { %5071 = vpow2.f32 %v4215_v48 }
 0xb39   :  { %5073 = vpow2.f32 %v4216_v57 }
 0xb42   :  { %v5072_v21 = vpop.eup %5071 }
 0xb43   :  { %v3264_v1 = vadd.f32 1.0, %v5072_v21  ;;  %v5074_v6 = vpop.eup %5073 }
 0xb44   :  { %v3271_v38 = vadd.f32 1.0, %v5074_v6 }
 0xb45   :  { %5075 = vrcp.f32 %v3264_v1 }
 0xb46   :  { %5077 = vrcp.f32 %v3271_v38 }
 0xb4f   :  { %v5076_v3 = vpop.eup %5075 }
 0xb50   :  { %v3275_v22 = vmul.f32 %v5076_v3, %v3274_v46  ;;  %v5078_v58 = vpop.eup %5077 }
 0xb51   :  { %v3278_v30 = vsub.f32 1.0, %v5078_v58  ;;  %v3280_v47 = vmul.f32 %v5078_v58, %v6370_v33  ;;  %v2684_v33 = vadd.f32 %v6228_v60, %v6305_v10  ;;  %v2752_v58 = vadd.f32 %v6216_v45, %v6318_v56 }
 0xb52   :  { %v3276_v12 = vadd.f32 %v3275_v22, %v2749_v20  ;;  %v2688_v45 = vadd.f32 %v6231_v8, %v6297_v55 }
 0xb54   :  { %5079 = vtanh.f32 %v3276_v12 }
 0xb5e   :  { %v5080_v5 = vpop.eup %5079 }
 0xb5f   :  { %v3279_v13 = vmul.f32 %v5080_v5, %v3278_v30 }
 0xb61   :  { %v6417_v18 = vadd.f32 %v3280_v47, %v3279_v13 }
 0xb63   :  { %v3285_v51 = vpack.c.bf16 %v6417_v18, %v6417_v18 }
 0xb65   :  { %3319 = vmatmul.mubr.bf16.vlgmr.msra.gmra.mrb[76].mxu0 %v3285_v51  ;;  %4677 = vmatmul.mubr.bf16.vlgmr.msra.gmra.mrb[60].mxu1 %v3285_v51 }
 0xb66   :  { %3394 = vmatpush1.bf16.msra.mxu0 %v6055_v35  ;;  %4681 = vmatpush3.bf16.msra.mxu1 %v6127_v2 }
 0xb67   :  { %3395 = vmatprep.subr.bf16.mxu0 %v6062_v25  ;;  %4682 = vmatprep.subr.bf16.mxu1 %v6724_v61 }
 0xb68   :  { %3425 = vmatprep.mubr.bf16.mxu0 %v6725_v23  ;;  %4696 = vmatprep.mubr.msk.bf16.mxu1 %vm5158_vm1, %v6724_v61 }
 0xb6a   :  { %3396 = vmatpush1.bf16.msra.mxu0 %v6067_v31  ;;  %4683 = vmatpush3.bf16.msra.mxu1 %v6151_v63 }
 0xb6b   :  { %3397 = vmatprep.subr.bf16.mxu0 %v6074_v19  ;;  %4684 = vmatprep.subr.bf16.mxu1 %v6724_v61 }
 0xb6e   :  { %3398 = vmatpush1.bf16.msra.mxu0 %v6079_v24  ;;  %4685 = vmatpush3.bf16.msra.mxu1 %v6160_v17 }
 0xb6f   :  { %3399 = vmatprep.subr.bf16.mxu0 %v6086_v28  ;;  %4686 = vmatprep.subr.bf16.mxu1 %v6724_v61 }
 0xb72   :  { %3400 = vmatpush1.bf16.msra.mxu0 %v6092_v32  ;;  %4687 = vmatpush3.bf16.msra.mxu1 %v6167_v42 }
 0xb73   :  { %3401 = vmatprep.subr.bf16.mxu0 %v6098_v34  ;;  %4688 = vmatprep.subr.bf16.mxu1 %v6724_v61 }
 0xb76   :  { %3402 = vmatpush1.bf16.msra.mxu0 %v6103_v37  ;;  %4689 = vmatpush3.bf16.msra.mxu1 %v6174_v59 }
 0xb77   :  { %3403 = vmatprep.subr.bf16.mxu0 %v6110_v26  ;;  %4690 = vmatprep.subr.bf16.mxu1 %v6724_v61 }
 0xb7a   :  { %3404 = vmatpush1.bf16.msra.mxu0 %v6116_v14  ;;  %4691 = vmatpush3.bf16.msra.mxu1 %v6181_v62 }
 0xb7b   :  { %3405 = vmatprep.subr.bf16.mxu0 %v6122_v53  ;;  %4692 = vmatprep.subr.bf16.mxu1 %v6724_v61 }
 0xb7e   :  { %3406 = vmatpush1.bf16.msra.mxu0 %v6132_v36  ;;  %4693 = vmatpush3.bf16.msra.mxu1 %v6188_v52 }
 0xb7f   :  { %3407 = vmatprep.subr.bf16.mxu0 %v6140_v4  ;;  %4694 = vmatprep.subr.bf16.mxu1 %v6724_v61 }
 0xb82   :  { %3408 = vmatpush1.bf16.msra.mxu0 %v6146_v40  ;;  %4695 = vmatpush3.bf16.msra.mxu1 %v6195_v11 }
 0xb83   :  { %3500 = vmatprep.subr.bf16.mxu0 %v6050_v7  ;;  %4700 = vmatprep.subr.bf16.mxu1 %v6724_v61 }
 0xc38   :  { %v3320_v15 = vpop.f32.mrb[76].mxu0  ;;  %v3361_v0 = vpop.f32.mrb[60].mxu1 }
 0xc39   :  { %v3367_v50 = vadd.f32 %v3320_v15, %v2682_v27  ;;  %v3322_v48 = vpop.f32.mrb[77].mxu0  ;;  %v4678_v49 = vpop.f32.mrb[61].mxu1  ;;  %v3381_v60 = vadd.f32 %v6314_v44, %v3361_v0 }
 0xc3a   :  { %v3374_v16 = vadd.f32 %v3322_v48, %v2684_v33  ;;  %v3324_v57 = vpop.f32.mrb[78].mxu0  ;;  %v3364_v21 = vpop.f32.mrb[62].mxu1 }
 0xc3b   :  { %v4217_v1 = vmul.f32 -1.442695, %v3367_v50  ;;  %v3325_v6 = vpop.f32.mrb[79].mxu0  ;;  %v4679_v38 = vpop.f32.mrb[63].mxu1 }
 0xc3c   :  { %v4218_v46 = vmul.f32 -1.442695, %v3374_v16 }
 0xc3d   :  { %5081 = vpow2.f32 %v4217_v1 }
 0xc3e   :  { %5083 = vpow2.f32 %v4218_v46 }
 0xc47   :  { %v5082_v3 = vpop.eup %5081 }
 0xc48   :  { %v3371_v20 = vadd.f32 1.0, %v5082_v3  ;;  %v5084_v9 = vpop.eup %5083 }
 0xc49   :  { %v3378_v22 = vadd.f32 1.0, %v5084_v9 }
 0xc4a   :  { %5085 = vrcp.f32 %v3371_v20 }
 0xc4b   :  { %5087 = vrcp.f32 %v3378_v22 }
 0xc54   :  { %v5086_v12 = vpop.eup %5085 }
 0xc55   :  { %v3382_v30 = vmul.f32 %v5086_v12, %v3381_v60  ;;  %v5088_v13 = vpop.eup %5087  ;;  %v2757_v12 = vadd.f32 %v6289_v39, %v6318_v56 }
 0xc56   :  { %v3385_v47 = vsub.f32 1.0, %v5088_v13  ;;  %v3387_v33 = vmul.f32 %v5088_v13, %v6417_v18  ;;  %v2690_v18 = vadd.f32 %v6234_v29, %v6305_v10 }
 0xc57   :  { %v3383_v5 = vadd.f32 %v3382_v30, %v2752_v58 }
 0xc59   :  { %5089 = vtanh.f32 %v3383_v5 }
 0xc63   :  { %v5090_v51 = vpop.eup %5089 }
 0xc64   :  { %v3386_v27 = vmul.f32 %v5090_v51, %v3385_v47 }
 0xc66   :  { %v6464_v15 = vadd.f32 %v3387_v33, %v3386_v27 }
 0xc68   :  { %v3392_v50 = vpack.c.bf16 %v6464_v15, %v6464_v15 }
 0xc6a   :  { %3426 = vmatmul.mubr.bf16.vlgmr.msra.gmra.mrb[80].mxu0 %v3392_v50  ;;  %4697 = vmatmul.mubr.bf16.vlgmr.msra.gmra.mrb[64].mxu1 %v3392_v50 }
 0xc6b   :  { %3501 = vmatpush1.bf16.msra.mxu0 %v6055_v35  ;;  %4701 = vmatpush3.bf16.msra.mxu1 %v6127_v2 }
 0xc6c   :  { %3502 = vmatprep.subr.bf16.mxu0 %v6062_v25  ;;  %4702 = vmatprep.subr.bf16.mxu1 %v6724_v61 }
 0xc6d   :  { %3532 = vmatprep.mubr.bf16.mxu0 %v6725_v23  ;;  %4716 = vmatprep.mubr.msk.bf16.mxu1 %vm5158_vm1, %v6724_v61 }
 0xc6f   :  { %3503 = vmatpush1.bf16.msra.mxu0 %v6067_v31  ;;  %4703 = vmatpush3.bf16.msra.mxu1 %v6151_v63 }
 0xc70   :  { %3504 = vmatprep.subr.bf16.mxu0 %v6074_v19  ;;  %4704 = vmatprep.subr.bf16.mxu1 %v6724_v61 }
 0xc73   :  { %3505 = vmatpush1.bf16.msra.mxu0 %v6079_v24  ;;  %4705 = vmatpush3.bf16.msra.mxu1 %v6160_v17 }
 0xc74   :  { %3506 = vmatprep.subr.bf16.mxu0 %v6086_v28  ;;  %4706 = vmatprep.subr.bf16.mxu1 %v6724_v61 }
 0xc77   :  { %3507 = vmatpush1.bf16.msra.mxu0 %v6092_v32  ;;  %4707 = vmatpush3.bf16.msra.mxu1 %v6167_v42 }
 0xc78   :  { %3508 = vmatprep.subr.bf16.mxu0 %v6098_v34  ;;  %4708 = vmatprep.subr.bf16.mxu1 %v6724_v61 }
 0xc7b   :  { %3509 = vmatpush1.bf16.msra.mxu0 %v6103_v37  ;;  %4709 = vmatpush3.bf16.msra.mxu1 %v6174_v59 }
 0xc7c   :  { %3510 = vmatprep.subr.bf16.mxu0 %v6110_v26  ;;  %4710 = vmatprep.subr.bf16.mxu1 %v6724_v61 }
 0xc7f   :  { %3511 = vmatpush1.bf16.msra.mxu0 %v6116_v14  ;;  %4711 = vmatpush3.bf16.msra.mxu1 %v6181_v62 }
 0xc80   :  { %3512 = vmatprep.subr.bf16.mxu0 %v6122_v53  ;;  %4712 = vmatprep.subr.bf16.mxu1 %v6724_v61 }
 0xc83   :  { %3513 = vmatpush1.bf16.msra.mxu0 %v6132_v36  ;;  %4713 = vmatpush3.bf16.msra.mxu1 %v6188_v52 }
 0xc84   :  { %3514 = vmatprep.subr.bf16.mxu0 %v6140_v4  ;;  %4714 = vmatprep.subr.bf16.mxu1 %v6724_v61 }
 0xc87   :  { %3515 = vmatpush1.bf16.msra.mxu0 %v6146_v40  ;;  %4715 = vmatpush3.bf16.msra.mxu1 %v6195_v11 }
 0xc88   :  { %3607 = vmatprep.subr.bf16.mxu0 %v6050_v7  ;;  %4720 = vmatprep.subr.bf16.mxu1 %v6724_v61 }
 0xd3d   :  { %v3427_v0 = vpop.f32.mrb[80].mxu0  ;;  %v3468_v48 = vpop.f32.mrb[64].mxu1 }
 0xd3e   :  { %v3474_v49 = vadd.f32 %v3427_v0, %v2688_v45  ;;  %v3429_v16 = vpop.f32.mrb[81].mxu0  ;;  %v4698_v57 = vpop.f32.mrb[65].mxu1  ;;  %v3488_v29 = vadd.f32 %v6314_v44, %v3468_v48 }
 0xd3f   :  { %v3481_v21 = vadd.f32 %v3429_v16, %v2690_v18  ;;  %v3431_v1 = vpop.f32.mrb[82].mxu0  ;;  %v3471_v6 = vpop.f32.mrb[66].mxu1  ;;  %v5135_v16 = vld [vmem:[%s6704_s6 + $0x1c] ss:$12 sps:$4 sm:$0xff]   ;;  %v5136_v57 = vld [vmem:[%s6704_s6 + $0x18] ss:$12 sps:$4 sm:$0xff]  }
 0xd40   :  { %v4219_v38 = vmul.f32 -1.442695, %v3474_v49  ;;  %v3432_v46 = vpop.f32.mrb[83].mxu0  ;;  %v4699_v3 = vpop.f32.mrb[67].mxu1  ;;  %v5134_v49 = vld [vmem:[%s6704_s6 + $0x8] ss:$12 sps:$4 sm:$0xff]  }
 0xd41   :  { %v4220_v7 = vmul.f32 -1.442695, %v3481_v21  ;;  %v5137_v21 = vld [vmem:[%s6704_s6 + $0x20] ss:$12 sps:$4 sm:$0xff]   ;;  %v5140_v6 = vld [vmem:[%s6704_s6 + $0x38] ss:$12 sps:$4 sm:$0xff]  }
 0xd42   :  { %5091 = vpow2.f32 %v4219_v38  ;;  %v5138_v1 = vld [vmem:[%s6704_s6 + $0x34] ss:$12 sps:$4 sm:$0xff]   ;;  %v5141_v38 = vld [vmem:[%s6704_s6 + $0x4c] ss:$12 sps:$4 sm:$0xff]   ;;  %v5143_v3 = vld [vmem:[%s6704_s6 + $0x50] ss:$12 sps:$4 sm:$0xff]  }
 0xd43   :  { %5093 = vpow2.f32 %v4220_v7  ;;  %v5142_v46 = vld [vmem:[%s6704_s6 + $0x48] ss:$12 sps:$4 sm:$0xff]   ;;  %v5144_v7 = vld [vmem:[%s6704_s6 + $0x64] ss:$12 sps:$4 sm:$0xff]  }
 0xd4c   :  { %v5092_v20 = vpop.eup %5091 }
 0xd4d   :  { %v3478_v9 = vadd.f32 1.0, %v5092_v20  ;;  %v5094_v8 = vpop.eup %5093  ;;  %v5145_v20 = vld [vmem:[%s6704_s6 + $0x60] ss:$12 sps:$4 sm:$0xff]  }
 0xd4e   :  { %v3485_v22 = vadd.f32 1.0, %v5094_v8  ;;  %v5147_v8 = vld [vmem:[%s6704_s6 + $0x7c] ss:$12 sps:$4 sm:$0xff]  }
 0xd4f   :  { %5095 = vrcp.f32 %v3478_v9  ;;  %v5146_v9 = vld [vmem:[%s6704_s6 + $0x68] ss:$12 sps:$4 sm:$0xff]  }
 0xd50   :  { %5097 = vrcp.f32 %v3485_v22  ;;  %v5148_v22 = vld [vmem:[%s6704_s6 + $0x78] ss:$12 sps:$4 sm:$0xff]  }
 0xd59   :  { %v5096_v60 = vpop.eup %5095 }
 0xd5a   :  { %v3489_v58 = vmul.f32 %v5096_v60, %v3488_v29  ;;  %v5098_v5 = vpop.eup %5097  ;;  %v5149_v29 = vld [vmem:[%s6704_s6 + $0x80] ss:$12 sps:$4 sm:$0xff]  }
 0xd5b   :  { %v3492_v13 = vsub.f32 1.0, %v5098_v5  ;;  %v3494_v27 = vmul.f32 %v5098_v5, %v6464_v15  ;;  %v5150_v60 = vld [vmem:[%s6704_s6 + $0x94] ss:$12 sps:$4 sm:$0xff]  }
 0xd5c   :  { %v3490_v30 = vadd.f32 %v3489_v58, %v2757_v12  ;;  %v5151_v12 = vld [vmem:[%s6704_s6 + $0x90] ss:$12 sps:$4 sm:$0xff]   ;;  %v5152_v58 = vld [vmem:[%s6704_s6 + $0x98] ss:$12 sps:$4 sm:$0xff]   ;;  %v5154_v5 = vld [vmem:[%s6704_s6 + $0xa8] ss:$12 sps:$4 sm:$0xff]  }
 0xd5e   :  { %5099 = vtanh.f32 %v3490_v30  ;;  %v5153_v30 = vld [vmem:[%s6704_s6 + $0xac] ss:$12 sps:$4 sm:$0xff]  }
 0xd68   :  { %v5100_v47 = vpop.eup %5099 }
 0xd69   :  { %v3493_v51 = vmul.f32 %v5100_v47, %v3492_v13  ;;  %v5155_v13 = vld [vmem:[%s6704_s6 + $0xb0] ss:$12 sps:$4 sm:$0xff]   ;;  %v6726_v47 = vld [vmem:[#allocation4_spill] sm:$0xff] }
 0xd6b   :  { %v6511_v33 = vadd.f32 %v3494_v27, %v3493_v51  ;;  %v2698_v51 = vadd.f32 %v6726_v47, %v6297_v55  ;;  %v6727_v27 = vld [vmem:[#allocation6_spill] sm:$0xff] }
 0xd6d   :  { %v3499_v50 = vpack.c.bf16 %v6511_v33, %v6511_v33 }
 0xd6f   :  { %3533 = vmatmul.mubr.bf16.vlgmr.msra.gmra.mrb[84].mxu0 %v3499_v50  ;;  %4717 = vmatmul.mubr.bf16.vlgmr.msra.gmra.mrb[68].mxu1 %v3499_v50 }
 0xd70   :  { %3608 = vmatpush1.bf16.msra.mxu0 %v6055_v35  ;;  %4721 = vmatpush3.bf16.msra.mxu1 %v6127_v2  ;;  %v5132_v35 = vld [vmem:[%s6704_s6 + $0x4] ss:$12 sps:$4 sm:$0xff]  }
 0xd71   :  { %3609 = vmatprep.subr.bf16.mxu0 %v6062_v25  ;;  %4722 = vmatprep.subr.bf16.mxu1 %v6724_v61  ;;  %v2692_v25 = vadd.f32 %v6236_v54, %v6297_v55 }
 0xd72   :  { %3639 = vmatprep.mubr.bf16.mxu0 %v6725_v23  ;;  %4736 = vmatprep.mubr.msk.bf16.mxu1 %vm5158_vm1, %v6724_v61 }
 0xd74   :  { %3610 = vmatpush1.bf16.msra.mxu0 %v6067_v31  ;;  %4723 = vmatpush3.bf16.msra.mxu1 %v6151_v63  ;;  %v2694_v31 = vadd.f32 %v6238_v41, %v6305_v10 }
 0xd75   :  { %3611 = vmatprep.subr.bf16.mxu0 %v6074_v19  ;;  %4724 = vmatprep.subr.bf16.mxu1 %v6724_v61 }
 0xd78   :  { %3612 = vmatpush1.bf16.msra.mxu0 %v6079_v24  ;;  %4725 = vmatpush3.bf16.msra.mxu1 %v6160_v17 }
 0xd79   :  { %3613 = vmatprep.subr.bf16.mxu0 %v6086_v28  ;;  %4726 = vmatprep.subr.bf16.mxu1 %v6724_v61 }
 0xd7c   :  { %3614 = vmatpush1.bf16.msra.mxu0 %v6092_v32  ;;  %4727 = vmatpush3.bf16.msra.mxu1 %v6167_v42 }
 0xd7d   :  { %3615 = vmatprep.subr.bf16.mxu0 %v6098_v34  ;;  %4728 = vmatprep.subr.bf16.mxu1 %v6724_v61 }
 0xd80   :  { %3616 = vmatpush1.bf16.msra.mxu0 %v6103_v37  ;;  %4729 = vmatpush3.bf16.msra.mxu1 %v6174_v59 }
 0xd81   :  { %3617 = vmatprep.subr.bf16.mxu0 %v6110_v26  ;;  %4730 = vmatprep.subr.bf16.mxu1 %v6724_v61 }
 0xd84   :  { %3618 = vmatpush1.bf16.msra.mxu0 %v6116_v14  ;;  %4731 = vmatpush3.bf16.msra.mxu1 %v6181_v62 }
 0xd85   :  { %3619 = vmatprep.subr.bf16.mxu0 %v6122_v53  ;;  %4732 = vmatprep.subr.bf16.mxu1 %v6724_v61 }
 0xd88   :  { %3620 = vmatpush1.bf16.msra.mxu0 %v6132_v36  ;;  %4733 = vmatpush3.bf16.msra.mxu1 %v6188_v52  ;;  %v2760_v52 = vadd.f32 %v6301_v43, %v6318_v56  ;;  %v5133_v43 = vld [vmem:[%s6704_s6] ss:$12 sps:$4 sm:$0xff]  }
 0xd89   :  { %3621 = vmatprep.subr.bf16.mxu0 %v6140_v4  ;;  %4734 = vmatprep.subr.bf16.mxu1 %v6724_v61 }
 0xd8c   :  { %3622 = vmatpush1.bf16.msra.mxu0 %v6146_v40  ;;  %4735 = vmatpush3.bf16.msra.mxu1 %v6195_v11 }
 0xd8d   :  { %3714 = vmatprep.subr.bf16.mxu0 %v5132_v35  ;;  %4740 = vmatprep.subr.bf16.mxu1 %v6724_v61 }
 0xe42   :  { %v3534_v19 = vpop.f32.mrb[84].mxu0  ;;  %v3575_v24 = vpop.f32.mrb[68].mxu1 }
 0xe43   :  { %v3581_v28 = vadd.f32 %v3534_v19, %v2692_v25  ;;  %v3536_v32 = vpop.f32.mrb[85].mxu0  ;;  %v4718_v34 = vpop.f32.mrb[69].mxu1  ;;  %v3595_v59 = vadd.f32 %v6314_v44, %v3575_v24 }
 0xe44   :  { %v3588_v37 = vadd.f32 %v3536_v32, %v2694_v31  ;;  %v3538_v26 = vpop.f32.mrb[86].mxu0  ;;  %v3578_v14 = vpop.f32.mrb[70].mxu1 }
 0xe45   :  { %v4221_v53 = vmul.f32 -1.442695, %v3581_v28  ;;  %v3539_v2 = vpop.f32.mrb[87].mxu0  ;;  %v4719_v36 = vpop.f32.mrb[71].mxu1 }
 0xe46   :  { %v4222_v4 = vmul.f32 -1.442695, %v3588_v37 }
 0xe47   :  { %5101 = vpow2.f32 %v4221_v53 }
 0xe48   :  { %5103 = vpow2.f32 %v4222_v4 }
 0xe51   :  { %v5102_v40 = vpop.eup %5101 }
 0xe52   :  { %v3585_v63 = vadd.f32 1.0, %v5102_v40  ;;  %v5104_v17 = vpop.eup %5103 }
 0xe53   :  { %v3592_v42 = vadd.f32 1.0, %v5104_v17  ;;  %v6728_v17 = vld [vmem:[#allocation5_spill] sm:$0xff] }
 0xe54   :  { %5105 = vrcp.f32 %v3585_v63 }
 0xe55   :  { %5107 = vrcp.f32 %v3592_v42  ;;  %v2765_v42 = vadd.f32 %v6728_v17, %v6318_v56 }
 0xe5e   :  { %v5106_v62 = vpop.eup %5105 }
 0xe5f   :  { %v3596_v11 = vmul.f32 %v5106_v62, %v3595_v59  ;;  %v5108_v41 = vpop.eup %5107 }
 0xe60   :  { %v3599_v39 = vsub.f32 1.0, %v5108_v41  ;;  %v3601_v18 = vmul.f32 %v5108_v41, %v6511_v33  ;;  %v2700_v33 = vadd.f32 %v6727_v27, %v6305_v10 }
 0xe61   :  { %v3597_v54 = vadd.f32 %v3596_v11, %v2760_v52 }
 0xe63   :  { %5109 = vtanh.f32 %v3597_v54 }
 0xe6d   :  { %v5110_v15 = vpop.eup %5109 }
 0xe6e   :  { %v3600_v45 = vmul.f32 %v5110_v15, %v3599_v39 }
 0xe70   :  { %v6560_v0 = vadd.f32 %v3601_v18, %v3600_v45  ;;  %v4963_v18 = vld [vmem:[%s6707_s9] sm:$0xff]  }
 0xe72   :  { %v3606_v48 = vpack.c.bf16 %v6560_v0, %v6560_v0 }
 0xe74   :  { %3640 = vmatmul.mubr.bf16.vlgmr.msra.gmra.mrb[88].mxu0 %v3606_v48  ;;  %4737 = vmatmul.mubr.bf16.vlgmr.msra.gmra.mrb[72].mxu1 %v3606_v48  ;;  %v4964_v48 = vld [vmem:[%s6707_s9 + $0x8] sm:$0xff]  }
 0xe75   :  { %3715 = vmatpush1.bf16.msra.mxu0 %v5133_v43  ;;  %4741 = vmatpush3.bf16.msra.mxu1 %v5134_v49  ;;  %v4966_v43 = vld [vmem:[%s6707_s9 + $0x18] sm:$0xff]   ;;  %v4967_v49 = vld [vmem:[%s6707_s9 + $0x20] sm:$0xff]  }
 0xe76   :  { %3716 = vmatprep.subr.bf16.mxu0 %v5135_v16  ;;  %4742 = vmatprep.subr.bf16.mxu1 %v6724_v61  ;;  %v4968_v16 = vld [vmem:[%s6707_s9 + $0x28] sm:$0xff]  }
 0xe77   :  { %3746 = vmatprep.mubr.bf16.mxu0 %v6725_v23  ;;  %4756 = vmatprep.mubr.msk.bf16.mxu1 %vm5158_vm1, %v6724_v61  ;;  %v5139_v23 = vld [vmem:[%s6704_s6 + $0x30] ss:$12 sps:$4 sm:$0xff]  }
 0xe79   :  { %3717 = vmatpush1.bf16.msra.mxu0 %v5136_v57  ;;  %4743 = vmatpush3.bf16.msra.mxu1 %v5137_v21  ;;  %v4969_v57 = vld [vmem:[%s6707_s9 + $0x30] sm:$0xff]   ;;  %v4970_v21 = vld [vmem:[%s6707_s9 + $0x38] sm:$0xff]  }
 0xe7a   :  { %3718 = vmatprep.subr.bf16.mxu0 %v5138_v1  ;;  %4744 = vmatprep.subr.bf16.mxu1 %v6724_v61  ;;  %v6729_v1 = vld [vmem:[#allocation7_spill] sm:$0xff] }
 0xe7d   :  { %3719 = vmatpush1.bf16.msra.mxu0 %v5139_v23  ;;  %4745 = vmatpush3.bf16.msra.mxu1 %v5140_v6  ;;  %v2702_v23 = vadd.f32 %v6729_v1, %v6297_v55  ;;  %v6730_v6 = vld [vmem:[#allocation9_spill] sm:$0xff] }
 0xe7e   :  { %3720 = vmatprep.subr.bf16.mxu0 %v5141_v38  ;;  %4746 = vmatprep.subr.bf16.mxu1 %v6724_v61  ;;  %v2704_v38 = vadd.f32 %v6730_v6, %v6305_v10 }
 0xe81   :  { %3721 = vmatpush1.bf16.msra.mxu0 %v5142_v46  ;;  %4747 = vmatpush3.bf16.msra.mxu1 %v5143_v3 }
 0xe82   :  { %3722 = vmatprep.subr.bf16.mxu0 %v5144_v7  ;;  %4748 = vmatprep.subr.bf16.mxu1 %v6724_v61 }
 0xe85   :  { %3723 = vmatpush1.bf16.msra.mxu0 %v5145_v20  ;;  %4749 = vmatpush3.bf16.msra.mxu1 %v5146_v9 }
 0xe86   :  { %3724 = vmatprep.subr.bf16.mxu0 %v5147_v8  ;;  %4750 = vmatprep.subr.bf16.mxu1 %v6724_v61 }
 0xe89   :  { %3725 = vmatpush1.bf16.msra.mxu0 %v5148_v22  ;;  %4751 = vmatpush3.bf16.msra.mxu1 %v5149_v29 }
 0xe8a   :  { %3726 = vmatprep.subr.bf16.mxu0 %v5150_v60  ;;  %4752 = vmatprep.subr.bf16.mxu1 %v6724_v61 }
 0xe8d   :  { %3727 = vmatpush1.bf16.msra.mxu0 %v5151_v12  ;;  %4753 = vmatpush3.bf16.msra.mxu1 %v5152_v58 }
 0xe8e   :  { %3728 = vmatprep.subr.bf16.mxu0 %v5153_v30  ;;  %4754 = vmatprep.subr.bf16.mxu1 %v6724_v61 }
 0xe91   :  { %3729 = vmatpush1.bf16.msra.mxu0 %v5154_v5  ;;  %4755 = vmatpush3.bf16.msra.mxu1 %v5155_v13 }
 0xe92   :  { %4760 = vmatprep.subr.bf16.mxu0 %v6724_v61 }
 0xf47   :  { %v3641_v50 = vpop.f32.mrb[88].mxu0  ;;  %v3682_v35 = vpop.f32.mrb[72].mxu1 }
 0xf48   :  { %v3688_v25 = vadd.f32 %v3641_v50, %v2698_v51  ;;  %v3643_v31 = vpop.f32.mrb[89].mxu0  ;;  %v4738_v19 = vpop.f32.mrb[73].mxu1  ;;  %v3702_v40 = vadd.f32 %v6314_v44, %v3682_v35  ;;  %v6731_v51 = vld [vmem:[#allocation8_spill] sm:$0xff] }
 0xf49   :  { %v3695_v24 = vadd.f32 %v3643_v31, %v2700_v33  ;;  %v3645_v28 = vpop.f32.mrb[90].mxu0  ;;  %v3685_v32 = vpop.f32.mrb[74].mxu1  ;;  %v2768_v27 = vadd.f32 %v6731_v51, %v6318_v56 }
 0xf4a   :  { %v4223_v34 = vmul.f32 -1.442695, %v3688_v25  ;;  %v3646_v37 = vpop.f32.mrb[91].mxu0  ;;  %v4739_v26 = vpop.f32.mrb[75].mxu1 }
 0xf4b   :  { %v4224_v14 = vmul.f32 -1.442695, %v3695_v24 }
 0xf4c   :  { %5111 = vpow2.f32 %v4223_v34 }
 0xf4d   :  { %5113 = vpow2.f32 %v4224_v14 }
 0xf56   :  { %v5112_v53 = vpop.eup %5111 }
 0xf57   :  { %v3692_v2 = vadd.f32 1.0, %v5112_v53  ;;  %v5114_v36 = vpop.eup %5113 }
 0xf58   :  { %v3699_v4 = vadd.f32 1.0, %v5114_v36 }
 0xf59   :  { %5115 = vrcp.f32 %v3692_v2 }
 0xf5a   :  { %5117 = vrcp.f32 %v3699_v4 }
 0xf63   :  { %v5116_v63 = vpop.eup %5115 }
 0xf64   :  { %v3703_v59 = vmul.f32 %v5116_v63, %v3702_v40  ;;  %v5118_v52 = vpop.eup %5117 }
 0xf65   :  { %v3706_v11 = vsub.f32 1.0, %v5118_v52  ;;  %v3708_v39 = vmul.f32 %v5118_v52, %v6560_v0  ;;  %v4965_v0 = vld [vmem:[%s6707_s9 + $0x10] sm:$0xff]  }
 0xf66   :  { %v3704_v62 = vadd.f32 %v3703_v59, %v2765_v42 }
 0xf68   :  { %5119 = vtanh.f32 %v3704_v62 }
 0xf72   :  { %v5120_v54 = vpop.eup %5119 }
 0xf73   :  { %v3707_v41 = vmul.f32 %v5120_v54, %v3706_v11 }
 0xf75   :  { %v3709_v15 = vadd.f32 %v3708_v39, %v3707_v41 }
 0xf77   :  { %v3713_v45 = vpack.c.bf16 %v3709_v15, %v3709_v15 }
 0xf79   :  { %3747 = vmatmul.mubr.bf16.vlgmr.msra.gmra.mrb[92].mxu0 %v3713_v45  ;;  %4757 = vmatmul.mubr.bf16.vlgmr.msra.gmra.mrb[76].mxu1 %v3713_v45 }
 0xf7a   :  { %4776 = vmatprep.mubr.msk.bf16.mxu0 %vm5158_vm1, %v6724_v61  ;;  %4761 = vmatpush3.bf16.msra.mxu0 %v4963_v18 }
 0xf7b   :  { %4762 = vmatprep.subr.bf16.mxu0 %v6724_v61 }
 0xf7e   :  { %4763 = vmatpush3.bf16.msra.mxu0 %v4964_v48 }
 0xf7f   :  { %4764 = vmatprep.subr.bf16.mxu0 %v6724_v61 }
 0xf82   :  { %4765 = vmatpush3.bf16.msra.mxu0 %v4965_v0 }
 0xf83   :  { %4766 = vmatprep.subr.bf16.mxu0 %v6724_v61 }
 0xf86   :  { %4767 = vmatpush3.bf16.msra.mxu0 %v4966_v43 }
 0xf87   :  { %4768 = vmatprep.subr.bf16.mxu0 %v6724_v61 }
 0xf8a   :  { %4769 = vmatpush3.bf16.msra.mxu0 %v4967_v49 }
 0xf8b   :  { %4770 = vmatprep.subr.bf16.mxu0 %v6724_v61 }
 0xf8e   :  { %4771 = vmatpush3.bf16.msra.mxu0 %v4968_v16 }
 0xf8f   :  { %4772 = vmatprep.subr.bf16.mxu0 %v6724_v61 }
 0xf92   :  { %4773 = vmatpush3.bf16.msra.mxu0 %v4969_v57 }
 0xf93   :  { %4774 = vmatprep.subr.bf16.mxu0 %v6724_v61 }
 0xf96   :  { %4775 = vmatpush3.bf16.msra.mxu0 %v4970_v21 }
0x104c   :  { %v3748_v46 = vpop.f32.mrb[92].mxu0  ;;  %v3789_v3 = vpop.f32.mrb[76].mxu1 }
0x104d   :  { %v3795_v7 = vadd.f32 %v3748_v46, %v2702_v23  ;;  %v3750_v20 = vpop.f32.mrb[93].mxu0  ;;  %v4758_v9 = vpop.f32.mrb[77].mxu1  ;;  %v3809_v10 = vadd.f32 %v6314_v44, %v3789_v3  ;;  %v4227_v44 = vld [vmem:[%s6708_s10] ss:$0 sm:$0xff] }
0x104e   :  { %v3802_v8 = vadd.f32 %v3750_v20, %v2704_v38  ;;  %v3752_v22 = vpop.f32.mrb[94].mxu0  ;;  %v3792_v29 = vpop.f32.mrb[78].mxu1 }
0x104f   :  { %v4225_v60 = vmul.f32 -1.442695, %v3795_v7  ;;  %v3753_v12 = vpop.f32.mrb[95].mxu0  ;;  %v4759_v58 = vpop.f32.mrb[79].mxu1 }
0x1050   :  { %v4226_v61 = vmul.f32 -1.442695, %v3802_v8 }
0x1051   :  { %5121 = vpow2.f32 %v4225_v60 }
0x1052   :  { %5123 = vpow2.f32 %v4226_v61 }
0x105b   :  { %v5122_v30 = vpop.eup %5121 }
0x105c   :  { %v3799_v5 = vadd.f32 1.0, %v5122_v30  ;;  %v5124_v55 = vpop.eup %5123 }
0x105d   :  { %v3806_v13 = vadd.f32 1.0, %v5124_v55 }
0x105e   :  { %5125 = vrcp.f32 %v3799_v5 }
0x105f   :  { %5127 = vrcp.f32 %v3806_v13 }
0x1068   :  { %v5126_v47 = vpop.eup %5125 }
0x1069   :  { %v3810_v33 = vmul.f32 %v5126_v47, %v3809_v10  ;;  %v5128_v35 = vpop.eup %5127 }
0x106a   :  { %v3813_v25 = vsub.f32 1.0, %v5128_v35  ;;  %v3815_v24 = vmul.f32 %v5128_v35, %v3709_v15 }
0x106b   :  { %v3811_v50 = vadd.f32 %v3810_v33, %v2768_v27 }
0x106d   :  { %5129 = vtanh.f32 %v3811_v50 }
0x1077   :  { %v5130_v31 = vpop.eup %5129 }
0x1078   :  { %v3814_v19 = vmul.f32 %v5130_v31, %v3813_v25 }
0x107a   :  { %v3816_v28 = vadd.f32 %v3815_v24, %v3814_v19 }
0x107c   :  { %v3817_v32 = vpack.c.bf16 %v3816_v28, %v3816_v28 }
0x107e   :  { %4777 = vmatmul.mubr.bf16.vlgmr.msra.gmra.mrb[96].mxu0 %v3817_v32 }
0x1151   :  { %v3923_v34 = vpop.f32.mrb[96].mxu0 }
0x1152   :  { %v3924_v37 = vadd.f32 %v4227_v44, %v3923_v34  ;;  %v4778_v56 = vpop.f32.mrb[97].mxu0 }
0x1153   :  { %v3926_v26 = vpop.f32.mrb[98].mxu0 }
0x1154   :  { %3930 = vst.msk [vmem:[%s6709_s11] sm:$0xff] %vm3929_vm2, %v3924_v37  ;;  %v4779_v14 = vpop.f32.mrb[99].mxu0 }

</bundles_post_ra>
